<compile_context>
chip_gen: v7x
topology: tpu7x:2x2x1
jax: 0.10.0
libtpu: 0.0.40
codegen_flags: <defaults>
</compile_context>

<pallas_src>
import math
import functools

import numpy as np
import jax
import jax.numpy as jnp
from jax.experimental import pallas as pl
from jax.experimental.pallas import tpu as pltpu

_BF16 = jnp.bfloat16


# ----------------------------------------------------------------------------
# Host-built constants (built once per trace; shared by the fused kernels)
# ----------------------------------------------------------------------------

def moving_avg_matrix(L, k):
    """AvgPool1d(kernel=k, stride=1) with edge-replication padding, as LxL op."""
    pad = (k - 1) // 2
    M = np.zeros((L, L), np.float64)
    for t in range(L):
        for j in range(k):
            s = min(max(t + j - pad, 0), L - 1)
            M[t, s] += 1.0 / k
    return jnp.asarray(M.astype(np.float32))


def corr_constants(L):
    """rfft-symmetric DFT operators + delay-shift matrix for AutoCorrelation.

    cf[f,t] = cos(2*pi*f*t/L), sf[f,t] = sin(2*pi*f*t/L) for f in [0, L//2]
    ci[t,f] = w_f*cos(2*pi*f*t/L)/L, si analogous (w_f = 1 for DC/Nyquist, 2 else)
    shift[t,s] = (s - t) mod L   (delay-aggregation selector)
    """
    F = L // 2 + 1
    f = np.arange(F)[:, None]
    t = np.arange(L)[None, :]
    ang = 2.0 * np.pi * f * t / L
    cf = np.cos(ang)
    sf = np.sin(ang)
    w = np.full((F,), 2.0)
    w[0] = 1.0
    if L % 2 == 0:
        w[-1] = 1.0
    ci = (cf * w[:, None]).T / L
    si = (sf * w[:, None]).T / L
    s_ = np.arange(L)[None, :]
    t_ = np.arange(L)[:, None]
    shift = (s_ - t_) % L
    return dict(cf=jnp.asarray(cf.astype(np.float32)),
                sf=jnp.asarray(sf.astype(np.float32)),
                ci=jnp.asarray(ci.astype(np.float32)),
                si=jnp.asarray(si.astype(np.float32)),
                shift=jnp.asarray(shift.astype(np.int32)))


def _check_corr_constants(L=16, D=4, seed=0):
    """Host-side numpy check of the DFT correlation path vs np.fft (cheap)."""
    rng = np.random.RandomState(seed)
    q = rng.randn(L, D)
    k = rng.randn(L, D)
    ref = np.fft.irfft(np.fft.rfft(q, axis=0) * np.conj(np.fft.rfft(k, axis=0)),
                       n=L, axis=0).mean(-1)
    cc = corr_constants(L)
    cf = np.asarray(cc["cf"], np.float64)
    sf = np.asarray(cc["sf"], np.float64)
    ci = np.asarray(cc["ci"], np.float64)
    si = np.asarray(cc["si"], np.float64)
    qr, qi = cf @ q, sf @ q
    kr, ki = cf @ k, sf @ k
    re = qr * kr + qi * ki
    im = qr * ki - qi * kr
    mv = (ci @ re.sum(-1, keepdims=True) - si @ im.sum(-1, keepdims=True))[:, 0] / D
    assert np.allclose(mv, ref, atol=1e-4), float(np.abs(mv - ref).max())


# ----------------------------------------------------------------------------
# In-kernel helpers (traced values)
# ----------------------------------------------------------------------------

def _bdot(a, b):
    """bf16 MXU matmul with f32 accumulation."""
    return jnp.dot(a.astype(_BF16), b.astype(_BF16),
                   preferred_element_type=jnp.float32)


def _roll_time(x, delta):
    """y[t] = x[(t + delta) % L]  (sublane roll on the XLU, static delta)."""
    return pltpu.roll(x, shift=(-delta) % x.shape[0], axis=0)


def _split_b(x_flat, Bb, L):
    return [x_flat[b * L:(b + 1) * L] for b in range(Bb)]


def _cat_b(parts):
    return parts[0] if len(parts) == 1 else jnp.concatenate(parts, axis=0)


def _decomp_trend(x_flat, ma_bf, Bb, L):
    """moving-average trend per batch element; ma_bf is (L, L) bf16."""
    return _cat_b([_bdot(ma_bf, xb) for xb in _split_b(x_flat, Bb, L)])


def _my_layernorm(x_flat, gamma, beta, Bb, L):
    """my_Layernorm: LayerNorm(d_model) then subtract per-batch time mean."""
    mu = jnp.mean(x_flat, axis=-1, keepdims=True)
    xc = x_flat - mu
    var = jnp.mean(xc * xc, axis=-1, keepdims=True)
    xh = xc * jax.lax.rsqrt(var + 1e-5) * gamma + beta
    return _cat_b([xb - jnp.mean(xb, axis=0, keepdims=True)
                   for xb in _split_b(xh, Bb, L)])


def _autocorr(q, k, v, cfb, sfb, ci, si, shift, top_k):
    """AutoCorrelation (eval / inference aggregation path) for one batch element.

    q: (L, D), k/v: (S, D).  The circular cross-correlation is computed with
    rfft-symmetric DFT matmuls on the MXU (identical to torch.fft.rfft/irfft of
    Q*conj(K) for real inputs); only the head+channel-mean correlation (the only
    statistic the reference uses) is inverse-transformed.  Heads stay fused in
    D = d_model (the per-head split of the reference is a no-op here).
    """
    L, D = q.shape
    S = k.shape[0]
    if L > S:                                   # reference pads keys/values
        pad = jnp.zeros((L - S, D), jnp.float32)
        k = jnp.concatenate([k, pad], axis=0)
        v = jnp.concatenate([v, pad], axis=0)
    elif L < S:                                 # reference truncates
        k = k[:L]
        v = v[:L]

    # forward rFFT (bf16 MXU, f32 accumulation)
    qb = q.astype(_BF16)
    kb = k.astype(_BF16)
    qr = jnp.dot(cfb, qb, preferred_element_type=jnp.float32)
    qi = jnp.dot(sfb, qb, preferred_element_type=jnp.float32)
    kr = jnp.dot(cfb, kb, preferred_element_type=jnp.float32)
    ki = jnp.dot(sfb, kb, preferred_element_type=jnp.float32)
    re = qr * kr + qi * ki                      # Re{Q * conj(K)}  (F, D)
    im = qr * ki - qi * kr                      # Im{Q * conj(K)}
    rs = jnp.sum(re, axis=-1, keepdims=True)    # (F, 1)
    ims = jnp.sum(im, axis=-1, keepdims=True)
    # channel-mean correlation (1/L folded into ci/si), kept in f32
    mv = (jnp.dot(ci, rs, preferred_element_type=jnp.float32)
          - jnp.dot(si, ims, preferred_element_type=jnp.float32)) * (1.0 / D)  # (L, 1)

    # top-k delays (iterative max) + softmax over their correlations (f32)
    NEG = jnp.float32(-1e30)
    tau = jax.lax.broadcasted_iota(jnp.int32, (L, 1), 0)
    work = mv
    sel_w, sel_d = [], []
    for _ in range(top_k):
        w_i = jnp.max(work, keepdims=True)                  # (1, 1)
        d_i = jnp.min(jnp.where(work >= w_i, tau, L), keepdims=True)
        sel_w.append(w_i)
        sel_d.append(d_i)
        work = jnp.where(tau == d_i, NEG, work)
    m = sel_w[0]
    for w in sel_w[1:]:
        m = jnp.maximum(m, w)
    exps = [jnp.exp(w - m) for w in sel_w]
    denom = exps[0]
    for e in exps[1:]:
        denom = denom + e
    inv = 1.0 / denom

    # delay aggregation: out[t] = sum_i softmax_i * v[(t + delay_i) % L]
    # (shift is the host-built (s - t) mod L matrix)
    wagg = jnp.zeros((L, L), jnp.float32)
    for e, d_i in zip(exps, sel_d):
        wagg = wagg + (e * inv) * (shift == d_i).astype(jnp.float32)
    return _bdot(wagg, v)


# ----------------------------------------------------------------------------
# Fused Pallas kernels (one per encoder / decoder stack)
# ----------------------------------------------------------------------------

def _encoder_kernel(x_ref, mark_ref, cf_ref, sf_ref, ci_ref, si_ref,
                    ma_ref, shift_ref, wemb_ref, gamma_ref, beta_ref,
                    *rest, Bb, L, top_k, n_layers):
    o_ref = rest[-1]
    layer_refs = rest[:-1]                      # 6 refs per encoder layer

    cfb = cf_ref[...].astype(_BF16)
    sfb = sf_ref[...].astype(_BF16)
    ci = ci_ref[...]
    si = si_ref[...]
    ma = ma_ref[...].astype(_BF16)
    shift = shift_ref[...]

    x = x_ref[...]                              # (Bb, L, C)
    mark = mark_ref[...]                        # (Bb, L, Dm)

    # DataEmbedding_wo_pos: circular TokenEmbedding(k=3) + timeF Linear fused
    # into one matmul (lane-concat [x(t-1) | x(t) | x(t+1) | mark]).
    emb_rows = []
    for b in range(Bb):
        xb = x[b]
        emb_rows.append(jnp.concatenate(
            [_roll_time(xb, -1), xb, _roll_time(xb, +1), mark[b]], axis=-1))
    h = _bdot(_cat_b(emb_rows), wemb_ref[...])  # (Bb*L, D)
    D = h.shape[-1]

    for li in range(n_layers):
        wqkv, bqkv, wo, bo, w1, w2 = layer_refs[6 * li:6 * li + 6]

        # AutoCorrelation self-attention: shared-weight projections flattened
        # over batch, per-batch correlation / aggregation.
        qkv = _bdot(h, wqkv[...]) + bqkv[...]                 # (Bb*L, 3D)
        attn = _cat_b([
            _autocorr(qkv[b * L:(b + 1) * L, 0:D],
                      qkv[b * L:(b + 1) * L, D:2 * D],
                      qkv[b * L:(b + 1) * L, 2 * D:3 * D],
                      cfb, sfb, ci, si, shift, top_k)
            for b in range(Bb)])
        h = h + _bdot(attn, wo[...]) + bo[...]

        # series_decomp 1 (keep seasonal part)
        h = h - _decomp_trend(h, ma, Bb, L)

        # position-wise FFN (Conv1d k=1, no bias, relu)
        y = jnp.maximum(_bdot(h, w1[...]), 0.0)
        y = _bdot(y, w2[...])

        # series_decomp 2
        s = h + y
        h = s - _decomp_trend(s, ma, Bb, L)

    # Encoder-level my_Layernorm
    h = _my_layernorm(h, gamma_ref[...], beta_ref[...], Bb, L)
    for b in range(Bb):
        o_ref[b] = h[b * L:(b + 1) * L]


def _decoder_kernel(xenc_ref, mark_ref, enc_ref,
                    cf_ref, sf_ref, ci_ref, si_ref, ma_d_ref, shift_ref, ma_e_ref,
                    wemb_ref, gamma_ref, beta_ref, pw_ref, pb_ref,
                    *rest, Bb, Le, Ld, label_len, pred_len, top_k, n_layers):
    o_ref = rest[-1]
    layer_refs = rest[:-1]                      # 13 refs per decoder layer

    cfb = cf_ref[...].astype(_BF16)
    sfb = sf_ref[...].astype(_BF16)
    ci = ci_ref[...]
    si = si_ref[...]
    ma_d = ma_d_ref[...].astype(_BF16)
    ma_e = ma_e_ref[...].astype(_BF16)
    shift = shift_ref[...]

    x_enc = xenc_ref[...]                       # (Bb, Le, C)
    mark = mark_ref[...]                        # (Bb, Ld, Dm)
    enc_flat = enc_ref[...].reshape(Bb * Le, -1)  # (Bb*Le, D)
    C = x_enc.shape[-1]

    # --- decoder init: series_decomp of x_enc + label/pred-window glue ------
    seas_b, trend_rows = [], []
    for b in range(Bb):
        xe = x_enc[b]
        tr = _bdot(ma_e, xe)                    # trend of x_enc      (Le, C)
        se = xe - tr                            # seasonal of x_enc
        mean_b = jnp.mean(xe, axis=0, keepdims=True)
        trend_rows.append(jnp.concatenate(
            [tr[Le - label_len:], jnp.broadcast_to(mean_b, (pred_len, C))], axis=0))
        seas_b.append(jnp.concatenate(
            [se[Le - label_len:], jnp.zeros((pred_len, C), jnp.float32)], axis=0))
    trend = _cat_b(trend_rows)                  # accumulated trend (Bb*Ld, C)

    # DataEmbedding_wo_pos of seasonal_init (fused conv taps + timeF linear)
    emb_rows = []
    for b in range(Bb):
        sb = seas_b[b]
        emb_rows.append(jnp.concatenate(
            [_roll_time(sb, -1), sb, _roll_time(sb, +1), mark[b]], axis=-1))
    h = _bdot(_cat_b(emb_rows), wemb_ref[...])  # (Bb*Ld, D)
    D = h.shape[-1]

    for li in range(n_layers):
        (swqkv, sbqkv, swo, sbo, cwq, cbq, cwkv, cbkv, cwo, cbo,
         w1, w2, wtr) = layer_refs[13 * li:13 * li + 13]

        # --- self attention + decomp1 ---
        qkv = _bdot(h, swqkv[...]) + sbqkv[...]
        attn = _cat_b([
            _autocorr(qkv[b * Ld:(b + 1) * Ld, 0:D],
                      qkv[b * Ld:(b + 1) * Ld, D:2 * D],
                      qkv[b * Ld:(b + 1) * Ld, 2 * D:3 * D],
                      cfb, sfb, ci, si, shift, top_k)
            for b in range(Bb)])
        h = h + _bdot(attn, swo[...]) + sbo[...]
        t1 = _decomp_trend(h, ma_d, Bb, Ld)
        h = h - t1

        # --- cross attention + decomp2 ---
        q_all = _bdot(h, cwq[...]) + cbq[...]                   # (Bb*Ld, D)
        kv_all = _bdot(enc_flat, cwkv[...]) + cbkv[...]         # (Bb*Le, 2D)
        attn = _cat_b([
            _autocorr(q_all[b * Ld:(b + 1) * Ld],
                      kv_all[b * Le:(b + 1) * Le, 0:D],
                      kv_all[b * Le:(b + 1) * Le, D:2 * D],
                      cfb, sfb, ci, si, shift, top_k)
            for b in range(Bb)])
        h = h + _bdot(attn, cwo[...]) + cbo[...]
        t2 = _decomp_trend(h, ma_d, Bb, Ld)
        h = h - t2

        # --- FFN + decomp3 ---
        y = jnp.maximum(_bdot(h, w1[...]), 0.0)
        y = _bdot(y, w2[...])
        s = h + y
        t3 = _decomp_trend(s, ma_d, Bb, Ld)
        h = s - t3

        # --- residual trend: circular Conv1d(d_model->c_out, k=3, no bias) ---
        rt = t1 + t2 + t3                                       # (Bb*Ld, D)
        conv_rows = []
        for b in range(Bb):
            rb = rt[b * Ld:(b + 1) * Ld]
            conv_rows.append(jnp.concatenate(
                [_roll_time(rb, -1), rb, _roll_time(rb, +1)], axis=-1))
        trend = trend + _bdot(_cat_b(conv_rows), wtr[...])

    # --- decoder tail: my_Layernorm + Linear(d_model->c_out) + trend add ----
    # (only the last pred_len rows are computed / stored — all the model returns)
    h = _my_layernorm(h, gamma_ref[...], beta_ref[...], Bb, Ld)
    tail = _cat_b([h[b * Ld + Ld - pred_len:(b + 1) * Ld] for b in range(Bb)])
    ttl = _cat_b([trend[b * Ld + Ld - pred_len:(b + 1) * Ld] for b in range(Bb)])
    out = _bdot(tail, pw_ref[...]) + pb_ref[...] + ttl          # (Bb*pred_len, Ct)
    for b in range(Bb):
        o_ref[b] = out[b * pred_len:(b + 1) * pred_len]


# ----------------------------------------------------------------------------
# pallas_call wrappers
# ----------------------------------------------------------------------------

def _compiler_params():
    # TODO(synk): pipeline_mode=pl.Buffered(1) on the grid-invariant weight
    # specs would halve their VMEM footprint at production sizes.
    return pltpu.CompilerParams(dimension_semantics=("parallel",),
                                vmem_limit_bytes=48 * 1024 * 1024)


def _cspec(a):
    """Whole-array, grid-invariant BlockSpec for a constant / weight input."""
    return pl.BlockSpec(a.shape, lambda i, nd=a.ndim: (0,) * nd)


def encoder_forward(params, cc, ma, x_enc, x_mark_enc, *, top_k, bb):
    B, Le, C = x_enc.shape
    Dm = x_mark_enc.shape[-1]
    D = params["enc_norm"]["gamma"].shape[-1]
    Bb = B // bb
    layers = params["enc_layers"]

    const_args = [cc["cf"], cc["sf"], cc["ci"], cc["si"], ma, cc["shift"],
                  params["enc_emb_w"], params["enc_norm"]["gamma"],
                  params["enc_norm"]["beta"]]
    layer_args = []
    for lp in layers:
        at = lp["attn"]
        layer_args += [at["wqkv"], at["bqkv"], at["wo"], at["bo"],
                       lp["w1"], lp["w2"]]

    kernel = functools.partial(_encoder_kernel, Bb=Bb, L=Le,
                               top_k=top_k, n_layers=len(layers))
    return pl.pallas_call(
        kernel,
        grid=(bb,),
        in_specs=([pl.BlockSpec((Bb, Le, C), lambda i: (i, 0, 0)),
                   pl.BlockSpec((Bb, Le, Dm), lambda i: (i, 0, 0))]
                  + [_cspec(a) for a in const_args + layer_args]),
        out_specs=pl.BlockSpec((Bb, Le, D), lambda i: (i, 0, 0)),
        out_shape=jax.ShapeDtypeStruct((B, Le, D), jnp.float32),
        compiler_params=_compiler_params(),
    )(x_enc, x_mark_enc, *const_args, *layer_args)


def decoder_forward(params, cc, ma_d, ma_e, x_enc, x_mark_dec, enc_out, *,
                    label_len, pred_len, top_k, bb):
    B, Le, C = x_enc.shape
    Ld = label_len + pred_len
    Dm = x_mark_dec.shape[-1]
    D = enc_out.shape[-1]
    Ct = params["proj_w"].shape[-1]
    Bb = B // bb
    layers = params["dec_layers"]

    const_args = [cc["cf"], cc["sf"], cc["ci"], cc["si"], ma_d, cc["shift"], ma_e,
                  params["dec_emb_w"], params["dec_norm"]["gamma"],
                  params["dec_norm"]["beta"], params["proj_w"], params["proj_b"]]
    layer_args = []
    for lp in layers:
        sa, ca = lp["self_attn"], lp["cross_attn"]
        layer_args += [sa["wqkv"], sa["bqkv"], sa["wo"], sa["bo"],
                       ca["wq"], ca["bq"], ca["wkv"], ca["bkv"],
                       ca["wo"], ca["bo"], lp["w1"], lp["w2"], lp["wtrend"]]

    kernel = functools.partial(_decoder_kernel, Bb=Bb, Le=Le, Ld=Ld,
                               label_len=label_len, pred_len=pred_len,
                               top_k=top_k, n_layers=len(layers))
    return pl.pallas_call(
        kernel,
        grid=(bb,),
        in_specs=([pl.BlockSpec((Bb, Le, C), lambda i: (i, 0, 0)),
                   pl.BlockSpec((Bb, Ld, Dm), lambda i: (i, 0, 0)),
                   pl.BlockSpec((Bb, Le, D), lambda i: (i, 0, 0))]
                  + [_cspec(a) for a in const_args + layer_args]),
        out_specs=pl.BlockSpec((Bb, pred_len, Ct), lambda i: (i, 0, 0)),
        out_shape=jax.ShapeDtypeStruct((B, pred_len, Ct), jnp.float32),
        compiler_params=_compiler_params(),
    )(x_enc, x_mark_dec, enc_out, *const_args, *layer_args)


# ----------------------------------------------------------------------------
# Parameters & model forward
# ----------------------------------------------------------------------------

def init_params(key, cfg):
    d_model, d_ff, c_out = cfg["d_model"], cfg["d_ff"], cfg["c_out"]
    mark = cfg["mark_dim"]
    keys = iter(jax.random.split(key, 512))

    def w(shape, scale=0.1):     # matmul weights stored in bf16
        return (scale * jax.random.normal(next(keys), shape, jnp.float32)
                ).astype(_BF16)

    def b(shape, scale=0.1):     # biases / affine params stay f32
        return scale * jax.random.normal(next(keys), shape, jnp.float32)

    def attn_self():             # q/k/v weights packed along the output dim
        return dict(wqkv=w((d_model, 3 * d_model)), bqkv=b((1, 3 * d_model)),
                    wo=w((d_model, d_model)), bo=b((1, d_model)))

    def attn_cross():            # q applied to x, k/v applied to enc_out
        return dict(wq=w((d_model, d_model)), bq=b((1, d_model)),
                    wkv=w((d_model, 2 * d_model)), bkv=b((1, 2 * d_model)),
                    wo=w((d_model, d_model)), bo=b((1, d_model)))

    return dict(
        # fused DataEmbedding weight rows: [x(t-1) taps | x(t) | x(t+1) | timeF]
        enc_emb_w=w((3 * cfg["enc_in"] + mark, d_model)),
        dec_emb_w=w((3 * cfg["dec_in"] + mark, d_model)),
        enc_layers=[dict(attn=attn_self(),
                         w1=w((d_model, d_ff)), w2=w((d_ff, d_model)))
                    for _ in range(cfg["e_layers"])],
        enc_norm=dict(gamma=jnp.ones((1, d_model), jnp.float32),
                      beta=jnp.zeros((1, d_model), jnp.float32)),
        dec_layers=[dict(self_attn=attn_self(), cross_attn=attn_cross(),
                         w1=w((d_model, d_ff)), w2=w((d_ff, d_model)),
                         # fused circular Conv1d(d_model->c_out, k=3) taps
                         wtrend=w((3 * d_model, c_out)))
                    for _ in range(cfg["d_layers"])],
        dec_norm=dict(gamma=jnp.ones((1, d_model), jnp.float32),
                      beta=jnp.zeros((1, d_model), jnp.float32)),
        proj_w=w((d_model, c_out)), proj_b=b((1, c_out)),
    )


def autoformer_forward(params, cfg, x_enc, x_mark_enc, x_dec, x_mark_dec):
    # TODO(synk): include_pred==1 branch (RevIN + project_dict + lin1_enc) is
    # disabled by config (include_pred=0) and not implemented.
    # TODO(synk): only embed_type=0 / embed='timeF' temporal embedding path.
    del x_dec  # reference feeds seasonal_init (not x_dec) into the decoder
    B, Le, _ = x_enc.shape
    pred_len, label_len = cfg["pred_len"], cfg["label_len"]
    Ld = label_len + pred_len
    factor = cfg["factor"]

    # constant operators, built once per trace and shared by both fused kernels
    ma_e = moving_avg_matrix(Le, cfg["moving_avg"])
    cc_e = corr_constants(Le)
    if Ld == Le:
        ma_d, cc_d = ma_e, cc_e
    else:
        ma_d = moving_avg_matrix(Ld, cfg["moving_avg"])
        cc_d = corr_constants(Ld)
    tk_e = max(1, min(Le - 1, int(factor * math.log(Le))))
    tk_d = max(1, min(Ld - 1, int(factor * math.log(Ld))))

    # 2-way batch-block grid: fills both v7x TensorCores; on v5e/v6e it is just
    # two cheap sequential steps of the same fused kernel.
    bb = 2 if (B % 2 == 0 and B >= 2) else 1

    enc_out = encoder_forward(params, cc_e, ma_e, x_enc, x_mark_enc,
                              top_k=tk_e, bb=bb)
    return decoder_forward(params, cc_d, ma_d, ma_e, x_enc, x_mark_dec, enc_out,
                           label_len=label_len, pred_len=pred_len,
                           top_k=tk_d, bb=bb)


# ----------------------------------------------------------------------------
# Main
# ----------------------------------------------------------------------------

if __name__ == "__main__":
    cfg = dict(seq_len=16, label_len=8, pred_len=8,
               enc_in=8, dec_in=8, c_out=8,
               d_model=32, n_heads=4, d_ff=64,
               e_layers=1, d_layers=1,
               moving_avg=5, factor=1, mark_dim=4,   # freq='h' -> 4 time features
               dropout=0.0, activation="relu",
               embed_type=0, embed="timeF", freq="h",
               output_attention=False, include_pred=0)

    # host-side sanity check of the DFT correlation constants vs np.fft
    _check_corr_constants(L=cfg["seq_len"])

    key = jax.random.PRNGKey(0)
    kp, k1, k2, k3, k4 = jax.random.split(key, 5)
    params = init_params(kp, cfg)

    B = 2
    dec_len = cfg["label_len"] + cfg["pred_len"]
    x_enc = jax.random.normal(k1, (B, cfg["seq_len"], cfg["enc_in"]), jnp.float32)
    x_mark_enc = jax.random.normal(k2, (B, cfg["seq_len"], cfg["mark_dim"]), jnp.float32)
    x_dec = jax.random.normal(k3, (B, dec_len, cfg["dec_in"]), jnp.float32)
    x_mark_dec = jax.random.normal(k4, (B, dec_len, cfg["mark_dim"]), jnp.float32)

    fwd = jax.jit(functools.partial(autoformer_forward, params, cfg))
    out = fwd(x_enc, x_mark_enc, x_dec, x_mark_dec)
    out = jax.block_until_ready(out)

    assert out.shape == (B, cfg["pred_len"], cfg["c_out"]), out.shape
    assert bool(jnp.all(jnp.isfinite(out)))
    print("KERNEL_OK")
</pallas_src>

<mosaic_0001>
module attributes {stable_mosaic.version = 11 : i64} {
  func.func @_encoder_kernel(%arg0: i32, %arg1: memref<1x16x8xf32, #tpu.memory_space<vmem>>, %arg2: memref<1x16x4xf32, #tpu.memory_space<vmem>>, %arg3: memref<9x16xf32, #tpu.memory_space<vmem>>, %arg4: memref<9x16xf32, #tpu.memory_space<vmem>>, %arg5: memref<16x9xf32, #tpu.memory_space<vmem>>, %arg6: memref<16x9xf32, #tpu.memory_space<vmem>>, %arg7: memref<16x16xf32, #tpu.memory_space<vmem>>, %arg8: memref<16x16xi32, #tpu.memory_space<vmem>>, %arg9: memref<28x32xbf16, #tpu.memory_space<vmem>>, %arg10: memref<1x32xf32, #tpu.memory_space<vmem>>, %arg11: memref<1x32xf32, #tpu.memory_space<vmem>>, %arg12: memref<32x96xbf16, #tpu.memory_space<vmem>>, %arg13: memref<1x96xf32, #tpu.memory_space<vmem>>, %arg14: memref<32x32xbf16, #tpu.memory_space<vmem>>, %arg15: memref<1x32xf32, #tpu.memory_space<vmem>>, %arg16: memref<32x64xbf16, #tpu.memory_space<vmem>>, %arg17: memref<64x32xbf16, #tpu.memory_space<vmem>>, %arg18: memref<1x16x32xf32, #tpu.memory_space<vmem>>) attributes {dimension_semantics = [#tpu.dimension_semantics<parallel>], iteration_bounds = array<i64: 2>, scalar_prefetch = 0 : i64, scratch_operands = 0 : i64, tpu.core_type = #tpu.core_type<tc>, window_params = [{transform_indices = @transform_0, window_bounds = array<i64: 1, 16, 8>}, {transform_indices = @transform_1, window_bounds = array<i64: 1, 16, 4>}, {pipeline_mode = #tpu.pipeline_mode<synchronous>, transform_indices = @transform_2, window_bounds = array<i64: 9, 16>}, {pipeline_mode = #tpu.pipeline_mode<synchronous>, transform_indices = @transform_3, window_bounds = array<i64: 9, 16>}, {pipeline_mode = #tpu.pipeline_mode<synchronous>, transform_indices = @transform_4, window_bounds = array<i64: 16, 9>}, {pipeline_mode = #tpu.pipeline_mode<synchronous>, transform_indices = @transform_5, window_bounds = array<i64: 16, 9>}, {pipeline_mode = #tpu.pipeline_mode<synchronous>, transform_indices = @transform_6, window_bounds = array<i64: 16, 16>}, {pipeline_mode = #tpu.pipeline_mode<synchronous>, transform_indices = @transform_7, window_bounds = array<i64: 16, 16>}, {pipeline_mode = #tpu.pipeline_mode<synchronous>, transform_indices = @transform_8, window_bounds = array<i64: 28, 32>}, {pipeline_mode = #tpu.pipeline_mode<synchronous>, transform_indices = @transform_9, window_bounds = array<i64: 1, 32>}, {pipeline_mode = #tpu.pipeline_mode<synchronous>, transform_indices = @transform_10, window_bounds = array<i64: 1, 32>}, {pipeline_mode = #tpu.pipeline_mode<synchronous>, transform_indices = @transform_11, window_bounds = array<i64: 32, 96>}, {pipeline_mode = #tpu.pipeline_mode<synchronous>, transform_indices = @transform_12, window_bounds = array<i64: 1, 96>}, {pipeline_mode = #tpu.pipeline_mode<synchronous>, transform_indices = @transform_13, window_bounds = array<i64: 32, 32>}, {pipeline_mode = #tpu.pipeline_mode<synchronous>, transform_indices = @transform_14, window_bounds = array<i64: 1, 32>}, {pipeline_mode = #tpu.pipeline_mode<synchronous>, transform_indices = @transform_15, window_bounds = array<i64: 32, 64>}, {pipeline_mode = #tpu.pipeline_mode<synchronous>, transform_indices = @transform_16, window_bounds = array<i64: 64, 32>}, {transform_indices = @transform_17, window_bounds = array<i64: 1, 16, 32>}]} {
    %c0 = arith.constant 0 : index
    %c0_0 = arith.constant 0 : index
    %0 = vector.load %arg3[%c0, %c0_0] : memref<9x16xf32, #tpu.memory_space<vmem>>, vector<9x16xf32>
    %1 = arith.truncf %0 : vector<9x16xf32> to vector<9x16xbf16>
    %c0_1 = arith.constant 0 : index
    %c0_2 = arith.constant 0 : index
    %2 = vector.load %arg4[%c0_1, %c0_2] : memref<9x16xf32, #tpu.memory_space<vmem>>, vector<9x16xf32>
    %3 = arith.truncf %2 : vector<9x16xf32> to vector<9x16xbf16>
    %c0_3 = arith.constant 0 : index
    %c0_4 = arith.constant 0 : index
    %4 = vector.load %arg5[%c0_3, %c0_4] : memref<16x9xf32, #tpu.memory_space<vmem>>, vector<16x9xf32>
    %c0_5 = arith.constant 0 : index
    %c0_6 = arith.constant 0 : index
    %5 = vector.load %arg6[%c0_5, %c0_6] : memref<16x9xf32, #tpu.memory_space<vmem>>, vector<16x9xf32>
    %c0_7 = arith.constant 0 : index
    %c0_8 = arith.constant 0 : index
    %6 = vector.load %arg7[%c0_7, %c0_8] : memref<16x16xf32, #tpu.memory_space<vmem>>, vector<16x16xf32>
    %7 = arith.truncf %6 : vector<16x16xf32> to vector<16x16xbf16>
    %c0_9 = arith.constant 0 : index
    %c0_10 = arith.constant 0 : index
    %8 = vector.load %arg8[%c0_9, %c0_10] : memref<16x16xi32, #tpu.memory_space<vmem>>, vector<16x16xi32>
    %c0_11 = arith.constant 0 : index
    %c0_12 = arith.constant 0 : index
    %c0_13 = arith.constant 0 : index
    %9 = vector.load %arg1[%c0_11, %c0_12, %c0_13] : memref<1x16x8xf32, #tpu.memory_space<vmem>>, vector<1x16x8xf32>
    %c0_14 = arith.constant 0 : index
    %c0_15 = arith.constant 0 : index
    %c0_16 = arith.constant 0 : index
    %10 = vector.load %arg2[%c0_14, %c0_15, %c0_16] : memref<1x16x4xf32, #tpu.memory_space<vmem>>, vector<1x16x4xf32>
    %11 = vector.shape_cast %9 : vector<1x16x8xf32> to vector<16x8xf32>
    %c1_i32 = arith.constant 1 : i32
    %12 = tpu.dynamic_rotate %11 by %c1_i32 dim 0 : vector<16x8xf32>, i32 -> vector<16x8xf32>
    %c15_i32 = arith.constant 15 : i32
    %13 = tpu.dynamic_rotate %11 by %c15_i32 dim 0 : vector<16x8xf32>, i32 -> vector<16x8xf32>
    %14 = vector.shape_cast %10 : vector<1x16x4xf32> to vector<16x4xf32>
    %15 = tpu.concatenate %12, %11, %13, %14 in 1 : vector<16x8xf32>, vector<16x8xf32>, vector<16x8xf32>, vector<16x4xf32> -> vector<16x28xf32>
    %c0_17 = arith.constant 0 : index
    %c0_18 = arith.constant 0 : index
    %16 = vector.load %arg9[%c0_17, %c0_18] : memref<28x32xbf16, #tpu.memory_space<vmem>>, vector<28x32xbf16>
    %17 = arith.truncf %15 : vector<16x28xf32> to vector<16x28xbf16>
    %cst = arith.constant dense<0.000000e+00> : vector<16x32xf32>
    %18 = tpu.matmul %17, %16, %cst {dimension_numbers = #tpu.dot_dimension_numbers<[1], [0], [0], [1], [0, 0, 1, 1], [], []>} : vector<16x28xbf16>, vector<28x32xbf16>, vector<16x32xf32> -> vector<16x32xf32>
    %c0_19 = arith.constant 0 : index
    %c0_20 = arith.constant 0 : index
    %19 = vector.load %arg12[%c0_19, %c0_20] : memref<32x96xbf16, #tpu.memory_space<vmem>>, vector<32x96xbf16>
    %20 = arith.truncf %18 : vector<16x32xf32> to vector<16x32xbf16>
    %cst_21 = arith.constant dense<0.000000e+00> : vector<16x96xf32>
    %21 = tpu.matmul %20, %19, %cst_21 {dimension_numbers = #tpu.dot_dimension_numbers<[1], [0], [0], [1], [0, 0, 1, 1], [], []>} : vector<16x32xbf16>, vector<32x96xbf16>, vector<16x96xf32> -> vector<16x96xf32>
    %c0_22 = arith.constant 0 : index
    %c0_23 = arith.constant 0 : index
    %22 = vector.load %arg13[%c0_22, %c0_23] : memref<1x96xf32, #tpu.memory_space<vmem>>, vector<1x96xf32>
    %23 = vector.broadcast %22 : vector<1x96xf32> to vector<16x96xf32>
    %24 = arith.addf %21, %23 : vector<16x96xf32>
    %25 = vector.extract_strided_slice %24 {offsets = [0, 0], sizes = [16, 32], strides = [1, 1]} : vector<16x96xf32> to vector<16x32xf32>
    %26 = vector.extract_strided_slice %24 {offsets = [0, 32], sizes = [16, 32], strides = [1, 1]} : vector<16x96xf32> to vector<16x32xf32>
    %27 = vector.extract_strided_slice %24 {offsets = [0, 64], sizes = [16, 32], strides = [1, 1]} : vector<16x96xf32> to vector<16x32xf32>
    %28 = arith.truncf %25 : vector<16x32xf32> to vector<16x32xbf16>
    %29 = arith.truncf %26 : vector<16x32xf32> to vector<16x32xbf16>
    %cst_24 = arith.constant dense<0.000000e+00> : vector<9x32xf32>
    %30 = tpu.matmul %1, %28, %cst_24 {dimension_numbers = #tpu.dot_dimension_numbers<[1], [0], [0], [1], [0, 0, 1, 1], [], []>} : vector<9x16xbf16>, vector<16x32xbf16>, vector<9x32xf32> -> vector<9x32xf32>
    %cst_25 = arith.constant dense<0.000000e+00> : vector<9x32xf32>
    %31 = tpu.matmul %3, %28, %cst_25 {dimension_numbers = #tpu.dot_dimension_numbers<[1], [0], [0], [1], [0, 0, 1, 1], [], []>} : vector<9x16xbf16>, vector<16x32xbf16>, vector<9x32xf32> -> vector<9x32xf32>
    %cst_26 = arith.constant dense<0.000000e+00> : vector<9x32xf32>
    %32 = tpu.matmul %1, %29, %cst_26 {dimension_numbers = #tpu.dot_dimension_numbers<[1], [0], [0], [1], [0, 0, 1, 1], [], []>} : vector<9x16xbf16>, vector<16x32xbf16>, vector<9x32xf32> -> vector<9x32xf32>
    %cst_27 = arith.constant dense<0.000000e+00> : vector<9x32xf32>
    %33 = tpu.matmul %3, %29, %cst_27 {dimension_numbers = #tpu.dot_dimension_numbers<[1], [0], [0], [1], [0, 0, 1, 1], [], []>} : vector<9x16xbf16>, vector<16x32xbf16>, vector<9x32xf32> -> vector<9x32xf32>
    %34 = arith.mulf %30, %32 : vector<9x32xf32>
    %35 = arith.mulf %31, %33 : vector<9x32xf32>
    %36 = arith.addf %34, %35 : vector<9x32xf32>
    %37 = arith.mulf %30, %33 : vector<9x32xf32>
    %38 = arith.mulf %31, %32 : vector<9x32xf32>
    %39 = arith.subf %37, %38 : vector<9x32xf32>
    %cst_28 = arith.constant dense<0.000000e+00> : vector<9xf32>
    %40 = vector.multi_reduction <add>, %36, %cst_28 [1] : vector<9x32xf32> to vector<9xf32>
    %41 = vector.shape_cast %40 : vector<9xf32> to vector<9x1xf32>
    %cst_29 = arith.constant dense<0.000000e+00> : vector<9xf32>
    %42 = vector.multi_reduction <add>, %39, %cst_29 [1] : vector<9x32xf32> to vector<9xf32>
    %43 = vector.shape_cast %42 : vector<9xf32> to vector<9x1xf32>
    %cst_30 = arith.constant dense<0.000000e+00> : vector<16x1xf32>
    %44 = tpu.matmul %4, %41, %cst_30 {dimension_numbers = #tpu.dot_dimension_numbers<[1], [0], [0], [1], [0, 0, 1, 1], [], []>} : vector<16x9xf32>, vector<9x1xf32>, vector<16x1xf32> -> vector<16x1xf32>
    %cst_31 = arith.constant dense<0.000000e+00> : vector<16x1xf32>
    %45 = tpu.matmul %5, %43, %cst_31 {dimension_numbers = #tpu.dot_dimension_numbers<[1], [0], [0], [1], [0, 0, 1, 1], [], []>} : vector<16x9xf32>, vector<9x1xf32>, vector<16x1xf32> -> vector<16x1xf32>
    %46 = arith.subf %44, %45 : vector<16x1xf32>
    %cst_32 = arith.constant 3.125000e-02 : f32
    %47 = vector.broadcast %cst_32 : f32 to vector<16x1xf32>
    %48 = arith.mulf %46, %47 : vector<16x1xf32>
    %49 = tpu.iota {dimensions = array<i32: 0>} : vector<16x1xi32>
    %50 = vector.shape_cast %48 : vector<16x1xf32> to vector<1x16x1xf32>
    %cst_33 = arith.constant dense<0xFF800000> : vector<1xf32>
    %51 = vector.multi_reduction <maximumf>, %50, %cst_33 [1, 2] : vector<1x16x1xf32> to vector<1xf32>
    %52 = vector.shape_cast %51 : vector<1xf32> to vector<1x1x1xf32>
    %53 = vector.extract %52[0, 0, 0] : f32 from vector<1x1x1xf32>
    %54 = vector.broadcast %53 : f32 to vector<1x1xf32>
    %55 = vector.broadcast %54 : vector<1x1xf32> to vector<16x1xf32>
    %56 = arith.cmpf oge, %48, %55 : vector<16x1xf32>
    %c16_i32 = arith.constant 16 : i32
    %57 = vector.broadcast %c16_i32 : i32 to vector<16x1xi32>
    %58 = arith.select %56, %49, %57 : vector<16x1xi1>, vector<16x1xi32>
    %59 = vector.shape_cast %58 : vector<16x1xi32> to vector<1x16x1xi32>
    %cst_34 = arith.constant dense<2147483647> : vector<1xi32>
    %60 = vector.multi_reduction <minsi>, %59, %cst_34 [1, 2] : vector<1x16x1xi32> to vector<1xi32>
    %61 = vector.shape_cast %60 : vector<1xi32> to vector<1x1x1xi32>
    %62 = vector.extract %61[0, 0, 0] : i32 from vector<1x1x1xi32>
    %63 = vector.broadcast %62 : i32 to vector<1x1xi32>
    %64 = vector.broadcast %63 : vector<1x1xi32> to vector<16x1xi32>
    %65 = arith.cmpi eq, %49, %64 : vector<16x1xi32>
    %cst_35 = arith.constant -1.000000e+30 : f32
    %66 = vector.broadcast %cst_35 : f32 to vector<16x1xf32>
    %67 = arith.select %65, %66, %48 : vector<16x1xi1>, vector<16x1xf32>
    %68 = vector.shape_cast %67 : vector<16x1xf32> to vector<1x16x1xf32>
    %cst_36 = arith.constant dense<0xFF800000> : vector<1xf32>
    %69 = vector.multi_reduction <maximumf>, %68, %cst_36 [1, 2] : vector<1x16x1xf32> to vector<1xf32>
    %70 = vector.shape_cast %69 : vector<1xf32> to vector<1x1x1xf32>
    %71 = vector.extract %70[0, 0, 0] : f32 from vector<1x1x1xf32>
    %72 = vector.broadcast %71 : f32 to vector<1x1xf32>
    %73 = vector.broadcast %72 : vector<1x1xf32> to vector<16x1xf32>
    %74 = arith.cmpf oge, %67, %73 : vector<16x1xf32>
    %c16_i32_37 = arith.constant 16 : i32
    %75 = vector.broadcast %c16_i32_37 : i32 to vector<16x1xi32>
    %76 = arith.select %74, %49, %75 : vector<16x1xi1>, vector<16x1xi32>
    %77 = vector.shape_cast %76 : vector<16x1xi32> to vector<1x16x1xi32>
    %cst_38 = arith.constant dense<2147483647> : vector<1xi32>
    %78 = vector.multi_reduction <minsi>, %77, %cst_38 [1, 2] : vector<1x16x1xi32> to vector<1xi32>
    %79 = vector.shape_cast %78 : vector<1xi32> to vector<1x1x1xi32>
    %80 = vector.extract %79[0, 0, 0] : i32 from vector<1x1x1xi32>
    %81 = vector.broadcast %80 : i32 to vector<1x1xi32>
    %82 = arith.maximumf %54, %72 : vector<1x1xf32>
    %83 = arith.subf %54, %82 : vector<1x1xf32>
    %84 = math.exp %83 : vector<1x1xf32>
    %85 = arith.subf %72, %82 : vector<1x1xf32>
    %86 = math.exp %85 : vector<1x1xf32>
    %87 = arith.addf %84, %86 : vector<1x1xf32>
    %cst_39 = arith.constant 1.000000e+00 : f32
    %88 = vector.broadcast %cst_39 : f32 to vector<1x1xf32>
    %89 = arith.divf %88, %87 : vector<1x1xf32>
    %cst_40 = arith.constant 0.000000e+00 : f32
    %90 = vector.broadcast %cst_40 : f32 to vector<16x16xf32>
    %91 = arith.mulf %84, %89 : vector<1x1xf32>
    %92 = vector.broadcast %63 : vector<1x1xi32> to vector<16x16xi32>
    %93 = arith.cmpi eq, %8, %92 : vector<16x16xi32>
    %94 = arith.extui %93 : vector<16x16xi1> to vector<16x16xi32>
    %95 = arith.sitofp %94 : vector<16x16xi32> to vector<16x16xf32>
    %96 = vector.broadcast %91 : vector<1x1xf32> to vector<16x16xf32>
    %97 = arith.mulf %96, %95 : vector<16x16xf32>
    %98 = arith.addf %90, %97 : vector<16x16xf32>
    %99 = arith.mulf %86, %89 : vector<1x1xf32>
    %100 = vector.broadcast %81 : vector<1x1xi32> to vector<16x16xi32>
    %101 = arith.cmpi eq, %8, %100 : vector<16x16xi32>
    %102 = arith.extui %101 : vector<16x16xi1> to vector<16x16xi32>
    %103 = arith.sitofp %102 : vector<16x16xi32> to vector<16x16xf32>
    %104 = vector.broadcast %99 : vector<1x1xf32> to vector<16x16xf32>
    %105 = arith.mulf %104, %103 : vector<16x16xf32>
    %106 = arith.addf %98, %105 : vector<16x16xf32>
    %107 = arith.truncf %106 : vector<16x16xf32> to vector<16x16xbf16>
    %108 = arith.truncf %27 : vector<16x32xf32> to vector<16x32xbf16>
    %cst_41 = arith.constant dense<0.000000e+00> : vector<16x32xf32>
    %109 = tpu.matmul %107, %108, %cst_41 {dimension_numbers = #tpu.dot_dimension_numbers<[1], [0], [0], [1], [0, 0, 1, 1], [], []>} : vector<16x16xbf16>, vector<16x32xbf16>, vector<16x32xf32> -> vector<16x32xf32>
    %c0_42 = arith.constant 0 : index
    %c0_43 = arith.constant 0 : index
    %110 = vector.load %arg14[%c0_42, %c0_43] : memref<32x32xbf16, #tpu.memory_space<vmem>>, vector<32x32xbf16>
    %111 = arith.truncf %109 : vector<16x32xf32> to vector<16x32xbf16>
    %cst_44 = arith.constant dense<0.000000e+00> : vector<16x32xf32>
    %112 = tpu.matmul %111, %110, %cst_44 {dimension_numbers = #tpu.dot_dimension_numbers<[1], [0], [0], [1], [0, 0, 1, 1], [], []>} : vector<16x32xbf16>, vector<32x32xbf16>, vector<16x32xf32> -> vector<16x32xf32>
    %113 = arith.addf %18, %112 : vector<16x32xf32>
    %c0_45 = arith.constant 0 : index
    %c0_46 = arith.constant 0 : index
    %114 = vector.load %arg15[%c0_45, %c0_46] : memref<1x32xf32, #tpu.memory_space<vmem>>, vector<1x32xf32>
    %115 = vector.broadcast %114 : vector<1x32xf32> to vector<16x32xf32>
    %116 = arith.addf %113, %115 : vector<16x32xf32>
    %117 = arith.truncf %116 : vector<16x32xf32> to vector<16x32xbf16>
    %cst_47 = arith.constant dense<0.000000e+00> : vector<16x32xf32>
    %118 = tpu.matmul %7, %117, %cst_47 {dimension_numbers = #tpu.dot_dimension_numbers<[1], [0], [0], [1], [0, 0, 1, 1], [], []>} : vector<16x16xbf16>, vector<16x32xbf16>, vector<16x32xf32> -> vector<16x32xf32>
    %119 = arith.subf %116, %118 : vector<16x32xf32>
    %c0_48 = arith.constant 0 : index
    %c0_49 = arith.constant 0 : index
    %120 = vector.load %arg16[%c0_48, %c0_49] : memref<32x64xbf16, #tpu.memory_space<vmem>>, vector<32x64xbf16>
    %121 = arith.truncf %119 : vector<16x32xf32> to vector<16x32xbf16>
    %cst_50 = arith.constant dense<0.000000e+00> : vector<16x64xf32>
    %122 = tpu.matmul %121, %120, %cst_50 {dimension_numbers = #tpu.dot_dimension_numbers<[1], [0], [0], [1], [0, 0, 1, 1], [], []>} : vector<16x32xbf16>, vector<32x64xbf16>, vector<16x64xf32> -> vector<16x64xf32>
    %cst_51 = arith.constant 0.000000e+00 : f32
    %123 = vector.broadcast %cst_51 : f32 to vector<16x64xf32>
    %124 = arith.maximumf %122, %123 : vector<16x64xf32>
    %c0_52 = arith.constant 0 : index
    %c0_53 = arith.constant 0 : index
    %125 = vector.load %arg17[%c0_52, %c0_53] : memref<64x32xbf16, #tpu.memory_space<vmem>>, vector<64x32xbf16>
    %126 = arith.truncf %124 : vector<16x64xf32> to vector<16x64xbf16>
    %cst_54 = arith.constant dense<0.000000e+00> : vector<16x32xf32>
    %127 = tpu.matmul %126, %125, %cst_54 {dimension_numbers = #tpu.dot_dimension_numbers<[1], [0], [0], [1], [0, 0, 1, 1], [], []>} : vector<16x64xbf16>, vector<64x32xbf16>, vector<16x32xf32> -> vector<16x32xf32>
    %128 = arith.addf %119, %127 : vector<16x32xf32>
    %129 = arith.truncf %128 : vector<16x32xf32> to vector<16x32xbf16>
    %cst_55 = arith.constant dense<0.000000e+00> : vector<16x32xf32>
    %130 = tpu.matmul %7, %129, %cst_55 {dimension_numbers = #tpu.dot_dimension_numbers<[1], [0], [0], [1], [0, 0, 1, 1], [], []>} : vector<16x16xbf16>, vector<16x32xbf16>, vector<16x32xf32> -> vector<16x32xf32>
    %131 = arith.subf %128, %130 : vector<16x32xf32>
    %c0_56 = arith.constant 0 : index
    %c0_57 = arith.constant 0 : index
    %132 = vector.load %arg10[%c0_56, %c0_57] : memref<1x32xf32, #tpu.memory_space<vmem>>, vector<1x32xf32>
    %c0_58 = arith.constant 0 : index
    %c0_59 = arith.constant 0 : index
    %133 = vector.load %arg11[%c0_58, %c0_59] : memref<1x32xf32, #tpu.memory_space<vmem>>, vector<1x32xf32>
    %cst_60 = arith.constant dense<0.000000e+00> : vector<16xf32>
    %134 = vector.multi_reduction <add>, %131, %cst_60 [1] : vector<16x32xf32> to vector<16xf32>
    %135 = vector.shape_cast %134 : vector<16xf32> to vector<16x1xf32>
    %cst_61 = arith.constant 3.200000e+01 : f32
    %136 = vector.broadcast %cst_61 : f32 to vector<16x1xf32>
    %137 = arith.divf %135, %136 : vector<16x1xf32>
    %138 = vector.broadcast %137 : vector<16x1xf32> to vector<16x32xf32>
    %139 = arith.subf %131, %138 : vector<16x32xf32>
    %140 = arith.mulf %139, %139 : vector<16x32xf32>
    %cst_62 = arith.constant dense<0.000000e+00> : vector<16xf32>
    %141 = vector.multi_reduction <add>, %140, %cst_62 [1] : vector<16x32xf32> to vector<16xf32>
    %142 = vector.shape_cast %141 : vector<16xf32> to vector<16x1xf32>
    %cst_63 = arith.constant 3.200000e+01 : f32
    %143 = vector.broadcast %cst_63 : f32 to vector<16x1xf32>
    %144 = arith.divf %142, %143 : vector<16x1xf32>
    %cst_64 = arith.constant 9.99999974E-6 : f32
    %145 = vector.broadcast %cst_64 : f32 to vector<16x1xf32>
    %146 = arith.addf %144, %145 : vector<16x1xf32>
    %147 = math.rsqrt %146 : vector<16x1xf32>
    %148 = vector.broadcast %147 : vector<16x1xf32> to vector<16x32xf32>
    %149 = arith.mulf %139, %148 : vector<16x32xf32>
    %150 = vector.broadcast %132 : vector<1x32xf32> to vector<16x32xf32>
    %151 = arith.mulf %149, %150 : vector<16x32xf32>
    %152 = vector.broadcast %133 : vector<1x32xf32> to vector<16x32xf32>
    %153 = arith.addf %151, %152 : vector<16x32xf32>
    %cst_65 = arith.constant dense<0.000000e+00> : vector<32xf32>
    %154 = vector.multi_reduction <add>, %153, %cst_65 [0] : vector<16x32xf32> to vector<32xf32>
    %155 = vector.shape_cast %154 : vector<32xf32> to vector<1x32xf32>
    %cst_66 = arith.constant 1.600000e+01 : f32
    %156 = vector.broadcast %cst_66 : f32 to vector<1x32xf32>
    %157 = arith.divf %155, %156 : vector<1x32xf32>
    %158 = vector.broadcast %157 : vector<1x32xf32> to vector<16x32xf32>
    %159 = arith.subf %153, %158 : vector<16x32xf32>
    %c0_67 = arith.constant 0 : index
    %c0_68 = arith.constant 0 : index
    %c0_69 = arith.constant 0 : index
    %160 = vector.load %arg18[%c0_67, %c0_68, %c0_69] : memref<1x16x32xf32, #tpu.memory_space<vmem>>, vector<1x16x32xf32>
    %161 = vector.shape_cast %160 : vector<1x16x32xf32> to vector<16x32xf32>
    %162 = vector.shape_cast %159 : vector<16x32xf32> to vector<1x16x32xf32>
    tpu.vector_store %arg18[%c0_67, %c0_68, %c0_69], %162 {strides = array<i32>} : memref<1x16x32xf32, #tpu.memory_space<vmem>>, vector<1x16x32xf32>,
    return
  }
  func.func @transform_0(%arg0: i32) -> (i32, i32, i32) {
    %c0_i32 = arith.constant 0 : i32
    %c0_i32_0 = arith.constant 0 : i32
    %c0_i32_1 = arith.constant 0 : i32
    return %arg0, %c0_i32, %c0_i32_0 : i32, i32, i32
  }
  func.func @transform_1(%arg0: i32) -> (i32, i32, i32) {
    %c0_i32 = arith.constant 0 : i32
    %c0_i32_0 = arith.constant 0 : i32
    %c0_i32_1 = arith.constant 0 : i32
    return %arg0, %c0_i32, %c0_i32_0 : i32, i32, i32
  }
  func.func @transform_2(%arg0: i32) -> (i32, i32) {
    %c0_i32 = arith.constant 0 : i32
    %c0_i32_0 = arith.constant 0 : i32
    %c0_i32_1 = arith.constant 0 : i32
    return %c0_i32, %c0_i32_0 : i32, i32
  }
  func.func @transform_3(%arg0: i32) -> (i32, i32) {
    %c0_i32 = arith.constant 0 : i32
    %c0_i32_0 = arith.constant 0 : i32
    %c0_i32_1 = arith.constant 0 : i32
    return %c0_i32, %c0_i32_0 : i32, i32
  }
  func.func @transform_4(%arg0: i32) -> (i32, i32) {
    %c0_i32 = arith.constant 0 : i32
    %c0_i32_0 = arith.constant 0 : i32
    %c0_i32_1 = arith.constant 0 : i32
    return %c0_i32, %c0_i32_0 : i32, i32
  }
  func.func @transform_5(%arg0: i32) -> (i32, i32) {
    %c0_i32 = arith.constant 0 : i32
    %c0_i32_0 = arith.constant 0 : i32
    %c0_i32_1 = arith.constant 0 : i32
    return %c0_i32, %c0_i32_0 : i32, i32
  }
  func.func @transform_6(%arg0: i32) -> (i32, i32) {
    %c0_i32 = arith.constant 0 : i32
    %c0_i32_0 = arith.constant 0 : i32
    %c0_i32_1 = arith.constant 0 : i32
    return %c0_i32, %c0_i32_0 : i32, i32
  }
  func.func @transform_7(%arg0: i32) -> (i32, i32) {
    %c0_i32 = arith.constant 0 : i32
    %c0_i32_0 = arith.constant 0 : i32
    %c0_i32_1 = arith.constant 0 : i32
    return %c0_i32, %c0_i32_0 : i32, i32
  }
  func.func @transform_8(%arg0: i32) -> (i32, i32) {
    %c0_i32 = arith.constant 0 : i32
    %c0_i32_0 = arith.constant 0 : i32
    %c0_i32_1 = arith.constant 0 : i32
    return %c0_i32, %c0_i32_0 : i32, i32
  }
  func.func @transform_9(%arg0: i32) -> (i32, i32) {
    %c0_i32 = arith.constant 0 : i32
    %c0_i32_0 = arith.constant 0 : i32
    %c0_i32_1 = arith.constant 0 : i32
    return %c0_i32, %c0_i32_0 : i32, i32
  }
  func.func @transform_10(%arg0: i32) -> (i32, i32) {
    %c0_i32 = arith.constant 0 : i32
    %c0_i32_0 = arith.constant 0 : i32
    %c0_i32_1 = arith.constant 0 : i32
    return %c0_i32, %c0_i32_0 : i32, i32
  }
  func.func @transform_11(%arg0: i32) -> (i32, i32) {
    %c0_i32 = arith.constant 0 : i32
    %c0_i32_0 = arith.constant 0 : i32
    %c0_i32_1 = arith.constant 0 : i32
    return %c0_i32, %c0_i32_0 : i32, i32
  }
  func.func @transform_12(%arg0: i32) -> (i32, i32) {
    %c0_i32 = arith.constant 0 : i32
    %c0_i32_0 = arith.constant 0 : i32
    %c0_i32_1 = arith.constant 0 : i32
    return %c0_i32, %c0_i32_0 : i32, i32
  }
  func.func @transform_13(%arg0: i32) -> (i32, i32) {
    %c0_i32 = arith.constant 0 : i32
    %c0_i32_0 = arith.constant 0 : i32
    %c0_i32_1 = arith.constant 0 : i32
    return %c0_i32, %c0_i32_0 : i32, i32
  }
  func.func @transform_14(%arg0: i32) -> (i32, i32) {
    %c0_i32 = arith.constant 0 : i32
    %c0_i32_0 = arith.constant 0 : i32
    %c0_i32_1 = arith.constant 0 : i32
    return %c0_i32, %c0_i32_0 : i32, i32
  }
  func.func @transform_15(%arg0: i32) -> (i32, i32) {
    %c0_i32 = arith.constant 0 : i32
    %c0_i32_0 = arith.constant 0 : i32
    %c0_i32_1 = arith.constant 0 : i32
    return %c0_i32, %c0_i32_0 : i32, i32
  }
  func.func @transform_16(%arg0: i32) -> (i32, i32) {
    %c0_i32 = arith.constant 0 : i32
    %c0_i32_0 = arith.constant 0 : i32
    %c0_i32_1 = arith.constant 0 : i32
    return %c0_i32, %c0_i32_0 : i32, i32
  }
  func.func @transform_17(%arg0: i32) -> (i32, i32, i32) {
    %c0_i32 = arith.constant 0 : i32
    %c0_i32_0 = arith.constant 0 : i32
    %c0_i32_1 = arith.constant 0 : i32
    return %arg0, %c0_i32, %c0_i32_0 : i32, i32, i32
  }
}

module attributes {stable_mosaic.version = 11 : i64} {
  func.func @_decoder_kernel(%arg0: i32, %arg1: memref<1x16x8xf32, #tpu.memory_space<vmem>>, %arg2: memref<1x16x4xf32, #tpu.memory_space<vmem>>, %arg3: memref<1x16x32xf32, #tpu.memory_space<vmem>>, %arg4: memref<9x16xf32, #tpu.memory_space<vmem>>, %arg5: memref<9x16xf32, #tpu.memory_space<vmem>>, %arg6: memref<16x9xf32, #tpu.memory_space<vmem>>, %arg7: memref<16x9xf32, #tpu.memory_space<vmem>>, %arg8: memref<16x16xf32, #tpu.memory_space<vmem>>, %arg9: memref<16x16xi32, #tpu.memory_space<vmem>>, %arg10: memref<16x16xf32, #tpu.memory_space<vmem>>, %arg11: memref<28x32xbf16, #tpu.memory_space<vmem>>, %arg12: memref<1x32xf32, #tpu.memory_space<vmem>>, %arg13: memref<1x32xf32, #tpu.memory_space<vmem>>, %arg14: memref<32x8xbf16, #tpu.memory_space<vmem>>, %arg15: memref<1x8xf32, #tpu.memory_space<vmem>>, %arg16: memref<32x96xbf16, #tpu.memory_space<vmem>>, %arg17: memref<1x96xf32, #tpu.memory_space<vmem>>, %arg18: memref<32x32xbf16, #tpu.memory_space<vmem>>, %arg19: memref<1x32xf32, #tpu.memory_space<vmem>>, %arg20: memref<32x32xbf16, #tpu.memory_space<vmem>>, %arg21: memref<1x32xf32, #tpu.memory_space<vmem>>, %arg22: memref<32x64xbf16, #tpu.memory_space<vmem>>, %arg23: memref<1x64xf32, #tpu.memory_space<vmem>>, %arg24: memref<32x32xbf16, #tpu.memory_space<vmem>>, %arg25: memref<1x32xf32, #tpu.memory_space<vmem>>, %arg26: memref<32x64xbf16, #tpu.memory_space<vmem>>, %arg27: memref<64x32xbf16, #tpu.memory_space<vmem>>, %arg28: memref<96x8xbf16, #tpu.memory_space<vmem>>, %arg29: memref<1x8x8xf32, #tpu.memory_space<vmem>>) attributes {dimension_semantics = [#tpu.dimension_semantics<parallel>], iteration_bounds = array<i64: 2>, scalar_prefetch = 0 : i64, scratch_operands = 0 : i64, tpu.core_type = #tpu.core_type<tc>, window_params = [{transform_indices = @transform_0, window_bounds = array<i64: 1, 16, 8>}, {transform_indices = @transform_1, window_bounds = array<i64: 1, 16, 4>}, {transform_indices = @transform_2, window_bounds = array<i64: 1, 16, 32>}, {pipeline_mode = #tpu.pipeline_mode<synchronous>, transform_indices = @transform_3, window_bounds = array<i64: 9, 16>}, {pipeline_mode = #tpu.pipeline_mode<synchronous>, transform_indices = @transform_4, window_bounds = array<i64: 9, 16>}, {pipeline_mode = #tpu.pipeline_mode<synchronous>, transform_indices = @transform_5, window_bounds = array<i64: 16, 9>}, {pipeline_mode = #tpu.pipeline_mode<synchronous>, transform_indices = @transform_6, window_bounds = array<i64: 16, 9>}, {pipeline_mode = #tpu.pipeline_mode<synchronous>, transform_indices = @transform_7, window_bounds = array<i64: 16, 16>}, {pipeline_mode = #tpu.pipeline_mode<synchronous>, transform_indices = @transform_8, window_bounds = array<i64: 16, 16>}, {pipeline_mode = #tpu.pipeline_mode<synchronous>, transform_indices = @transform_9, window_bounds = array<i64: 16, 16>}, {pipeline_mode = #tpu.pipeline_mode<synchronous>, transform_indices = @transform_10, window_bounds = array<i64: 28, 32>}, {pipeline_mode = #tpu.pipeline_mode<synchronous>, transform_indices = @transform_11, window_bounds = array<i64: 1, 32>}, {pipeline_mode = #tpu.pipeline_mode<synchronous>, transform_indices = @transform_12, window_bounds = array<i64: 1, 32>}, {pipeline_mode = #tpu.pipeline_mode<synchronous>, transform_indices = @transform_13, window_bounds = array<i64: 32, 8>}, {pipeline_mode = #tpu.pipeline_mode<synchronous>, transform_indices = @transform_14, window_bounds = array<i64: 1, 8>}, {pipeline_mode = #tpu.pipeline_mode<synchronous>, transform_indices = @transform_15, window_bounds = array<i64: 32, 96>}, {pipeline_mode = #tpu.pipeline_mode<synchronous>, transform_indices = @transform_16, window_bounds = array<i64: 1, 96>}, {pipeline_mode = #tpu.pipeline_mode<synchronous>, transform_indices = @transform_17, window_bounds = array<i64: 32, 32>}, {pipeline_mode = #tpu.pipeline_mode<synchronous>, transform_indices = @transform_18, window_bounds = array<i64: 1, 32>}, {pipeline_mode = #tpu.pipeline_mode<synchronous>, transform_indices = @transform_19, window_bounds = array<i64: 32, 32>}, {pipeline_mode = #tpu.pipeline_mode<synchronous>, transform_indices = @transform_20, window_bounds = array<i64: 1, 32>}, {pipeline_mode = #tpu.pipeline_mode<synchronous>, transform_indices = @transform_21, window_bounds = array<i64: 32, 64>}, {pipeline_mode = #tpu.pipeline_mode<synchronous>, transform_indices = @transform_22, window_bounds = array<i64: 1, 64>}, {pipeline_mode = #tpu.pipeline_mode<synchronous>, transform_indices = @transform_23, window_bounds = array<i64: 32, 32>}, {pipeline_mode = #tpu.pipeline_mode<synchronous>, transform_indices = @transform_24, window_bounds = array<i64: 1, 32>}, {pipeline_mode = #tpu.pipeline_mode<synchronous>, transform_indices = @transform_25, window_bounds = array<i64: 32, 64>}, {pipeline_mode = #tpu.pipeline_mode<synchronous>, transform_indices = @transform_26, window_bounds = array<i64: 64, 32>}, {pipeline_mode = #tpu.pipeline_mode<synchronous>, transform_indices = @transform_27, window_bounds = array<i64: 96, 8>}, {transform_indices = @transform_28, window_bounds = array<i64: 1, 8, 8>}]} {
    %c0 = arith.constant 0 : index
    %c0_0 = arith.constant 0 : index
    %0 = vector.load %arg4[%c0, %c0_0] : memref<9x16xf32, #tpu.memory_space<vmem>>, vector<9x16xf32>
    %1 = arith.truncf %0 : vector<9x16xf32> to vector<9x16xbf16>
    %c0_1 = arith.constant 0 : index
    %c0_2 = arith.constant 0 : index
    %2 = vector.load %arg5[%c0_1, %c0_2] : memref<9x16xf32, #tpu.memory_space<vmem>>, vector<9x16xf32>
    %3 = arith.truncf %2 : vector<9x16xf32> to vector<9x16xbf16>
    %c0_3 = arith.constant 0 : index
    %c0_4 = arith.constant 0 : index
    %4 = vector.load %arg6[%c0_3, %c0_4] : memref<16x9xf32, #tpu.memory_space<vmem>>, vector<16x9xf32>
    %c0_5 = arith.constant 0 : index
    %c0_6 = arith.constant 0 : index
    %5 = vector.load %arg7[%c0_5, %c0_6] : memref<16x9xf32, #tpu.memory_space<vmem>>, vector<16x9xf32>
    %c0_7 = arith.constant 0 : index
    %c0_8 = arith.constant 0 : index
    %6 = vector.load %arg8[%c0_7, %c0_8] : memref<16x16xf32, #tpu.memory_space<vmem>>, vector<16x16xf32>
    %7 = arith.truncf %6 : vector<16x16xf32> to vector<16x16xbf16>
    %c0_9 = arith.constant 0 : index
    %c0_10 = arith.constant 0 : index
    %8 = vector.load %arg10[%c0_9, %c0_10] : memref<16x16xf32, #tpu.memory_space<vmem>>, vector<16x16xf32>
    %9 = arith.truncf %8 : vector<16x16xf32> to vector<16x16xbf16>
    %c0_11 = arith.constant 0 : index
    %c0_12 = arith.constant 0 : index
    %10 = vector.load %arg9[%c0_11, %c0_12] : memref<16x16xi32, #tpu.memory_space<vmem>>, vector<16x16xi32>
    %c0_13 = arith.constant 0 : index
    %c0_14 = arith.constant 0 : index
    %c0_15 = arith.constant 0 : index
    %11 = vector.load %arg1[%c0_13, %c0_14, %c0_15] : memref<1x16x8xf32, #tpu.memory_space<vmem>>, vector<1x16x8xf32>
    %c0_16 = arith.constant 0 : index
    %c0_17 = arith.constant 0 : index
    %c0_18 = arith.constant 0 : index
    %12 = vector.load %arg2[%c0_16, %c0_17, %c0_18] : memref<1x16x4xf32, #tpu.memory_space<vmem>>, vector<1x16x4xf32>
    %c0_19 = arith.constant 0 : index
    %c0_20 = arith.constant 0 : index
    %c0_21 = arith.constant 0 : index
    %13 = vector.load %arg3[%c0_19, %c0_20, %c0_21] : memref<1x16x32xf32, #tpu.memory_space<vmem>>, vector<1x16x32xf32>
    %14 = vector.shape_cast %13 : vector<1x16x32xf32> to vector<16x32xf32>
    %15 = vector.shape_cast %11 : vector<1x16x8xf32> to vector<16x8xf32>
    %16 = arith.truncf %15 : vector<16x8xf32> to vector<16x8xbf16>
    %cst = arith.constant dense<0.000000e+00> : vector<16x8xf32>
    %17 = tpu.matmul %9, %16, %cst {dimension_numbers = #tpu.dot_dimension_numbers<[1], [0], [0], [1], [0, 0, 1, 1], [], []>} : vector<16x16xbf16>, vector<16x8xbf16>, vector<16x8xf32> -> vector<16x8xf32>
    %18 = arith.subf %15, %17 : vector<16x8xf32>
    %cst_22 = arith.constant dense<0.000000e+00> : vector<8xf32>
    %19 = vector.multi_reduction <add>, %15, %cst_22 [0] : vector<16x8xf32> to vector<8xf32>
    %20 = vector.shape_cast %19 : vector<8xf32> to vector<1x8xf32>
    %cst_23 = arith.constant 1.600000e+01 : f32
    %21 = vector.broadcast %cst_23 : f32 to vector<1x8xf32>
    %22 = arith.divf %20, %21 : vector<1x8xf32>
    %23 = vector.extract_strided_slice %17 {offsets = [8, 0], sizes = [8, 8], strides = [1, 1]} : vector<16x8xf32> to vector<8x8xf32>
    %24 = vector.shape_cast %22 : vector<1x8xf32> to vector<1x8xf32>
    %25 = vector.broadcast %24 : vector<1x8xf32> to vector<8x8xf32>
    %26 = tpu.concatenate %23, %25 in 0 : vector<8x8xf32>, vector<8x8xf32> -> vector<16x8xf32>
    %27 = vector.extract_strided_slice %18 {offsets = [8, 0], sizes = [8, 8], strides = [1, 1]} : vector<16x8xf32> to vector<8x8xf32>
    %cst_24 = arith.constant 0.000000e+00 : f32
    %28 = vector.broadcast %cst_24 : f32 to vector<8x8xf32>
    %29 = tpu.concatenate %27, %28 in 0 : vector<8x8xf32>, vector<8x8xf32> -> vector<16x8xf32>
    %c1_i32 = arith.constant 1 : i32
    %30 = tpu.dynamic_rotate %29 by %c1_i32 dim 0 : vector<16x8xf32>, i32 -> vector<16x8xf32>
    %c15_i32 = arith.constant 15 : i32
    %31 = tpu.dynamic_rotate %29 by %c15_i32 dim 0 : vector<16x8xf32>, i32 -> vector<16x8xf32>
    %32 = vector.shape_cast %12 : vector<1x16x4xf32> to vector<16x4xf32>
    %33 = tpu.concatenate %30, %29, %31, %32 in 1 : vector<16x8xf32>, vector<16x8xf32>, vector<16x8xf32>, vector<16x4xf32> -> vector<16x28xf32>
    %c0_25 = arith.constant 0 : index
    %c0_26 = arith.constant 0 : index
    %34 = vector.load %arg11[%c0_25, %c0_26] : memref<28x32xbf16, #tpu.memory_space<vmem>>, vector<28x32xbf16>
    %35 = arith.truncf %33 : vector<16x28xf32> to vector<16x28xbf16>
    %cst_27 = arith.constant dense<0.000000e+00> : vector<16x32xf32>
    %36 = tpu.matmul %35, %34, %cst_27 {dimension_numbers = #tpu.dot_dimension_numbers<[1], [0], [0], [1], [0, 0, 1, 1], [], []>} : vector<16x28xbf16>, vector<28x32xbf16>, vector<16x32xf32> -> vector<16x32xf32>
    %c0_28 = arith.constant 0 : index
    %c0_29 = arith.constant 0 : index
    %37 = vector.load %arg16[%c0_28, %c0_29] : memref<32x96xbf16, #tpu.memory_space<vmem>>, vector<32x96xbf16>
    %38 = arith.truncf %36 : vector<16x32xf32> to vector<16x32xbf16>
    %cst_30 = arith.constant dense<0.000000e+00> : vector<16x96xf32>
    %39 = tpu.matmul %38, %37, %cst_30 {dimension_numbers = #tpu.dot_dimension_numbers<[1], [0], [0], [1], [0, 0, 1, 1], [], []>} : vector<16x32xbf16>, vector<32x96xbf16>, vector<16x96xf32> -> vector<16x96xf32>
    %c0_31 = arith.constant 0 : index
    %c0_32 = arith.constant 0 : index
    %40 = vector.load %arg17[%c0_31, %c0_32] : memref<1x96xf32, #tpu.memory_space<vmem>>, vector<1x96xf32>
    %41 = vector.broadcast %40 : vector<1x96xf32> to vector<16x96xf32>
    %42 = arith.addf %39, %41 : vector<16x96xf32>
    %43 = vector.extract_strided_slice %42 {offsets = [0, 0], sizes = [16, 32], strides = [1, 1]} : vector<16x96xf32> to vector<16x32xf32>
    %44 = vector.extract_strided_slice %42 {offsets = [0, 32], sizes = [16, 32], strides = [1, 1]} : vector<16x96xf32> to vector<16x32xf32>
    %45 = vector.extract_strided_slice %42 {offsets = [0, 64], sizes = [16, 32], strides = [1, 1]} : vector<16x96xf32> to vector<16x32xf32>
    %46 = arith.truncf %43 : vector<16x32xf32> to vector<16x32xbf16>
    %47 = arith.truncf %44 : vector<16x32xf32> to vector<16x32xbf16>
    %cst_33 = arith.constant dense<0.000000e+00> : vector<9x32xf32>
    %48 = tpu.matmul %1, %46, %cst_33 {dimension_numbers = #tpu.dot_dimension_numbers<[1], [0], [0], [1], [0, 0, 1, 1], [], []>} : vector<9x16xbf16>, vector<16x32xbf16>, vector<9x32xf32> -> vector<9x32xf32>
    %cst_34 = arith.constant dense<0.000000e+00> : vector<9x32xf32>
    %49 = tpu.matmul %3, %46, %cst_34 {dimension_numbers = #tpu.dot_dimension_numbers<[1], [0], [0], [1], [0, 0, 1, 1], [], []>} : vector<9x16xbf16>, vector<16x32xbf16>, vector<9x32xf32> -> vector<9x32xf32>
    %cst_35 = arith.constant dense<0.000000e+00> : vector<9x32xf32>
    %50 = tpu.matmul %1, %47, %cst_35 {dimension_numbers = #tpu.dot_dimension_numbers<[1], [0], [0], [1], [0, 0, 1, 1], [], []>} : vector<9x16xbf16>, vector<16x32xbf16>, vector<9x32xf32> -> vector<9x32xf32>
    %cst_36 = arith.constant dense<0.000000e+00> : vector<9x32xf32>
    %51 = tpu.matmul %3, %47, %cst_36 {dimension_numbers = #tpu.dot_dimension_numbers<[1], [0], [0], [1], [0, 0, 1, 1], [], []>} : vector<9x16xbf16>, vector<16x32xbf16>, vector<9x32xf32> -> vector<9x32xf32>
    %52 = arith.mulf %48, %50 : vector<9x32xf32>
    %53 = arith.mulf %49, %51 : vector<9x32xf32>
    %54 = arith.addf %52, %53 : vector<9x32xf32>
    %55 = arith.mulf %48, %51 : vector<9x32xf32>
    %56 = arith.mulf %49, %50 : vector<9x32xf32>
    %57 = arith.subf %55, %56 : vector<9x32xf32>
    %cst_37 = arith.constant dense<0.000000e+00> : vector<9xf32>
    %58 = vector.multi_reduction <add>, %54, %cst_37 [1] : vector<9x32xf32> to vector<9xf32>
    %59 = vector.shape_cast %58 : vector<9xf32> to vector<9x1xf32>
    %cst_38 = arith.constant dense<0.000000e+00> : vector<9xf32>
    %60 = vector.multi_reduction <add>, %57, %cst_38 [1] : vector<9x32xf32> to vector<9xf32>
    %61 = vector.shape_cast %60 : vector<9xf32> to vector<9x1xf32>
    %cst_39 = arith.constant dense<0.000000e+00> : vector<16x1xf32>
    %62 = tpu.matmul %4, %59, %cst_39 {dimension_numbers = #tpu.dot_dimension_numbers<[1], [0], [0], [1], [0, 0, 1, 1], [], []>} : vector<16x9xf32>, vector<9x1xf32>, vector<16x1xf32> -> vector<16x1xf32>
    %cst_40 = arith.constant dense<0.000000e+00> : vector<16x1xf32>
    %63 = tpu.matmul %5, %61, %cst_40 {dimension_numbers = #tpu.dot_dimension_numbers<[1], [0], [0], [1], [0, 0, 1, 1], [], []>} : vector<16x9xf32>, vector<9x1xf32>, vector<16x1xf32> -> vector<16x1xf32>
    %64 = arith.subf %62, %63 : vector<16x1xf32>
    %cst_41 = arith.constant 3.125000e-02 : f32
    %65 = vector.broadcast %cst_41 : f32 to vector<16x1xf32>
    %66 = arith.mulf %64, %65 : vector<16x1xf32>
    %67 = tpu.iota {dimensions = array<i32: 0>} : vector<16x1xi32>
    %68 = vector.shape_cast %66 : vector<16x1xf32> to vector<1x16x1xf32>
    %cst_42 = arith.constant dense<0xFF800000> : vector<1xf32>
    %69 = vector.multi_reduction <maximumf>, %68, %cst_42 [1, 2] : vector<1x16x1xf32> to vector<1xf32>
    %70 = vector.shape_cast %69 : vector<1xf32> to vector<1x1x1xf32>
    %71 = vector.extract %70[0, 0, 0] : f32 from vector<1x1x1xf32>
    %72 = vector.broadcast %71 : f32 to vector<1x1xf32>
    %73 = vector.broadcast %72 : vector<1x1xf32> to vector<16x1xf32>
    %74 = arith.cmpf oge, %66, %73 : vector<16x1xf32>
    %c16_i32 = arith.constant 16 : i32
    %75 = vector.broadcast %c16_i32 : i32 to vector<16x1xi32>
    %76 = arith.select %74, %67, %75 : vector<16x1xi1>, vector<16x1xi32>
    %77 = vector.shape_cast %76 : vector<16x1xi32> to vector<1x16x1xi32>
    %cst_43 = arith.constant dense<2147483647> : vector<1xi32>
    %78 = vector.multi_reduction <minsi>, %77, %cst_43 [1, 2] : vector<1x16x1xi32> to vector<1xi32>
    %79 = vector.shape_cast %78 : vector<1xi32> to vector<1x1x1xi32>
    %80 = vector.extract %79[0, 0, 0] : i32 from vector<1x1x1xi32>
    %81 = vector.broadcast %80 : i32 to vector<1x1xi32>
    %82 = vector.broadcast %81 : vector<1x1xi32> to vector<16x1xi32>
    %83 = arith.cmpi eq, %67, %82 : vector<16x1xi32>
    %cst_44 = arith.constant -1.000000e+30 : f32
    %84 = vector.broadcast %cst_44 : f32 to vector<16x1xf32>
    %85 = arith.select %83, %84, %66 : vector<16x1xi1>, vector<16x1xf32>
    %86 = vector.shape_cast %85 : vector<16x1xf32> to vector<1x16x1xf32>
    %cst_45 = arith.constant dense<0xFF800000> : vector<1xf32>
    %87 = vector.multi_reduction <maximumf>, %86, %cst_45 [1, 2] : vector<1x16x1xf32> to vector<1xf32>
    %88 = vector.shape_cast %87 : vector<1xf32> to vector<1x1x1xf32>
    %89 = vector.extract %88[0, 0, 0] : f32 from vector<1x1x1xf32>
    %90 = vector.broadcast %89 : f32 to vector<1x1xf32>
    %91 = vector.broadcast %90 : vector<1x1xf32> to vector<16x1xf32>
    %92 = arith.cmpf oge, %85, %91 : vector<16x1xf32>
    %c16_i32_46 = arith.constant 16 : i32
    %93 = vector.broadcast %c16_i32_46 : i32 to vector<16x1xi32>
    %94 = arith.select %92, %67, %93 : vector<16x1xi1>, vector<16x1xi32>
    %95 = vector.shape_cast %94 : vector<16x1xi32> to vector<1x16x1xi32>
    %cst_47 = arith.constant dense<2147483647> : vector<1xi32>
    %96 = vector.multi_reduction <minsi>, %95, %cst_47 [1, 2] : vector<1x16x1xi32> to vector<1xi32>
    %97 = vector.shape_cast %96 : vector<1xi32> to vector<1x1x1xi32>
    %98 = vector.extract %97[0, 0, 0] : i32 from vector<1x1x1xi32>
    %99 = vector.broadcast %98 : i32 to vector<1x1xi32>
    %100 = arith.maximumf %72, %90 : vector<1x1xf32>
    %101 = arith.subf %72, %100 : vector<1x1xf32>
    %102 = math.exp %101 : vector<1x1xf32>
    %103 = arith.subf %90, %100 : vector<1x1xf32>
    %104 = math.exp %103 : vector<1x1xf32>
    %105 = arith.addf %102, %104 : vector<1x1xf32>
    %cst_48 = arith.constant 1.000000e+00 : f32
    %106 = vector.broadcast %cst_48 : f32 to vector<1x1xf32>
    %107 = arith.divf %106, %105 : vector<1x1xf32>
    %cst_49 = arith.constant 0.000000e+00 : f32
    %108 = vector.broadcast %cst_49 : f32 to vector<16x16xf32>
    %109 = arith.mulf %102, %107 : vector<1x1xf32>
    %110 = vector.broadcast %81 : vector<1x1xi32> to vector<16x16xi32>
    %111 = arith.cmpi eq, %10, %110 : vector<16x16xi32>
    %112 = arith.extui %111 : vector<16x16xi1> to vector<16x16xi32>
    %113 = arith.sitofp %112 : vector<16x16xi32> to vector<16x16xf32>
    %114 = vector.broadcast %109 : vector<1x1xf32> to vector<16x16xf32>
    %115 = arith.mulf %114, %113 : vector<16x16xf32>
    %116 = arith.addf %108, %115 : vector<16x16xf32>
    %117 = arith.mulf %104, %107 : vector<1x1xf32>
    %118 = vector.broadcast %99 : vector<1x1xi32> to vector<16x16xi32>
    %119 = arith.cmpi eq, %10, %118 : vector<16x16xi32>
    %120 = arith.extui %119 : vector<16x16xi1> to vector<16x16xi32>
    %121 = arith.sitofp %120 : vector<16x16xi32> to vector<16x16xf32>
    %122 = vector.broadcast %117 : vector<1x1xf32> to vector<16x16xf32>
    %123 = arith.mulf %122, %121 : vector<16x16xf32>
    %124 = arith.addf %116, %123 : vector<16x16xf32>
    %125 = arith.truncf %124 : vector<16x16xf32> to vector<16x16xbf16>
    %126 = arith.truncf %45 : vector<16x32xf32> to vector<16x32xbf16>
    %cst_50 = arith.constant dense<0.000000e+00> : vector<16x32xf32>
    %127 = tpu.matmul %125, %126, %cst_50 {dimension_numbers = #tpu.dot_dimension_numbers<[1], [0], [0], [1], [0, 0, 1, 1], [], []>} : vector<16x16xbf16>, vector<16x32xbf16>, vector<16x32xf32> -> vector<16x32xf32>
    %c0_51 = arith.constant 0 : index
    %c0_52 = arith.constant 0 : index
    %128 = vector.load %arg18[%c0_51, %c0_52] : memref<32x32xbf16, #tpu.memory_space<vmem>>, vector<32x32xbf16>
    %129 = arith.truncf %127 : vector<16x32xf32> to vector<16x32xbf16>
    %cst_53 = arith.constant dense<0.000000e+00> : vector<16x32xf32>
    %130 = tpu.matmul %129, %128, %cst_53 {dimension_numbers = #tpu.dot_dimension_numbers<[1], [0], [0], [1], [0, 0, 1, 1], [], []>} : vector<16x32xbf16>, vector<32x32xbf16>, vector<16x32xf32> -> vector<16x32xf32>
    %131 = arith.addf %36, %130 : vector<16x32xf32>
    %c0_54 = arith.constant 0 : index
    %c0_55 = arith.constant 0 : index
    %132 = vector.load %arg19[%c0_54, %c0_55] : memref<1x32xf32, #tpu.memory_space<vmem>>, vector<1x32xf32>
    %133 = vector.broadcast %132 : vector<1x32xf32> to vector<16x32xf32>
    %134 = arith.addf %131, %133 : vector<16x32xf32>
    %135 = arith.truncf %134 : vector<16x32xf32> to vector<16x32xbf16>
    %cst_56 = arith.constant dense<0.000000e+00> : vector<16x32xf32>
    %136 = tpu.matmul %7, %135, %cst_56 {dimension_numbers = #tpu.dot_dimension_numbers<[1], [0], [0], [1], [0, 0, 1, 1], [], []>} : vector<16x16xbf16>, vector<16x32xbf16>, vector<16x32xf32> -> vector<16x32xf32>
    %137 = arith.subf %134, %136 : vector<16x32xf32>
    %c0_57 = arith.constant 0 : index
    %c0_58 = arith.constant 0 : index
    %138 = vector.load %arg20[%c0_57, %c0_58] : memref<32x32xbf16, #tpu.memory_space<vmem>>, vector<32x32xbf16>
    %139 = arith.truncf %137 : vector<16x32xf32> to vector<16x32xbf16>
    %cst_59 = arith.constant dense<0.000000e+00> : vector<16x32xf32>
    %140 = tpu.matmul %139, %138, %cst_59 {dimension_numbers = #tpu.dot_dimension_numbers<[1], [0], [0], [1], [0, 0, 1, 1], [], []>} : vector<16x32xbf16>, vector<32x32xbf16>, vector<16x32xf32> -> vector<16x32xf32>
    %c0_60 = arith.constant 0 : index
    %c0_61 = arith.constant 0 : index
    %141 = vector.load %arg21[%c0_60, %c0_61] : memref<1x32xf32, #tpu.memory_space<vmem>>, vector<1x32xf32>
    %142 = vector.broadcast %141 : vector<1x32xf32> to vector<16x32xf32>
    %143 = arith.addf %140, %142 : vector<16x32xf32>
    %c0_62 = arith.constant 0 : index
    %c0_63 = arith.constant 0 : index
    %144 = vector.load %arg22[%c0_62, %c0_63] : memref<32x64xbf16, #tpu.memory_space<vmem>>, vector<32x64xbf16>
    %145 = arith.truncf %14 : vector<16x32xf32> to vector<16x32xbf16>
    %cst_64 = arith.constant dense<0.000000e+00> : vector<16x64xf32>
    %146 = tpu.matmul %145, %144, %cst_64 {dimension_numbers = #tpu.dot_dimension_numbers<[1], [0], [0], [1], [0, 0, 1, 1], [], []>} : vector<16x32xbf16>, vector<32x64xbf16>, vector<16x64xf32> -> vector<16x64xf32>
    %c0_65 = arith.constant 0 : index
    %c0_66 = arith.constant 0 : index
    %147 = vector.load %arg23[%c0_65, %c0_66] : memref<1x64xf32, #tpu.memory_space<vmem>>, vector<1x64xf32>
    %148 = vector.broadcast %147 : vector<1x64xf32> to vector<16x64xf32>
    %149 = arith.addf %146, %148 : vector<16x64xf32>
    %150 = vector.extract_strided_slice %149 {offsets = [0, 0], sizes = [16, 32], strides = [1, 1]} : vector<16x64xf32> to vector<16x32xf32>
    %151 = vector.extract_strided_slice %149 {offsets = [0, 32], sizes = [16, 32], strides = [1, 1]} : vector<16x64xf32> to vector<16x32xf32>
    %152 = arith.truncf %143 : vector<16x32xf32> to vector<16x32xbf16>
    %153 = arith.truncf %150 : vector<16x32xf32> to vector<16x32xbf16>
    %cst_67 = arith.constant dense<0.000000e+00> : vector<9x32xf32>
    %154 = tpu.matmul %1, %152, %cst_67 {dimension_numbers = #tpu.dot_dimension_numbers<[1], [0], [0], [1], [0, 0, 1, 1], [], []>} : vector<9x16xbf16>, vector<16x32xbf16>, vector<9x32xf32> -> vector<9x32xf32>
    %cst_68 = arith.constant dense<0.000000e+00> : vector<9x32xf32>
    %155 = tpu.matmul %3, %152, %cst_68 {dimension_numbers = #tpu.dot_dimension_numbers<[1], [0], [0], [1], [0, 0, 1, 1], [], []>} : vector<9x16xbf16>, vector<16x32xbf16>, vector<9x32xf32> -> vector<9x32xf32>
    %cst_69 = arith.constant dense<0.000000e+00> : vector<9x32xf32>
    %156 = tpu.matmul %1, %153, %cst_69 {dimension_numbers = #tpu.dot_dimension_numbers<[1], [0], [0], [1], [0, 0, 1, 1], [], []>} : vector<9x16xbf16>, vector<16x32xbf16>, vector<9x32xf32> -> vector<9x32xf32>
    %cst_70 = arith.constant dense<0.000000e+00> : vector<9x32xf32>
    %157 = tpu.matmul %3, %153, %cst_70 {dimension_numbers = #tpu.dot_dimension_numbers<[1], [0], [0], [1], [0, 0, 1, 1], [], []>} : vector<9x16xbf16>, vector<16x32xbf16>, vector<9x32xf32> -> vector<9x32xf32>
    %158 = arith.mulf %154, %156 : vector<9x32xf32>
    %159 = arith.mulf %155, %157 : vector<9x32xf32>
    %160 = arith.addf %158, %159 : vector<9x32xf32>
    %161 = arith.mulf %154, %157 : vector<9x32xf32>
    %162 = arith.mulf %155, %156 : vector<9x32xf32>
    %163 = arith.subf %161, %162 : vector<9x32xf32>
    %cst_71 = arith.constant dense<0.000000e+00> : vector<9xf32>
    %164 = vector.multi_reduction <add>, %160, %cst_71 [1] : vector<9x32xf32> to vector<9xf32>
    %165 = vector.shape_cast %164 : vector<9xf32> to vector<9x1xf32>
    %cst_72 = arith.constant dense<0.000000e+00> : vector<9xf32>
    %166 = vector.multi_reduction <add>, %163, %cst_72 [1] : vector<9x32xf32> to vector<9xf32>
    %167 = vector.shape_cast %166 : vector<9xf32> to vector<9x1xf32>
    %cst_73 = arith.constant dense<0.000000e+00> : vector<16x1xf32>
    %168 = tpu.matmul %4, %165, %cst_73 {dimension_numbers = #tpu.dot_dimension_numbers<[1], [0], [0], [1], [0, 0, 1, 1], [], []>} : vector<16x9xf32>, vector<9x1xf32>, vector<16x1xf32> -> vector<16x1xf32>
    %cst_74 = arith.constant dense<0.000000e+00> : vector<16x1xf32>
    %169 = tpu.matmul %5, %167, %cst_74 {dimension_numbers = #tpu.dot_dimension_numbers<[1], [0], [0], [1], [0, 0, 1, 1], [], []>} : vector<16x9xf32>, vector<9x1xf32>, vector<16x1xf32> -> vector<16x1xf32>
    %170 = arith.subf %168, %169 : vector<16x1xf32>
    %cst_75 = arith.constant 3.125000e-02 : f32
    %171 = vector.broadcast %cst_75 : f32 to vector<16x1xf32>
    %172 = arith.mulf %170, %171 : vector<16x1xf32>
    %173 = tpu.iota {dimensions = array<i32: 0>} : vector<16x1xi32>
    %174 = vector.shape_cast %172 : vector<16x1xf32> to vector<1x16x1xf32>
    %cst_76 = arith.constant dense<0xFF800000> : vector<1xf32>
    %175 = vector.multi_reduction <maximumf>, %174, %cst_76 [1, 2] : vector<1x16x1xf32> to vector<1xf32>
    %176 = vector.shape_cast %175 : vector<1xf32> to vector<1x1x1xf32>
    %177 = vector.extract %176[0, 0, 0] : f32 from vector<1x1x1xf32>
    %178 = vector.broadcast %177 : f32 to vector<1x1xf32>
    %179 = vector.broadcast %178 : vector<1x1xf32> to vector<16x1xf32>
    %180 = arith.cmpf oge, %172, %179 : vector<16x1xf32>
    %c16_i32_77 = arith.constant 16 : i32
    %181 = vector.broadcast %c16_i32_77 : i32 to vector<16x1xi32>
    %182 = arith.select %180, %173, %181 : vector<16x1xi1>, vector<16x1xi32>
    %183 = vector.shape_cast %182 : vector<16x1xi32> to vector<1x16x1xi32>
    %cst_78 = arith.constant dense<2147483647> : vector<1xi32>
    %184 = vector.multi_reduction <minsi>, %183, %cst_78 [1, 2] : vector<1x16x1xi32> to vector<1xi32>
    %185 = vector.shape_cast %184 : vector<1xi32> to vector<1x1x1xi32>
    %186 = vector.extract %185[0, 0, 0] : i32 from vector<1x1x1xi32>
    %187 = vector.broadcast %186 : i32 to vector<1x1xi32>
    %188 = vector.broadcast %187 : vector<1x1xi32> to vector<16x1xi32>
    %189 = arith.cmpi eq, %173, %188 : vector<16x1xi32>
    %cst_79 = arith.constant -1.000000e+30 : f32
    %190 = vector.broadcast %cst_79 : f32 to vector<16x1xf32>
    %191 = arith.select %189, %190, %172 : vector<16x1xi1>, vector<16x1xf32>
    %192 = vector.shape_cast %191 : vector<16x1xf32> to vector<1x16x1xf32>
    %cst_80 = arith.constant dense<0xFF800000> : vector<1xf32>
    %193 = vector.multi_reduction <maximumf>, %192, %cst_80 [1, 2] : vector<1x16x1xf32> to vector<1xf32>
    %194 = vector.shape_cast %193 : vector<1xf32> to vector<1x1x1xf32>
    %195 = vector.extract %194[0, 0, 0] : f32 from vector<1x1x1xf32>
    %196 = vector.broadcast %195 : f32 to vector<1x1xf32>
    %197 = vector.broadcast %196 : vector<1x1xf32> to vector<16x1xf32>
    %198 = arith.cmpf oge, %191, %197 : vector<16x1xf32>
    %c16_i32_81 = arith.constant 16 : i32
    %199 = vector.broadcast %c16_i32_81 : i32 to vector<16x1xi32>
    %200 = arith.select %198, %173, %199 : vector<16x1xi1>, vector<16x1xi32>
    %201 = vector.shape_cast %200 : vector<16x1xi32> to vector<1x16x1xi32>
    %cst_82 = arith.constant dense<2147483647> : vector<1xi32>
    %202 = vector.multi_reduction <minsi>, %201, %cst_82 [1, 2] : vector<1x16x1xi32> to vector<1xi32>
    %203 = vector.shape_cast %202 : vector<1xi32> to vector<1x1x1xi32>
    %204 = vector.extract %203[0, 0, 0] : i32 from vector<1x1x1xi32>
    %205 = vector.broadcast %204 : i32 to vector<1x1xi32>
    %206 = arith.maximumf %178, %196 : vector<1x1xf32>
    %207 = arith.subf %178, %206 : vector<1x1xf32>
    %208 = math.exp %207 : vector<1x1xf32>
    %209 = arith.subf %196, %206 : vector<1x1xf32>
    %210 = math.exp %209 : vector<1x1xf32>
    %211 = arith.addf %208, %210 : vector<1x1xf32>
    %cst_83 = arith.constant 1.000000e+00 : f32
    %212 = vector.broadcast %cst_83 : f32 to vector<1x1xf32>
    %213 = arith.divf %212, %211 : vector<1x1xf32>
    %cst_84 = arith.constant 0.000000e+00 : f32
    %214 = vector.broadcast %cst_84 : f32 to vector<16x16xf32>
    %215 = arith.mulf %208, %213 : vector<1x1xf32>
    %216 = vector.broadcast %187 : vector<1x1xi32> to vector<16x16xi32>
    %217 = arith.cmpi eq, %10, %216 : vector<16x16xi32>
    %218 = arith.extui %217 : vector<16x16xi1> to vector<16x16xi32>
    %219 = arith.sitofp %218 : vector<16x16xi32> to vector<16x16xf32>
    %220 = vector.broadcast %215 : vector<1x1xf32> to vector<16x16xf32>
    %221 = arith.mulf %220, %219 : vector<16x16xf32>
    %222 = arith.addf %214, %221 : vector<16x16xf32>
    %223 = arith.mulf %210, %213 : vector<1x1xf32>
    %224 = vector.broadcast %205 : vector<1x1xi32> to vector<16x16xi32>
    %225 = arith.cmpi eq, %10, %224 : vector<16x16xi32>
    %226 = arith.extui %225 : vector<16x16xi1> to vector<16x16xi32>
    %227 = arith.sitofp %226 : vector<16x16xi32> to vector<16x16xf32>
    %228 = vector.broadcast %223 : vector<1x1xf32> to vector<16x16xf32>
    %229 = arith.mulf %228, %227 : vector<16x16xf32>
    %230 = arith.addf %222, %229 : vector<16x16xf32>
    %231 = arith.truncf %230 : vector<16x16xf32> to vector<16x16xbf16>
    %232 = arith.truncf %151 : vector<16x32xf32> to vector<16x32xbf16>
    %cst_85 = arith.constant dense<0.000000e+00> : vector<16x32xf32>
    %233 = tpu.matmul %231, %232, %cst_85 {dimension_numbers = #tpu.dot_dimension_numbers<[1], [0], [0], [1], [0, 0, 1, 1], [], []>} : vector<16x16xbf16>, vector<16x32xbf16>, vector<16x32xf32> -> vector<16x32xf32>
    %c0_86 = arith.constant 0 : index
    %c0_87 = arith.constant 0 : index
    %234 = vector.load %arg24[%c0_86, %c0_87] : memref<32x32xbf16, #tpu.memory_space<vmem>>, vector<32x32xbf16>
    %235 = arith.truncf %233 : vector<16x32xf32> to vector<16x32xbf16>
    %cst_88 = arith.constant dense<0.000000e+00> : vector<16x32xf32>
    %236 = tpu.matmul %235, %234, %cst_88 {dimension_numbers = #tpu.dot_dimension_numbers<[1], [0], [0], [1], [0, 0, 1, 1], [], []>} : vector<16x32xbf16>, vector<32x32xbf16>, vector<16x32xf32> -> vector<16x32xf32>
    %237 = arith.addf %137, %236 : vector<16x32xf32>
    %c0_89 = arith.constant 0 : index
    %c0_90 = arith.constant 0 : index
    %238 = vector.load %arg25[%c0_89, %c0_90] : memref<1x32xf32, #tpu.memory_space<vmem>>, vector<1x32xf32>
    %239 = vector.broadcast %238 : vector<1x32xf32> to vector<16x32xf32>
    %240 = arith.addf %237, %239 : vector<16x32xf32>
    %241 = arith.truncf %240 : vector<16x32xf32> to vector<16x32xbf16>
    %cst_91 = arith.constant dense<0.000000e+00> : vector<16x32xf32>
    %242 = tpu.matmul %7, %241, %cst_91 {dimension_numbers = #tpu.dot_dimension_numbers<[1], [0], [0], [1], [0, 0, 1, 1], [], []>} : vector<16x16xbf16>, vector<16x32xbf16>, vector<16x32xf32> -> vector<16x32xf32>
    %243 = arith.subf %240, %242 : vector<16x32xf32>
    %c0_92 = arith.constant 0 : index
    %c0_93 = arith.constant 0 : index
    %244 = vector.load %arg26[%c0_92, %c0_93] : memref<32x64xbf16, #tpu.memory_space<vmem>>, vector<32x64xbf16>
    %245 = arith.truncf %243 : vector<16x32xf32> to vector<16x32xbf16>
    %cst_94 = arith.constant dense<0.000000e+00> : vector<16x64xf32>
    %246 = tpu.matmul %245, %244, %cst_94 {dimension_numbers = #tpu.dot_dimension_numbers<[1], [0], [0], [1], [0, 0, 1, 1], [], []>} : vector<16x32xbf16>, vector<32x64xbf16>, vector<16x64xf32> -> vector<16x64xf32>
    %cst_95 = arith.constant 0.000000e+00 : f32
    %247 = vector.broadcast %cst_95 : f32 to vector<16x64xf32>
    %248 = arith.maximumf %246, %247 : vector<16x64xf32>
    %c0_96 = arith.constant 0 : index
    %c0_97 = arith.constant 0 : index
    %249 = vector.load %arg27[%c0_96, %c0_97] : memref<64x32xbf16, #tpu.memory_space<vmem>>, vector<64x32xbf16>
    %250 = arith.truncf %248 : vector<16x64xf32> to vector<16x64xbf16>
    %cst_98 = arith.constant dense<0.000000e+00> : vector<16x32xf32>
    %251 = tpu.matmul %250, %249, %cst_98 {dimension_numbers = #tpu.dot_dimension_numbers<[1], [0], [0], [1], [0, 0, 1, 1], [], []>} : vector<16x64xbf16>, vector<64x32xbf16>, vector<16x32xf32> -> vector<16x32xf32>
    %252 = arith.addf %243, %251 : vector<16x32xf32>
    %253 = arith.truncf %252 : vector<16x32xf32> to vector<16x32xbf16>
    %cst_99 = arith.constant dense<0.000000e+00> : vector<16x32xf32>
    %254 = tpu.matmul %7, %253, %cst_99 {dimension_numbers = #tpu.dot_dimension_numbers<[1], [0], [0], [1], [0, 0, 1, 1], [], []>} : vector<16x16xbf16>, vector<16x32xbf16>, vector<16x32xf32> -> vector<16x32xf32>
    %255 = arith.subf %252, %254 : vector<16x32xf32>
    %256 = arith.addf %136, %242 : vector<16x32xf32>
    %257 = arith.addf %256, %254 : vector<16x32xf32>
    %c1_i32_100 = arith.constant 1 : i32
    %258 = tpu.dynamic_rotate %257 by %c1_i32_100 dim 0 : vector<16x32xf32>, i32 -> vector<16x32xf32>
    %c15_i32_101 = arith.constant 15 : i32
    %259 = tpu.dynamic_rotate %257 by %c15_i32_101 dim 0 : vector<16x32xf32>, i32 -> vector<16x32xf32>
    %260 = tpu.concatenate %258, %257, %259 in 1 : vector<16x32xf32>, vector<16x32xf32>, vector<16x32xf32> -> vector<16x96xf32>
    %c0_102 = arith.constant 0 : index
    %c0_103 = arith.constant 0 : index
    %261 = vector.load %arg28[%c0_102, %c0_103] : memref<96x8xbf16, #tpu.memory_space<vmem>>, vector<96x8xbf16>
    %262 = arith.truncf %260 : vector<16x96xf32> to vector<16x96xbf16>
    %cst_104 = arith.constant dense<0.000000e+00> : vector<16x8xf32>
    %263 = tpu.matmul %262, %261, %cst_104 {dimension_numbers = #tpu.dot_dimension_numbers<[1], [0], [0], [1], [0, 0, 1, 1], [], []>} : vector<16x96xbf16>, vector<96x8xbf16>, vector<16x8xf32> -> vector<16x8xf32>
    %264 = arith.addf %26, %263 : vector<16x8xf32>
    %c0_105 = arith.constant 0 : index
    %c0_106 = arith.constant 0 : index
    %265 = vector.load %arg12[%c0_105, %c0_106] : memref<1x32xf32, #tpu.memory_space<vmem>>, vector<1x32xf32>
    %c0_107 = arith.constant 0 : index
    %c0_108 = arith.constant 0 : index
    %266 = vector.load %arg13[%c0_107, %c0_108] : memref<1x32xf32, #tpu.memory_space<vmem>>, vector<1x32xf32>
    %cst_109 = arith.constant dense<0.000000e+00> : vector<16xf32>
    %267 = vector.multi_reduction <add>, %255, %cst_109 [1] : vector<16x32xf32> to vector<16xf32>
    %268 = vector.shape_cast %267 : vector<16xf32> to vector<16x1xf32>
    %cst_110 = arith.constant 3.200000e+01 : f32
    %269 = vector.broadcast %cst_110 : f32 to vector<16x1xf32>
    %270 = arith.divf %268, %269 : vector<16x1xf32>
    %271 = vector.broadcast %270 : vector<16x1xf32> to vector<16x32xf32>
    %272 = arith.subf %255, %271 : vector<16x32xf32>
    %273 = arith.mulf %272, %272 : vector<16x32xf32>
    %cst_111 = arith.constant dense<0.000000e+00> : vector<16xf32>
    %274 = vector.multi_reduction <add>, %273, %cst_111 [1] : vector<16x32xf32> to vector<16xf32>
    %275 = vector.shape_cast %274 : vector<16xf32> to vector<16x1xf32>
    %cst_112 = arith.constant 3.200000e+01 : f32
    %276 = vector.broadcast %cst_112 : f32 to vector<16x1xf32>
    %277 = arith.divf %275, %276 : vector<16x1xf32>
    %cst_113 = arith.constant 9.99999974E-6 : f32
    %278 = vector.broadcast %cst_113 : f32 to vector<16x1xf32>
    %279 = arith.addf %277, %278 : vector<16x1xf32>
    %280 = math.rsqrt %279 : vector<16x1xf32>
    %281 = vector.broadcast %280 : vector<16x1xf32> to vector<16x32xf32>
    %282 = arith.mulf %272, %281 : vector<16x32xf32>
    %283 = vector.broadcast %265 : vector<1x32xf32> to vector<16x32xf32>
    %284 = arith.mulf %282, %283 : vector<16x32xf32>
    %285 = vector.broadcast %266 : vector<1x32xf32> to vector<16x32xf32>
    %286 = arith.addf %284, %285 : vector<16x32xf32>
    %cst_114 = arith.constant dense<0.000000e+00> : vector<32xf32>
    %287 = vector.multi_reduction <add>, %286, %cst_114 [0] : vector<16x32xf32> to vector<32xf32>
    %288 = vector.shape_cast %287 : vector<32xf32> to vector<1x32xf32>
    %cst_115 = arith.constant 1.600000e+01 : f32
    %289 = vector.broadcast %cst_115 : f32 to vector<1x32xf32>
    %290 = arith.divf %288, %289 : vector<1x32xf32>
    %291 = vector.broadcast %290 : vector<1x32xf32> to vector<16x32xf32>
    %292 = arith.subf %286, %291 : vector<16x32xf32>
    %293 = vector.extract_strided_slice %292 {offsets = [8, 0], sizes = [8, 32], strides = [1, 1]} : vector<16x32xf32> to vector<8x32xf32>
    %294 = vector.extract_strided_slice %264 {offsets = [8, 0], sizes = [8, 8], strides = [1, 1]} : vector<16x8xf32> to vector<8x8xf32>
    %c0_116 = arith.constant 0 : index
    %c0_117 = arith.constant 0 : index
    %295 = vector.load %arg14[%c0_116, %c0_117] : memref<32x8xbf16, #tpu.memory_space<vmem>>, vector<32x8xbf16>
    %296 = arith.truncf %293 : vector<8x32xf32> to vector<8x32xbf16>
    %cst_118 = arith.constant dense<0.000000e+00> : vector<8x8xf32>
    %297 = tpu.matmul %296, %295, %cst_118 {dimension_numbers = #tpu.dot_dimension_numbers<[1], [0], [0], [1], [0, 0, 1, 1], [], []>} : vector<8x32xbf16>, vector<32x8xbf16>, vector<8x8xf32> -> vector<8x8xf32>
    %c0_119 = arith.constant 0 : index
    %c0_120 = arith.constant 0 : index
    %298 = vector.load %arg15[%c0_119, %c0_120] : memref<1x8xf32, #tpu.memory_space<vmem>>, vector<1x8xf32>
    %299 = vector.broadcast %298 : vector<1x8xf32> to vector<8x8xf32>
    %300 = arith.addf %297, %299 : vector<8x8xf32>
    %301 = arith.addf %300, %294 : vector<8x8xf32>
    %c0_121 = arith.constant 0 : index
    %c0_122 = arith.constant 0 : index
    %c0_123 = arith.constant 0 : index
    %302 = vector.load %arg29[%c0_121, %c0_122, %c0_123] : memref<1x8x8xf32, #tpu.memory_space<vmem>>, vector<1x8x8xf32>
    %303 = vector.shape_cast %302 : vector<1x8x8xf32> to vector<8x8xf32>
    %304 = vector.shape_cast %301 : vector<8x8xf32> to vector<1x8x8xf32>
    tpu.vector_store %arg29[%c0_121, %c0_122, %c0_123], %304 {strides = array<i32>} : memref<1x8x8xf32, #tpu.memory_space<vmem>>, vector<1x8x8xf32>,
    return
  }
  func.func @transform_0(%arg0: i32) -> (i32, i32, i32) {
    %c0_i32 = arith.constant 0 : i32
    %c0_i32_0 = arith.constant 0 : i32
    %c0_i32_1 = arith.constant 0 : i32
    return %arg0, %c0_i32, %c0_i32_0 : i32, i32, i32
  }
  func.func @transform_1(%arg0: i32) -> (i32, i32, i32) {
    %c0_i32 = arith.constant 0 : i32
    %c0_i32_0 = arith.constant 0 : i32
    %c0_i32_1 = arith.constant 0 : i32
    return %arg0, %c0_i32, %c0_i32_0 : i32, i32, i32
  }
  func.func @transform_2(%arg0: i32) -> (i32, i32, i32) {
    %c0_i32 = arith.constant 0 : i32
    %c0_i32_0 = arith.constant 0 : i32
    %c0_i32_1 = arith.constant 0 : i32
    return %arg0, %c0_i32, %c0_i32_0 : i32, i32, i32
  }
  func.func @transform_3(%arg0: i32) -> (i32, i32) {
    %c0_i32 = arith.constant 0 : i32
    %c0_i32_0 = arith.constant 0 : i32
    %c0_i32_1 = arith.constant 0 : i32
    return %c0_i32, %c0_i32_0 : i32, i32
  }
  func.func @transform_4(%arg0: i32) -> (i32, i32) {
    %c0_i32 = arith.constant 0 : i32
    %c0_i32_0 = arith.constant 0 : i32
    %c0_i32_1 = arith.constant 0 : i32
    return %c0_i32, %c0_i32_0 : i32, i32
  }
  func.func @transform_5(%arg0: i32) -> (i32, i32) {
    %c0_i32 = arith.constant 0 : i32
    %c0_i32_0 = arith.constant 0 : i32
    %c0_i32_1 = arith.constant 0 : i32
    return %c0_i32, %c0_i32_0 : i32, i32
  }
  func.func @transform_6(%arg0: i32) -> (i32, i32) {
    %c0_i32 = arith.constant 0 : i32
    %c0_i32_0 = arith.constant 0 : i32
    %c0_i32_1 = arith.constant 0 : i32
    return %c0_i32, %c0_i32_0 : i32, i32
  }
  func.func @transform_7(%arg0: i32) -> (i32, i32) {
    %c0_i32 = arith.constant 0 : i32
    %c0_i32_0 = arith.constant 0 : i32
    %c0_i32_1 = arith.constant 0 : i32
    return %c0_i32, %c0_i32_0 : i32, i32
  }
  func.func @transform_8(%arg0: i32) -> (i32, i32) {
    %c0_i32 = arith.constant 0 : i32
    %c0_i32_0 = arith.constant 0 : i32
    %c0_i32_1 = arith.constant 0 : i32
    return %c0_i32, %c0_i32_0 : i32, i32
  }
  func.func @transform_9(%arg0: i32) -> (i32, i32) {
    %c0_i32 = arith.constant 0 : i32
    %c0_i32_0 = arith.constant 0 : i32
    %c0_i32_1 = arith.constant 0 : i32
    return %c0_i32, %c0_i32_0 : i32, i32
  }
  func.func @transform_10(%arg0: i32) -> (i32, i32) {
    %c0_i32 = arith.constant 0 : i32
    %c0_i32_0 = arith.constant 0 : i32
    %c0_i32_1 = arith.constant 0 : i32
    return %c0_i32, %c0_i32_0 : i32, i32
  }
  func.func @transform_11(%arg0: i32) -> (i32, i32) {
    %c0_i32 = arith.constant 0 : i32
    %c0_i32_0 = arith.constant 0 : i32
    %c0_i32_1 = arith.constant 0 : i32
    return %c0_i32, %c0_i32_0 : i32, i32
  }
  func.func @transform_12(%arg0: i32) -> (i32, i32) {
    %c0_i32 = arith.constant 0 : i32
    %c0_i32_0 = arith.constant 0 : i32
    %c0_i32_1 = arith.constant 0 : i32
    return %c0_i32, %c0_i32_0 : i32, i32
  }
  func.func @transform_13(%arg0: i32) -> (i32, i32) {
    %c0_i32 = arith.constant 0 : i32
    %c0_i32_0 = arith.constant 0 : i32
    %c0_i32_1 = arith.constant 0 : i32
    return %c0_i32, %c0_i32_0 : i32, i32
  }
  func.func @transform_14(%arg0: i32) -> (i32, i32) {
    %c0_i32 = arith.constant 0 : i32
    %c0_i32_0 = arith.constant 0 : i32
    %c0_i32_1 = arith.constant 0 : i32
    return %c0_i32, %c0_i32_0 : i32, i32
  }
  func.func @transform_15(%arg0: i32) -> (i32, i32) {
    %c0_i32 = arith.constant 0 : i32
    %c0_i32_0 = arith.constant 0 : i32
    %c0_i32_1 = arith.constant 0 : i32
    return %c0_i32, %c0_i32_0 : i32, i32
  }
  func.func @transform_16(%arg0: i32) -> (i32, i32) {
    %c0_i32 = arith.constant 0 : i32
    %c0_i32_0 = arith.constant 0 : i32
    %c0_i32_1 = arith.constant 0 : i32
    return %c0_i32, %c0_i32_0 : i32, i32
  }
  func.func @transform_17(%arg0: i32) -> (i32, i32) {
    %c0_i32 = arith.constant 0 : i32
    %c0_i32_0 = arith.constant 0 : i32
    %c0_i32_1 = arith.constant 0 : i32
    return %c0_i32, %c0_i32_0 : i32, i32
  }
  func.func @transform_18(%arg0: i32) -> (i32, i32) {
    %c0_i32 = arith.constant 0 : i32
    %c0_i32_0 = arith.constant 0 : i32
    %c0_i32_1 = arith.constant 0 : i32
    return %c0_i32, %c0_i32_0 : i32, i32
  }
  func.func @transform_19(%arg0: i32) -> (i32, i32) {
    %c0_i32 = arith.constant 0 : i32
    %c0_i32_0 = arith.constant 0 : i32
    %c0_i32_1 = arith.constant 0 : i32
    return %c0_i32, %c0_i32_0 : i32, i32
  }
  func.func @transform_20(%arg0: i32) -> (i32, i32) {
    %c0_i32 = arith.constant 0 : i32
    %c0_i32_0 = arith.constant 0 : i32
    %c0_i32_1 = arith.constant 0 : i32
    return %c0_i32, %c0_i32_0 : i32, i32
  }
  func.func @transform_21(%arg0: i32) -> (i32, i32) {
    %c0_i32 = arith.constant 0 : i32
    %c0_i32_0 = arith.constant 0 : i32
    %c0_i32_1 = arith.constant 0 : i32
    return %c0_i32, %c0_i32_0 : i32, i32
  }
  func.func @transform_22(%arg0: i32) -> (i32, i32) {
    %c0_i32 = arith.constant 0 : i32
    %c0_i32_0 = arith.constant 0 : i32
    %c0_i32_1 = arith.constant 0 : i32
    return %c0_i32, %c0_i32_0 : i32, i32
  }
  func.func @transform_23(%arg0: i32) -> (i32, i32) {
    %c0_i32 = arith.constant 0 : i32
    %c0_i32_0 = arith.constant 0 : i32
    %c0_i32_1 = arith.constant 0 : i32
    return %c0_i32, %c0_i32_0 : i32, i32
  }
  func.func @transform_24(%arg0: i32) -> (i32, i32) {
    %c0_i32 = arith.constant 0 : i32
    %c0_i32_0 = arith.constant 0 : i32
    %c0_i32_1 = arith.constant 0 : i32
    return %c0_i32, %c0_i32_0 : i32, i32
  }
  func.func @transform_25(%arg0: i32) -> (i32, i32) {
    %c0_i32 = arith.constant 0 : i32
    %c0_i32_0 = arith.constant 0 : i32
    %c0_i32_1 = arith.constant 0 : i32
    return %c0_i32, %c0_i32_0 : i32, i32
  }
  func.func @transform_26(%arg0: i32) -> (i32, i32) {
    %c0_i32 = arith.constant 0 : i32
    %c0_i32_0 = arith.constant 0 : i32
    %c0_i32_1 = arith.constant 0 : i32
    return %c0_i32, %c0_i32_0 : i32, i32
  }
  func.func @transform_27(%arg0: i32) -> (i32, i32) {
    %c0_i32 = arith.constant 0 : i32
    %c0_i32_0 = arith.constant 0 : i32
    %c0_i32_1 = arith.constant 0 : i32
    return %c0_i32, %c0_i32_0 : i32, i32
  }
  func.func @transform_28(%arg0: i32) -> (i32, i32, i32) {
    %c0_i32 = arith.constant 0 : i32
    %c0_i32_0 = arith.constant 0 : i32
    %c0_i32_1 = arith.constant 0 : i32
    return %arg0, %c0_i32, %c0_i32_0 : i32, i32, i32
  }
}

</mosaic_0001>

<bundles_post_ra>
// kernel: autoformer_forward.2
= control target key start
LH: loop header
LB: loop body
LE: loop exit
PB: predicated region body
PF: predicated region fallthrough
CT: control target
= control target key end

     0   :  { %s2458_s0 = inlined_call_operand.vmem [shape: f32[2,16,8], index: 0, kind: input, shape index: {}]   ;;  %s2459_s1 = inlined_call_operand.vmem [shape: f32[2,16,4], index: 1, kind: input, shape index: {}]   ;;  %s2460_s2 = inlined_call_operand.vmem [shape: f32[9,16], index: 2, kind: input, shape index: {}]   ;;  %s2461_s3 = inlined_call_operand.vmem [shape: f32[9,16], index: 3, kind: input, shape index: {}]   ;;  %s2462_s4 = inlined_call_operand.vmem [shape: f32[16,9], index: 4, kind: input, shape index: {}]   ;;  %s2463_s5 = inlined_call_operand.vmem [shape: f32[16,9], index: 5, kind: input, shape index: {}]   ;;  %s2464_s6 = inlined_call_operand.vmem [shape: f32[16,16], index: 6, kind: input, shape index: {}]   ;;  %s2465_s7 = inlined_call_operand.vmem [shape: s32[16,16], index: 7, kind: input, shape index: {}]   ;;  %s2466_s8 = inlined_call_operand.hbm [shape: bf16[28,32], index: 8, kind: input, shape index: {}]   ;;  %s2467_s9 = inlined_call_operand.vmem [shape: f32[1,32], index: 9, kind: input, shape index: {}]   ;;  %s2468_s10 = inlined_call_operand.vmem [shape: f32[1,32], index: 10, kind: input, shape index: {}]   ;;  %s2469_s11 = inlined_call_operand.vmem [shape: bf16[32,96], index: 11, kind: input, shape index: {}]   ;;  %s2470_s12 = inlined_call_operand.vmem [shape: f32[1,96], index: 12, kind: input, shape index: {}]   ;;  %s2471_s13 = inlined_call_operand.vmem [shape: bf16[32,32], index: 13, kind: input, shape index: {}]   ;;  %s2472_s14 = inlined_call_operand.vmem [shape: f32[1,32], index: 14, kind: input, shape index: {}]   ;;  %s2473_s15 = inlined_call_operand.vmem [shape: bf16[32,64], index: 15, kind: input, shape index: {}]   ;;  %s2474_s16 = inlined_call_operand.vmem [shape: bf16[64,32], index: 16, kind: input, shape index: {}]   ;;  %s2475_s17 = inlined_call_operand.vmem [shape: f32[2,16,32], index: 17, kind: output, shape index: {}]  }
   0x1   :  { %2478 = sst [smem:[#allocation5_spill]] %s2458_s0 }
   0x2   :  { %2479 = sst [smem:[#allocation6_spill]] %s2459_s1 }
   0x3   :  { %22 = vsyncpa [#allocation3], 0  ;;  %s2202_s24 = smov 0  }
   0x4 LB: > { %s2208_s25 = sadd.s32 4294967295, %s2099_s24   ;;  %p1782_p0 = scmp.ge.s32.totalorder %s2099_s24, 1  ;;  %s2099_s24 = sphi %s2202_s24, %s28_s24  }
   0x5   : > { %p426_p1 = scmp.lt.s32.totalorder %s2099_s24, 3  ;;  %s2101_s26 = smov [#allocation2]  }
   0x6   : > { %s456_s27 = sshll.u32 %s2101_s26, 4  ;;  %p2476_p3 = scmp.eq.s32.totalorder %s2208_s25, 0  ;;  %s457_s27 = int_to_ptr.vmem [resolvable:$true] %s456_s27 }
   0x7   : > { %p2212_p2 = pnand %p1782_p0, %p426_p1  ;;  %s2061_s18 = scalar_lea.hbm %s2466_s8, 256 }
   0x8   : > { %p2062_p6 = scmp.ne.s32.totalorder %s2466_s8, %s2061_s18  ;;  %p2068_p10 = scmp.lt.u32.totalorder %s2061_s18, %s2466_s8 }
   0x9   : > { %s2480_s28 = scalar_select %p2212_p2, 1, 0 }
   0xa   : > { %p1999_p4 = pneg %p2212_p2 }
   0xc   : > { %p2221_p5 = pnand %p2476_p3, %p1999_p4 }
   0xe   : > { %p2063_p7 = pneg %p2221_p5 }
  0x10   : > { %p2064_p8 = pnand %p2063_p7, %p2062_p6 }
  0x12   : > { %p2065_p9 = pneg %p2064_p8 }
  0x14   : > { %p2070_p11 = pnand %p2068_p10, %p2065_p9 }
  0x16   : > { %2073 = shalt.err (!%p2070_p11)
}
  0x17   : > { %s2074_s22 = scalar_lea.vmem %s457_s27, 256  ;;  %p2082_p1 = scmp.lt.s32.totalorder %s457_s27, %s457_s27 }
  0x18   : > { %p2075_p12 = scmp.ne.s32.totalorder %s457_s27, %s2074_s22  ;;  %p2083_p4 = scmp.lt.s32.totalorder %s2074_s22, %s2074_s22 }
  0x1a   : > { %p2077_p13 = pnand %p2075_p12, %p2063_p7  ;;  %p2084_p3 = por %p2083_p4, %p2082_p1 }
  0x1c   : > { %p2078_p0 = pneg %p2077_p13 }
  0x1e   : > { %p2085_p2 = pnand %p2084_p3, %p2078_p0 }
  0x20   : > { %2088 = shalt.err (!%p2085_p2)
}
  0x21   : > { %s2102_s23 = smov 64   ;;  %s2103_s26 = smov 4  }
  0x22   : > { %2002 = dma.hbm_to_vmem [thread:$0]  (!%p2221_p5), %s2466_s8, 256, %s457_s27, [#allocation3], %s2102_s23, %s2102_s23, %s2103_s26  }
  0x23   : > { %p2482_p6 = scmp.ne.s32.totalorder %s2480_s28, 0 }
  0x24   : > { %p2483_p8 = scmp.eq.s32.totalorder (!%p2482_p6), %s2208_s25, 0 }
  0x25   : > { %512 = sbr.rel (%p2482_p6) target bundleno = 4120 (0x1018), region = 88 }
  0x2c   : > { %2094 = dma.done.wait (%p2483_p8), [#allocation3], 256   ;;  %p2484_p7 = pmov %p2483_p8 }
  0x2d   : > { %p569_p2 = scmp.lt.s32.totalorder %s2208_s25, 1  ;;  %v606_v0 = vlaneseq  ;;  %v2104_v1 = vmov 0.0   ;;  %s2485_s18 = sld [smem:[#allocation5_spill]]  ;;  %vm2105_vm0 = vmmov 0   ;;  %vm669_vm3 = vcmask 1045504   ;;  %v2039_v13 = vld [vmem:[#allocation2] sm:$0xff]  }
  0x2e   : > { %2096 = vsyncadd (%p2484_p7), [#allocation3], 4294967040  ;;  %1875 = vmatprep.subr.bf16.mxu0 %v2104_v1  ;;  %1883 = vmatprep.subr.bf16.mxu1 %v2104_v1  ;;  %s2486_s21 = sld [smem:[#allocation6_spill]]  ;;  %v2040_v16 = vld [vmem:[#allocation2 + $0x8] sm:$0x3f]   ;;  %s2107_s23 = smov 24  }
  0x2f   : > { %s2488_s25 = smov (!%p569_p2, %s2208_s25), 1  ;;  %v2251_v2 = vshrl.u32 %v606_v0, 7  ;;  %1879 = vmatprep.mubr.msk.bf16.mxu0 %vm2105_vm0, %v2104_v1  ;;  %1887 = vmatprep.mubr.msk.bf16.mxu1 %vm2105_vm0, %v2104_v1  ;;  %v2041_v19 = vld [vmem:[%s2469_s11] sm:$0xff]   ;;  %v671_v21 = vsel %vm669_vm3, %v2040_v16, 0  ;;  %s2108_s30 = smov 16   ;;  %vm640_vm4 = vcmask 64512  }
  0x30   : > { %s2253_s27 = sshll.u32 %s2488_s25, 4  ;;  %s2106_s25 = smov 8   ;;  %1876 = vmatpush3.bf16.msra.mxu0 %v2039_v13  ;;  %1884 = vmatpush3.bf16.msra.mxu1 %v2041_v19  ;;  %vm643_vm5 = vcmask 130048   ;;  %vm646_vm6 = vcmask 195584   ;;  %vm665_vm7 = vcmask 228352   ;;  %v2042_v38 = vld [vmem:[%s2469_s11 + $0x8] sm:$0xff]  }
  0x31   : > { %vm613_vm1 = vcmp.lt.s32.totalorder %v2251_v2, 7  ;;  %vm608_vm2 = vcmp.lt.s32.totalorder %v2251_v2, 1  ;;  %1877 = vmatprep.subr.bf16.mxu0 %v2104_v1  ;;  %1885 = vmatprep.subr.bf16.mxu1 %v2104_v1  ;;  %vm738_vm8 = vcmask 261120   ;;  %v1796_v44 = vld [vmem:[%s2470_s12] ss:$0 sm:$0xff]  ;;  %vm973_vm9 = vcmask 253952  }
  0x32   : > { %v585_v51 = vld [vmem:[%s2460_s2] sm:$0xff]  ;;  %v586_v52 = vld [vmem:[%s2460_s2 + $0x8] sm:$0x1]  ;;  %vm983_vm10 = vcmask 72704   ;;  %vm990_vm11 = vcmask 1040384   ;;  %vm2110_vm12 = vmmov 1  }
  0x33   : > { %s573_s19 = scalar_lea.vmem %s2485_s18, %s2253_s27  ;;  %v588_v53 = vld [vmem:[%s2461_s3] sm:$0xff]  ;;  %v589_v54 = vld [vmem:[%s2461_s3 + $0x8] sm:$0x1]  ;;  %v587_v56 = vpack.c.bf16 %v586_v52, %v585_v51  ;;  %vm1976_vm13 = vmpackc.low %vm990_vm11, %vm2110_vm12  ;;  %vm1158_vm14 = vcmask 7168   ;;  %s2111_s0 = smov 64  }
  0x34   : > { %s578_s22 = scalar_lea.vmem %s2486_s21, %s2253_s27  ;;  %v600_v3 = vld [vmem:[%s573_s19] sm:$0xff]  ;;  %v601_v4 = vld [vmem:[%s573_s19 + $0x8] sm:$0xff]  ;;  %1878 = vmatpush3.bf16.msra.mxu0 %v671_v21  ;;  %1886 = vmatpush3.bf16.msra.mxu1 %v2042_v38  ;;  %v590_v57 = vpack.c.bf16 %v589_v54, %v588_v53  ;;  %s583_s21 = scalar_lea.vmem %s2475_s17, %s2253_s27 }
  0x35   : > { %v602_v5 = vld [vmem:[%s578_s22] sm:$0xff]  ;;  %v605_v6 = vrot.slane %v601_v4, 7  ;;  %v612_v7 = vrot.slane %v601_v4, 1  ;;  %v2024_v8 = vpack.i.bf16 %v601_v4, %v600_v3  ;;  %v604_v9 = vrot.slane %v600_v3, 7  ;;  %v603_v10 = vld [vmem:[%s578_s22 + $0x8] sm:$0xff]  ;;  %1891 = vmatprep.subr.bf16.mxu0 %v2104_v1  ;;  %1897 = vmatprep.subr.bf16.mxu1 %v2104_v1 }
  0x36   : > { %v611_v11 = vrot.slane %v600_v3, 1  ;;  %v2034_v12 = vpack.i.bf16 %v603_v10, %v602_v5  ;;  %v594_v38 = vld [vmem:[%s2463_s5 + $0x8] sm:$0xff] }
  0x37   : > { %2025 = vrot.lane.b32.xlu0 %v2024_v8, %s2106_s25  ;;  %v609_v14 = vsel %vm608_vm2, %v604_v9, %v605_v6  ;;  %v610_v15 = vsel %vm608_vm2, %v605_v6, %v604_v9 }
  0x38   : > { %v614_v17 = vsel %vm613_vm1, %v611_v11, %v612_v7  ;;  %v615_v18 = vsel %vm613_vm1, %v612_v7, %v611_v11  ;;  %2035 = vrot.lane.b32.xlu1 %v2034_v12, %s2107_s23 }
  0x39   : > { %v2029_v20 = vpack.i.bf16 %v615_v18, %v614_v17 }
  0x3b   : > { %2030 = vrot.lane.b32.xlu0 %v2029_v20, %s2108_s30  ;;  %s2109_s30 = smov 96  }
  0xa9   : > { %v2026_v22 = vpop.permute.xlu0 %2025 }
  0xaa   : > { %v2036_v23 = vpop.permute.xlu1 %2035  ;;  %v2028_v24 = vunpack.i.h.bf16 %v2026_v22  ;;  %v2027_v25 = vunpack.i.l.bf16 %v2026_v22 }
  0xab   : > { %v2038_v27 = vunpack.i.h.bf16 %v2036_v23  ;;  %v2037_v28 = vunpack.i.l.bf16 %v2036_v23 }
  0xac   : > { %v641_v31 = vsel %vm640_vm4, %v610_v15, %v2027_v25  ;;  %v642_v32 = vsel %vm640_vm4, %v609_v14, %v2028_v24 }
  0xad   : > { %v2031_v26 = vpop.permute.xlu0 %2030 }
  0xae   : > { %v2033_v29 = vunpack.i.h.bf16 %v2031_v26  ;;  %v2032_v30 = vunpack.i.l.bf16 %v2031_v26 }
  0xb0   : > { %v644_v33 = vsel %vm643_vm5, %v641_v31, %v2032_v30  ;;  %v645_v34 = vsel %vm643_vm5, %v642_v32, %v2033_v29  ;;  %v591_v29 = vld [vmem:[%s2462_s4] sm:$0xff] }
  0xb1   : > { %v647_v35 = vsel %vm646_vm6, %v644_v33, %v2037_v28  ;;  %v648_v36 = vsel %vm646_vm6, %v645_v34, %v2038_v27  ;;  %v593_v30 = vld [vmem:[%s2463_s5] sm:$0xff] }
  0xb2   : > { %v653_v37 = vpack.c.bf16 %v648_v36, %v647_v35  ;;  %v592_v35 = vld [vmem:[%s2462_s4 + $0x8] sm:$0xff] }
  0xb4   : > { %1880 = vmatmul.mubr.msk.bf16.vlgmr.msra.gmra.mrb[0].mxu0 %vm665_vm7, %v653_v37 }
  0xb5   : > { %1893 = vmatprep.mubr.msk.bf16.mxu0 %vm2105_vm0, %v2104_v1 }
 0x187   : > { %v2288_v39 = vpop.f32.mrb[0].mxu0 }
 0x188   : > { %v1881_v40 = vpop.f32.mrb[1].mxu0 }
 0x189   : > { %v2290_v41 = vpop.f32.mrb[2].mxu0 }
 0x18a   : > { %v718_v42 = vpack.c.bf16 %v2290_v41, %v2288_v39  ;;  %v1882_v43 = vpop.f32.mrb[3].mxu0 }
 0x18c   : > { %1888 = vmatmul.mubr.msk.bf16.vlgmr.msra.gmra.mrb[0].mxu1 %vm738_vm8, %v718_v42 }
 0x18d   : > { %1899 = vmatprep.mubr.msk.bf16.mxu1 %vm2105_vm0, %v2104_v1 }
 0x25f   : > { %v776_v45 = vpop.f32.mrb[0].mxu1 }
 0x260   : > { %v1889_v46 = vpop.f32.mrb[1].mxu1  ;;  %v777_v48 = vadd.f32 %v1796_v44, %v776_v45 }
 0x261   : > { %v779_v47 = vpop.f32.mrb[2].mxu1 }
 0x262   : > { %v780_v49 = vadd.f32 %v1796_v44, %v779_v47  ;;  %v1890_v50 = vpop.f32.mrb[3].mxu1 }
 0x264   : > { %v2312_v55 = vpack.c.bf16 %v780_v49, %v777_v48 }
 0x266   : > { %873 = vrot.lane.b32.xlu1 %v2312_v55, %s2109_s30  ;;  %1892 = vmatpush3.bf16.msra.mxu0 %v2312_v55 }
 0x267   : > { %1898 = vmatpush3.bf16.msra.mxu1 %v2312_v55  ;;  %1903 = vmatprep.subr.bf16.mxu0 %v2104_v1 }
 0x268   : > { %1909 = vmatprep.subr.bf16.mxu1 %v2104_v1 }
 0x269   : > { %1894 = vmatmul.mubr.msk.bf16.vlgmr.msra.gmra.mrb[4].mxu0 %vm643_vm5, %v587_v56 }
 0x26a   : > { %1900 = vmatmul.mubr.msk.bf16.vlgmr.msra.gmra.mrb[4].mxu1 %vm643_vm5, %v590_v57  ;;  %1905 = vmatprep.mubr.msk.bf16.mxu0 %vm2105_vm0, %v2104_v1 }
 0x26b   : > { %1911 = vmatprep.mubr.msk.bf16.mxu1 %vm2105_vm0, %v2104_v1 }
 0x2d8   : > { %v874_v58 = vpop.permute.xlu1 %873 }
 0x2d9   : > { %1904 = vmatpush3.bf16.msra.mxu0 %v874_v58  ;;  %1910 = vmatpush3.bf16.msra.mxu1 %v874_v58 }
 0x2dc   : > { %1906 = vmatmul.mubr.msk.bf16.vlgmr.msra.gmra.mrb[8].mxu0 %vm643_vm5, %v587_v56  ;;  %1912 = vmatmul.mubr.msk.bf16.vlgmr.msra.gmra.mrb[8].mxu1 %vm643_vm5, %v590_v57 }
 0x2dd   : > { %1919 = vmatprep.mubr.msk.f32.mxu0 %vm983_vm10, %v591_v29  ;;  %1926 = vmatprep.mubr.msk.f32.mxu1 %vm983_vm10, %v593_v30 }
 0x33c   : > { %v821_v59 = vpop.f32.mrb[4].mxu0 }
 0x33d   : > { %v865_v60 = vpop.f32.mrb[4].mxu1  ;;  %v1895_v61 = vpop.f32.mrb[5].mxu0 }
 0x33e   : > { %v1901_v62 = vpop.f32.mrb[5].mxu1  ;;  %v824_v63 = vpop.f32.mrb[6].mxu0 }
 0x33f   : > { %v868_v0 = vpop.f32.mrb[6].mxu1  ;;  %v1896_v3 = vpop.f32.mrb[7].mxu0 }
 0x340   : > { %v1902_v4 = vpop.f32.mrb[7].mxu1 }
 0x3af   : > { %v910_v5 = vpop.f32.mrb[8].mxu0  ;;  %v951_v6 = vpop.f32.mrb[8].mxu1 }
 0x3b0   : > { %v958_v7 = vmul.f32 %v910_v5, %v821_v59  ;;  %v966_v8 = vmul.f32 %v910_v5, %v865_v60  ;;  %v960_v9 = vmul.f32 %v951_v6, %v865_v60  ;;  %v964_v10 = vmul.f32 %v951_v6, %v821_v59  ;;  %v1907_v11 = vpop.f32.mrb[9].mxu0  ;;  %v1913_v12 = vpop.f32.mrb[9].mxu1 }
 0x3b1   : > { %v913_v13 = vpop.f32.mrb[10].mxu0  ;;  %v954_v14 = vpop.f32.mrb[10].mxu1  ;;  %v1157_v60 = vadd.s32 8, %v2251_v2 }
 0x3b2   : > { %v959_v15 = vmul.f32 %v913_v13, %v824_v63  ;;  %v967_v16 = vmul.f32 %v913_v13, %v868_v0  ;;  %v961_v17 = vmul.f32 %v954_v14, %v868_v0  ;;  %v965_v18 = vmul.f32 %v954_v14, %v824_v63  ;;  %v1908_v19 = vpop.f32.mrb[11].mxu0  ;;  %v1914_v20 = vpop.f32.mrb[11].mxu1 }
 0x3b3   : > { %v962_v21 = vadd.f32 %v960_v9, %v958_v7  ;;  %v968_v22 = vsub.f32 %v964_v10, %v966_v8 }
 0x3b4   : > { %v963_v23 = vadd.f32 %v961_v17, %v959_v15  ;;  %v969_v24 = vsub.f32 %v965_v18, %v967_v16 }
 0x3b5   : > { %v970_v25 = vsel %vm738_vm8, %v962_v21, 0.0  ;;  %v977_v27 = vsel %vm738_vm8, %v968_v22, 0.0 }
 0x3b6   : > { %971 = vadd.xlane.f32.xlu0 %v970_v25  ;;  %v974_v26 = vsel %vm973_vm9, %v963_v23, 0.0  ;;  %v980_v28 = vsel %vm973_vm9, %v969_v24, 0.0 }
 0x3b7   : > { %975 = vadd.xlane.f32.xlu1 %v974_v26 }
 0x3ba   : > { %978 = vadd.xlane.f32.xlu0 %v977_v27 }
 0x3be   : > { %981 = vadd.xlane.f32.xlu0 %v980_v28 }
 0x443   : > { %v972_v31 = vpop.xlane.xlu0 %971 }
 0x444   : > { %v976_v32 = vpop.xlane.xlu1 %975 }
 0x445   : > { %v1975_v33 = vpack.c.bf16 %v976_v32, %v972_v31 }
 0x447   : > { %v979_v34 = vpop.xlane.xlu0 %978  ;;  %1977 = vmatprep.subr.msk.bf16.mxu0 %vm1976_vm13, %v1975_v33 }
 0x448   : > { %1980 = vmatpush3.bf16.msk.msra.mxu0 %vm1976_vm13, %v1975_v33 }
 0x449   : > { %1929 = vmatprep.subr.bf16.mxu0 %v2104_v1 }
 0x44b   : > { %v982_v36 = vpop.xlane.xlu0 %981  ;;  %1920 = vmatmul.mubr.msk.f32.vlgmr.msra.gmra.mrb[12].mxu0 %vm983_vm10, %v592_v35 }
 0x44c   : > { %v1981_v37 = vpack.c.bf16 %v982_v36, %v979_v34  ;;  %1931 = vmatprep.mubr.msk.bf16.mxu0 %vm2105_vm0, %v2104_v1 }
 0x44e   : > { %1983 = vmatprep.subr.msk.bf16.mxu1 %vm1976_vm13, %v1981_v37 }
 0x44f   : > { %1986 = vmatpush3.bf16.msk.msra.mxu1 %vm1976_vm13, %v1981_v37 }
 0x450   : > { %1935 = vmatprep.subr.bf16.mxu1 %v2104_v1 }
 0x452   : > { %1927 = vmatmul.mubr.msk.f32.vlgmr.msra.gmra.mrb[12].mxu1 %vm983_vm10, %v594_v38 }
 0x453   : > { %1939 = vmatprep.mubr.msk.bf16.mxu1 %vm2105_vm0, %v2104_v1 }
 0x51e   : > { %v1921_v40 = vpop.f32.mrb[12].mxu0 }
 0x51f   : > { %v1060_v42 = vpop.f32.mrb[13].mxu0 }
 0x525   : > { %v1928_v43 = vpop.f32.mrb[12].mxu1 }
 0x526   : > { %v1154_v44 = vsub.f32 %v1921_v40, %v1928_v43  ;;  %v1144_v45 = vpop.f32.mrb[13].mxu1 }
 0x527   : > { %v1153_v46 = vsub.f32 %v1060_v42, %v1144_v45 }
 0x528   : > { %v1156_v47 = vmul.f32 0.03125, %v1154_v44 }
 0x529   : > { %v1155_v48 = vmul.f32 0.03125, %v1153_v46 }
 0x52a   : > { %v1160_v49 = vsel %vm1158_vm14, %v1156_v47, -inf }
 0x52b   : > { %v1159_v50 = vsel %vm1158_vm14, %v1155_v48, -inf }
 0x52c   : > { %v1161_v51 = vmax.f32 %v1159_v50, %v1160_v49 }
 0x52e   : > { %1162 = vmax.xlane.f32.xlu1 %v1161_v51 }
 0x5bb   : > { %v1163_v52 = vpop.xlane.xlu1 %1162 }
 0x5bc   : > { %v1164_v53 = vrot.slane %v1163_v52, 4 }
 0x5be   : > { %v1165_v54 = vmax.f32 %v1163_v52, %v1164_v53  ;;  %v598_v52 = vld [vmem:[%s2465_s7] sm:$0xff]  ;;  %v599_v53 = vld [vmem:[%s2465_s7 + $0x8] sm:$0xff] }
 0x5c0   : > { %v1166_v56 = vrot.slane %v1165_v54, 2 }
 0x5c2   : > { %v1167_v57 = vmax.f32 %v1165_v54, %v1166_v56 }
 0x5c4   : > { %v1168_v58 = vrot.slane %v1167_v57, 1 }
 0x5c6   : > { %v1169_v59 = vmax.f32 %v1167_v57, %v1168_v58 }
 0x5c8   : > { %1987 = vpush %v1169_v59 }
 0x5f9   : > { %s1988_s25 = spop %1987 }
 0x5fa   : > { %v2354_v61 = vstv %s1988_s25 }
 0x5fb   : > { %vm1172_vm15 = vcmp.ge.f32.partialorder %v1155_v48, %v2354_v61  ;;  %vm1173_vm1 = vcmp.ge.f32.partialorder %v1156_v47, %v2354_v61 }
 0x5fc   : > { %v1174_v62 = vsel %vm1172_vm15, %v2251_v2, 16  ;;  %v1175_v63 = vsel %vm1173_vm1, %v1157_v60, 16 }
 0x5fd   : > { %v1176_v0 = vsel %vm1158_vm14, %v1174_v62, 2147483647  ;;  %v1177_v3 = vsel %vm1158_vm14, %v1175_v63, 2147483647 }
 0x5fe   : > { %vm1178_vm2 = vcmp.lt.s32.totalorder %v1176_v0, %v1177_v3 }
 0x5ff   : > { %v1179_v4 = vsel %vm1178_vm2, %v1176_v0, %v1177_v3  ;;  %v2043_v3 = vld [vmem:[%s2471_s13] sm:$0xff]  }
 0x600   : > { %v1181_v5 = vshra.s32 %v1179_v4, 16  ;;  %v1180_v7 = vand.u32 65535, %v1179_v4  ;;  %1936 = vmatpush3.bf16.msra.mxu1 %v2043_v3 }
 0x601   : > { %1937 = vmatprep.subr.bf16.mxu1 %v2104_v1 }
 0x602   : > { %v1183_v6 = vcvt.s32.f32 %v1181_v5  ;;  %v1182_v9 = vcvt.s32.f32 %v1180_v7 }
 0x604   : > { %1184 = vmin.xlane.f32.xlu0 %v1183_v6 }
 0x691   : > { %v1185_v8 = vpop.xlane.xlu0 %1184 }
 0x692   : > { %vm1186_vm3 = vcmp.eq.f32.partialorder %v1183_v6, %v1185_v8  ;;  %v1191_v11 = vcvt.f32.s32 %v1185_v8 }
 0x693   : > { %v1187_v10 = vsel %vm1186_vm3, %v1182_v9, inf }
 0x694   : > { %1188 = vmin.xlane.f32.xlu1 %v1187_v10  ;;  %v1192_v13 = vshll.u32 %v1191_v11, 16 }
 0x721   : > { %v1189_v12 = vpop.xlane.xlu1 %1188 }
 0x722   : > { %v1190_v14 = vcvt.f32.s32 %v1189_v12 }
 0x724   : > { %v1193_v15 = vadd.s32 %v1192_v13, %v1190_v14 }
 0x726   : > { %v1194_v16 = vrot.slane %v1193_v15, 4 }
 0x728   : > { %vm1195_vm4 = vcmp.lt.s32.totalorder %v1193_v15, %v1194_v16 }
 0x729   : > { %v1196_v17 = vsel %vm1195_vm4, %v1193_v15, %v1194_v16 }
 0x72a   : > { %v1197_v18 = vrot.slane %v1196_v17, 2 }
 0x72c   : > { %vm1198_vm6 = vcmp.lt.s32.totalorder %v1196_v17, %v1197_v18 }
 0x72d   : > { %v1199_v19 = vsel %vm1198_vm6, %v1196_v17, %v1197_v18 }
 0x72e   : > { %v1200_v20 = vrot.slane %v1199_v19, 1 }
 0x730   : > { %vm1201_vm7 = vcmp.lt.s32.totalorder %v1199_v19, %v1200_v20 }
 0x731   : > { %v1202_v21 = vsel %vm1201_vm7, %v1199_v19, %v1200_v20 }
 0x732   : > { %1989 = vpush %v1202_v21 }
 0x763   : > { %s1990_s23 = spop %1989 }
 0x764   : > { %v1204_v22 = vstv %s1990_s23 }
 0x765   : > { %vm1205_vm9 = vcmp.eq.s32.totalorder %v2251_v2, %v1204_v22  ;;  %vm1206_vm10 = vcmp.eq.s32.totalorder %v1157_v60, %v1204_v22  ;;  %vm1266_vm15 = vcmp.eq.s32.totalorder %v599_v53, %v1204_v22 }
 0x766   : > { %v1207_v23 = vsel %vm1205_vm9, -1e+30, %v1155_v48  ;;  %v1208_v24 = vsel %vm1206_vm10, -1e+30, %v1156_v47  ;;  %v1811_v58 = vsel %vm1266_vm15, 1.0, %v2104_v1  ;;  %vm1550_vm9 = vcmask 523264  }
 0x767   : > { %v1209_v25 = vsel %vm1158_vm14, %v1207_v23, -inf  ;;  %v1210_v26 = vsel %vm1158_vm14, %v1208_v24, -inf }
 0x768   : > { %v1211_v27 = vmax.f32 %v1209_v25, %v1210_v26 }
 0x76a   : > { %1212 = vmax.xlane.f32.xlu0 %v1211_v27 }
 0x7f7   : > { %v1213_v28 = vpop.xlane.xlu0 %1212 }
 0x7f8   : > { %v1214_v29 = vrot.slane %v1213_v28, 4 }
 0x7fa   : > { %v1215_v30 = vmax.f32 %v1213_v28, %v1214_v29 }
 0x7fc   : > { %v1216_v31 = vrot.slane %v1215_v30, 2 }
 0x7fe   : > { %v1217_v32 = vmax.f32 %v1215_v30, %v1216_v31 }
 0x800   : > { %v1218_v33 = vrot.slane %v1217_v32, 1 }
 0x802   : > { %v1219_v34 = vmax.f32 %v1217_v32, %v1218_v33  ;;  %v1818_v33 = vld [vmem:[%s2472_s14] ss:$0 sm:$0xff] }
 0x804   : > { %1991 = vpush %v1219_v34 }
 0x835   : > { %s1992_s26 = spop %1991 }
 0x836   : > { %v1221_v35 = vstv %s1992_s26 }
 0x837   : > { %vm1222_vm11 = vcmp.ge.f32.partialorder %v1207_v23, %v1221_v35  ;;  %vm1223_vm12 = vcmp.ge.f32.partialorder %v1208_v24, %v1221_v35  ;;  %v1254_v36 = vmax.f32 %v2354_v61, %v1221_v35  ;;  %v2044_v24 = vld [vmem:[%s2471_s13 + $0x8] sm:$0xff]  }
 0x838   : > { %v1224_v37 = vsel %vm1222_vm11, %v2251_v2, 16  ;;  %v1225_v38 = vsel %vm1223_vm12, %v1157_v60, 16  ;;  %1938 = vmatpush3.bf16.msra.mxu1 %v2044_v24 }
 0x839   : > { %v1255_v40 = vsub.f32 %v2354_v61, %v1254_v36  ;;  %v1258_v42 = vsub.f32 %v1221_v35, %v1254_v36  ;;  %v1226_v43 = vsel %vm1158_vm14, %v1224_v37, 2147483647  ;;  %v1227_v44 = vsel %vm1158_vm14, %v1225_v38, 2147483647  ;;  %1949 = vmatprep.subr.bf16.mxu1 %v2104_v1 }
 0x83a   : > { %vm1228_vm13 = vcmp.lt.s32.totalorder %v1226_v43, %v1227_v44  ;;  %vm1265_vm14 = vcmp.eq.s32.totalorder %v598_v52, %v1204_v22 }
 0x83b   : > { %v1256_v45 = vmul.f32 1.442695, %v1255_v40  ;;  %v1259_v46 = vmul.f32 1.442695, %v1258_v42  ;;  %v1229_v47 = vsel %vm1228_vm13, %v1226_v43, %v1227_v44  ;;  %v1810_v57 = vsel %vm1265_vm14, 1.0, %v2104_v1  ;;  %v595_v40 = vld [vmem:[%s2464_s6] sm:$0xff] }
 0x83c   : > { %v1231_v48 = vshra.s32 %v1229_v47, 16  ;;  %v1230_v61 = vand.u32 65535, %v1229_v47  ;;  %v596_v42 = vld [vmem:[%s2464_s6 + $0x8] sm:$0xff] }
 0x83d   : > { %2051 = vpow2.f32 %v1256_v45  ;;  %v597_v43 = vpack.c.bf16 %v596_v42, %v595_v40  ;;  %v2046_v44 = vld [vmem:[%s2473_s15 + $0x8] sm:$0xff]   ;;  %v2047_v45 = vld [vmem:[%s2474_s16] sm:$0xff]  }
 0x83e   : > { %2053 = vpow2.f32 %v1259_v46  ;;  %v1233_v49 = vcvt.s32.f32 %v1231_v48  ;;  %v1232_v62 = vcvt.s32.f32 %v1230_v61  ;;  %v2048_v46 = vld [vmem:[%s2474_s16 + $0x8] sm:$0xff]  }
 0x840   : > { %1234 = vmin.xlane.f32.xlu1 %v1233_v49 }
 0x847   : > { %v2052_v50 = vpop.eup %2051 }
 0x848   : > { %v2054_v51 = vpop.eup %2053 }
 0x849   : > { %v1261_v2 = vadd.f32 %v2054_v51, %v2052_v50 }
 0x84b   : > { %2055 = vrcp.f32 %v1261_v2 }
 0x851   : > { %1288 = vrot.lane.b32.xlu1 %v2312_v55, %s2111_s0 }
 0x855   : > { %v2056_v54 = vpop.eup %2055 }
 0x856   : > { %v1264_v56 = vmul.f32 %v2056_v54, %v2052_v50  ;;  %v1275_v16 = vmul.f32 %v2056_v54, %v2054_v51  ;;  %v2050_v54 = vld [vmem:[%s2474_s16 + $0x18] sm:$0xff]  }
 0x858   : > { %v1271_v59 = vmul.f32 %v1810_v57, %v1264_v56  ;;  %v1272_v60 = vmul.f32 %v1811_v58, %v1264_v56 }
 0x8cd   : > { %v1235_v55 = vpop.xlane.xlu1 %1234 }
 0x8ce   : > { %vm1236_vm1 = vcmp.eq.f32.partialorder %v1233_v49, %v1235_v55  ;;  %v1241_v4 = vcvt.f32.s32 %v1235_v55 }
 0x8cf   : > { %v1237_v63 = vsel %vm1236_vm1, %v1232_v62, inf }
 0x8d0   : > { %1238 = vmin.xlane.f32.xlu0 %v1237_v63  ;;  %v1242_v6 = vshll.u32 %v1241_v4, 16 }
 0x8d1   : > { %v1289_v0 = vpop.permute.xlu1 %1288 }
 0x8d2   : > { %1930 = vmatpush3.bf16.msra.mxu0 %v1289_v0 }
 0x8d3   : > { %1943 = vmatprep.subr.bf16.mxu0 %v2104_v1 }
 0x95d   : > { %v1239_v5 = vpop.xlane.xlu0 %1238 }
 0x95e   : > { %v1240_v7 = vcvt.f32.s32 %v1239_v5 }
 0x960   : > { %v1243_v8 = vadd.s32 %v1242_v6, %v1240_v7 }
 0x962   : > { %v1244_v9 = vrot.slane %v1243_v8, 4 }
 0x964   : > { %vm1245_vm2 = vcmp.lt.s32.totalorder %v1243_v8, %v1244_v9 }
 0x965   : > { %v1246_v10 = vsel %vm1245_vm2, %v1243_v8, %v1244_v9 }
 0x966   : > { %v1247_v11 = vrot.slane %v1246_v10, 2 }
 0x968   : > { %vm1248_vm3 = vcmp.lt.s32.totalorder %v1246_v10, %v1247_v11 }
 0x969   : > { %v1249_v12 = vsel %vm1248_vm3, %v1246_v10, %v1247_v11 }
 0x96a   : > { %v1250_v13 = vrot.slane %v1249_v12, 1 }
 0x96c   : > { %vm1251_vm4 = vcmp.lt.s32.totalorder %v1249_v12, %v1250_v13 }
 0x96d   : > { %v1252_v14 = vsel %vm1251_vm4, %v1249_v12, %v1250_v13 }
 0x96e   : > { %1993 = vpush %v1252_v14 }
 0x99f   : > { %s1994_s20 = spop %1993 }
 0x9a0   : > { %v1276_v15 = vstv %s1994_s20 }
 0x9a1   : > { %vm1277_vm6 = vcmp.eq.s32.totalorder %v598_v52, %v1276_v15  ;;  %vm1278_vm7 = vcmp.eq.s32.totalorder %v599_v53, %v1276_v15  ;;  %v2049_v53 = vld [vmem:[%s2474_s16 + $0x10] sm:$0xff]  }
 0x9a2   : > { %v1812_v17 = vsel %vm1277_vm6, 1.0, %v2104_v1  ;;  %v1813_v18 = vsel %vm1278_vm7, 1.0, %v2104_v1 }
 0x9a3   : > { %v1283_v19 = vmul.f32 %v1812_v17, %v1275_v16  ;;  %v1284_v20 = vmul.f32 %v1813_v18, %v1275_v16 }
 0x9a5   : > { %v1285_v21 = vadd.f32 %v1283_v19, %v1271_v59  ;;  %v1286_v22 = vadd.f32 %v1284_v20, %v1272_v60 }
 0x9a7   : > { %v1287_v23 = vpack.c.bf16 %v1286_v22, %v1285_v21 }
 0x9a9   : > { %1932 = vmatmul.mubr.msk.bf16.vlgmr.msra.gmra.mrb[16].mxu0 %vm643_vm5, %v1287_v23 }
 0x9aa   : > { %1945 = vmatprep.mubr.msk.bf16.mxu0 %vm2105_vm0, %v2104_v1 }
 0xa7c   : > { %v1328_v25 = vpop.f32.mrb[16].mxu0 }
 0xa7d   : > { %v1933_v26 = vpop.f32.mrb[17].mxu0 }
 0xa7e   : > { %v1331_v27 = vpop.f32.mrb[18].mxu0 }
 0xa7f   : > { %v1339_v28 = vpack.c.bf16 %v1331_v27, %v1328_v25  ;;  %v1934_v29 = vpop.f32.mrb[19].mxu0 }
 0xa81   : > { %1940 = vmatmul.mubr.msk.bf16.vlgmr.msra.gmra.mrb[16].mxu1 %vm738_vm8, %v1339_v28 }
 0xa82   : > { %1953 = vmatprep.mubr.msk.bf16.mxu1 %vm2105_vm0, %v2104_v1 }
 0xb54   : > { %v1389_v30 = vpop.f32.mrb[16].mxu1 }
 0xb55   : > { %v1396_v31 = vadd.f32 %v1389_v30, %v2288_v39  ;;  %v1941_v32 = vpop.f32.mrb[17].mxu1 }
 0xb56   : > { %v1392_v34 = vpop.f32.mrb[18].mxu1 }
 0xb57   : > { %v1397_v35 = vadd.f32 %v1392_v34, %v2290_v41  ;;  %v1942_v36 = vpop.f32.mrb[19].mxu1  ;;  %v1405_v37 = vadd.f32 %v1818_v33, %v1396_v31  ;;  %v2045_v41 = vld [vmem:[%s2473_s15] sm:$0xff]  }
 0xb58   : > { %1950 = vmatpush3.bf16.msra.mxu1 %v2045_v41  ;;  %v1829_v31 = vld [vmem:[%s2467_s9] ss:$0 sm:$0xff] }
 0xb59   : > { %v1406_v38 = vadd.f32 %v1818_v33, %v1397_v35  ;;  %1951 = vmatprep.subr.bf16.mxu1 %v2104_v1  ;;  %v1830_v35 = vld [vmem:[%s2468_s10] ss:$0 sm:$0xff] }
 0xb5b   : > { %v1407_v39 = vpack.c.bf16 %v1406_v38, %v1405_v37 }
 0xb5c   : > { %1952 = vmatpush3.bf16.msra.mxu1 %v2046_v44 }
 0xb5d   : > { %1944 = vmatpush3.bf16.msra.mxu0 %v1407_v39  ;;  %1969 = vmatprep.subr.bf16.mxu1 %v2104_v1 }
 0xb5e   : > { %1957 = vmatprep.subr.bf16.mxu0 %v2104_v1 }
 0xb60   : > { %1946 = vmatmul.mubr.msk.bf16.vlgmr.msra.gmra.mrb[20].mxu0 %vm643_vm5, %v597_v43 }
 0xb61   : > { %1965 = vmatprep.mubr.msk.bf16.mxu0 %vm2105_vm0, %v2104_v1  ;;  %1958 = vmatpush3.bf16.msra.mxu0 %v2047_v45 }
 0xb62   : > { %1959 = vmatprep.subr.bf16.mxu0 %v2104_v1 }
 0xb65   : > { %1960 = vmatpush3.bf16.msra.mxu0 %v2048_v46 }
 0xb66   : > { %1961 = vmatprep.subr.bf16.mxu0 %v2104_v1 }
 0xb69   : > { %1962 = vmatpush3.bf16.msra.mxu0 %v2049_v53 }
 0xb6a   : > { %1963 = vmatprep.subr.bf16.mxu0 %v2104_v1 }
 0xb6d   : > { %1964 = vmatpush3.bf16.msra.mxu0 %v2050_v54 }
 0xc33   : > { %v1445_v47 = vpop.f32.mrb[20].mxu0 }
 0xc34   : > { %v1947_v48 = vpop.f32.mrb[21].mxu0  ;;  %v1452_v50 = vsub.f32 %v1405_v37, %v1445_v47 }
 0xc35   : > { %v1448_v49 = vpop.f32.mrb[22].mxu0 }
 0xc36   : > { %v1453_v51 = vsub.f32 %v1406_v38, %v1448_v49  ;;  %v1948_v2 = vpop.f32.mrb[23].mxu0 }
 0xc38   : > { %v1458_v52 = vpack.c.bf16 %v1453_v51, %v1452_v50 }
 0xc3a   : > { %1954 = vmatmul.mubr.msk.bf16.vlgmr.msra.gmra.mrb[20].mxu1 %vm738_vm8, %v1458_v52 }
 0xc3b   : > { %1971 = vmatprep.mubr.msk.bf16.mxu1 %vm2105_vm0, %v2104_v1 }
 0xd0d   : > { %v1508_v56 = vpop.f32.mrb[20].mxu1 }
 0xd0e   : > { %v1955_v57 = vpop.f32.mrb[21].mxu1  ;;  %v1515_v59 = vmax.f32 %v1508_v56, 0.0 }
 0xd0f   : > { %v1511_v58 = vpop.f32.mrb[22].mxu1 }
 0xd10   : > { %v1516_v60 = vmax.f32 %v1511_v58, 0.0  ;;  %v1956_v61 = vpop.f32.mrb[23].mxu1 }
 0xd12   : > { %v1525_v55 = vpack.c.bf16 %v1516_v60, %v1515_v59 }
 0xd14   : > { %1966 = vmatmul.mubr.msk.bf16.vlgmr.msra.gmra.mrb[24].mxu0 %vm1550_vm9, %v1525_v55 }
 0xde7   : > { %v1588_v62 = vpop.f32.mrb[24].mxu0 }
 0xde8   : > { %v1967_v63 = vpop.f32.mrb[25].mxu0  ;;  %v1595_v3 = vadd.f32 %v1588_v62, %v1452_v50 }
 0xde9   : > { %v1591_v0 = vpop.f32.mrb[26].mxu0 }
 0xdea   : > { %v1596_v4 = vadd.f32 %v1591_v0, %v1453_v51  ;;  %v1968_v1 = vpop.f32.mrb[27].mxu0 }
 0xdec   : > { %v1597_v5 = vpack.c.bf16 %v1596_v4, %v1595_v3 }
 0xdee   : > { %1970 = vmatpush3.bf16.msra.mxu1 %v1597_v5 }
 0xdf1   : > { %1972 = vmatmul.mubr.msk.bf16.vlgmr.msra.gmra.mrb[24].mxu1 %vm643_vm5, %v597_v43 }
 0xec4   : > { %v1632_v6 = vpop.f32.mrb[24].mxu1 }
 0xec5   : > { %v1639_v7 = vsub.f32 %v1595_v3, %v1632_v6  ;;  %v1973_v8 = vpop.f32.mrb[25].mxu1 }
 0xec6   : > { %v1635_v9 = vpop.f32.mrb[26].mxu1 }
 0xec7   : > { %v1640_v10 = vsub.f32 %v1596_v4, %v1635_v9  ;;  %v1643_v11 = vsel %vm738_vm8, %v1639_v7, 0.0  ;;  %v1974_v12 = vpop.f32.mrb[27].mxu1 }
 0xec8   : > { %1644 = vadd.xlane.f32.xlu0 %v1643_v11 }
 0xec9   : > { %v1646_v13 = vsel %vm738_vm8, %v1640_v10, 0.0 }
 0xecc   : > { %1647 = vadd.xlane.f32.xlu0 %v1646_v13 }
 0xf55   : > { %v1645_v14 = vpop.xlane.xlu0 %1644 }
 0xf56   : > { %v1650_v15 = vmul.f32 0.03125, %v1645_v14 }
 0xf58   : > { %v1652_v16 = vsub.f32 %v1639_v7, %v1650_v15 }
 0xf59   : > { %v1648_v17 = vpop.xlane.xlu0 %1647 }
 0xf5a   : > { %v1651_v18 = vmul.f32 0.03125, %v1648_v17  ;;  %v1654_v19 = vmul.f32 %v1652_v16, %v1652_v16 }
 0xf5c   : > { %v1653_v20 = vsub.f32 %v1640_v10, %v1651_v18  ;;  %v1656_v21 = vsel %vm738_vm8, %v1654_v19, 0.0 }
 0xf5d   : > { %1657 = vadd.xlane.f32.xlu0 %v1656_v21 }
 0xf5e   : > { %v1655_v22 = vmul.f32 %v1653_v20, %v1653_v20 }
 0xf60   : > { %v1659_v23 = vsel %vm738_vm8, %v1655_v22, 0.0 }
 0xf61   : > { %1660 = vadd.xlane.f32.xlu0 %v1659_v23 }
 0xfea   : > { %v1658_v24 = vpop.xlane.xlu0 %1657 }
 0xfeb   : > { %v1662_v25 = vmul.f32 0.03125, %v1658_v24 }
 0xfed   : > { %v1664_v26 = vadd.f32 1e-05, %v1662_v25 }
 0xfee   : > { %v1661_v27 = vpop.xlane.xlu0 %1660 }
 0xfef   : > { %2057 = vrsqrt.f32 %v1664_v26  ;;  %v1663_v28 = vmul.f32 0.03125, %v1661_v27 }
 0xff1   : > { %v1665_v29 = vadd.f32 1e-05, %v1663_v28 }
 0xff3   : > { %2059 = vrsqrt.f32 %v1665_v29 }
 0xff9   : > { %v2058_v30 = vpop.eup %2057 }
 0xffa   : > { %v1668_v32 = vmul.f32 %v2058_v30, %v1652_v16 }
 0xffc   : > { %v1676_v33 = vmul.f32 %v1829_v31, %v1668_v32 }
 0xffd   : > { %v2060_v34 = vpop.eup %2059 }
 0xffe   : > { %v1669_v36 = vmul.f32 %v2060_v34, %v1653_v20  ;;  %v1684_v37 = vadd.f32 %v1830_v35, %v1676_v33 }
0x1000   : > { %v1677_v38 = vmul.f32 %v1829_v31, %v1669_v36  ;;  %v1686_v42 = vsel %vm738_vm8, %v1684_v37, 0.0 }
0x1002   : > { %v1685_v40 = vadd.f32 %v1830_v35, %v1677_v38 }
0x1004   : > { %v1687_v39 = vsel %vm738_vm8, %v1685_v40, 0.0 }
0x1005   : > { %v1688_v43 = vadd.f32 %v1687_v39, %v1686_v42 }
0x1007   : > { %v1689_v41 = vrot.slane %v1688_v43, 4 }
0x1009   : > { %v1690_v44 = vadd.f32 %v1689_v41, %v1688_v43 }
0x100b   : > { %v1691_v45 = vrot.slane %v1690_v44, 2 }
0x100d   : > { %v1692_v46 = vadd.f32 %v1691_v45, %v1690_v44 }
0x100f   : > { %v1693_v47 = vrot.slane %v1692_v46, 1 }
0x1011   : > { %v1694_v48 = vadd.f32 %v1693_v47, %v1692_v46 }
0x1013   : > { %v1696_v49 = vmul.f32 0.0625, %v1694_v48 }
0x1015   : > { %v1697_v50 = vsub.f32 %v1684_v37, %v1696_v49  ;;  %v1698_v51 = vsub.f32 %v1685_v40, %v1696_v49 }
0x1017   : > { %1699 = vst.msk [vmem:[%s583_s21] sm:$0xff] %vm738_vm8, %v1697_v50  ;;  %1700 = vst.msk [vmem:[%s583_s21 + $0x8] sm:$0xff] %vm738_vm8, %v1698_v51 }
0x1018 PF: > { %s28_s24 = sadd.s32 1, %s2099_s24  }
0x1019   : > { %p25_p3 = scmp.ge.s32.totalorder %s28_s24, 4  }
0x101b   :  { %27 = sbr.rel (!%p25_p3) target bundleno = 4 (0x4), region = 126 }
0x1022   :  { %1722 = vsyncpa [#allocation3], 1 }
0x1023   :  { %1724 = vsyncpa [#allocation3 + $0x1], 1 }

// kernel: autoformer_forward.3
= control target key start
LH: loop header
LB: loop body
LE: loop exit
PB: predicated region body
PF: predicated region fallthrough
CT: control target
= control target key end

     0   :  { %s4463_s0 = inlined_call_operand.vmem [shape: f32[2,16,8], index: 0, kind: input, shape index: {}]   ;;  %s4464_s1 = inlined_call_operand.vmem [shape: f32[2,16,4], index: 1, kind: input, shape index: {}]   ;;  %s4465_s2 = inlined_call_operand.vmem [shape: f32[2,16,32], index: 2, kind: input, shape index: {}]   ;;  %s4466_s3 = inlined_call_operand.vmem [shape: f32[9,16], index: 3, kind: input, shape index: {}]   ;;  %s4467_s4 = inlined_call_operand.vmem [shape: f32[9,16], index: 4, kind: input, shape index: {}]   ;;  %s4468_s5 = inlined_call_operand.vmem [shape: f32[16,9], index: 5, kind: input, shape index: {}]   ;;  %s4469_s6 = inlined_call_operand.vmem [shape: f32[16,9], index: 6, kind: input, shape index: {}]   ;;  %s4470_s7 = inlined_call_operand.vmem [shape: f32[16,16], index: 7, kind: input, shape index: {}, may-alias: {7,9}]   ;;  %s4471_s8 = inlined_call_operand.vmem [shape: s32[16,16], index: 8, kind: input, shape index: {}]   ;;  %s4472_s9 = inlined_call_operand.vmem [shape: f32[16,16], index: 9, kind: input, shape index: {}, may-alias: {7,9}]   ;;  %s4473_s10 = inlined_call_operand.vmem [shape: bf16[28,32], index: 10, kind: input, shape index: {}]   ;;  %s4474_s11 = inlined_call_operand.vmem [shape: f32[1,32], index: 11, kind: input, shape index: {}]   ;;  %s4475_s12 = inlined_call_operand.vmem [shape: f32[1,32], index: 12, kind: input, shape index: {}]   ;;  %s4476_s13 = inlined_call_operand.vmem [shape: bf16[32,8], index: 13, kind: input, shape index: {}]   ;;  %s4477_s14 = inlined_call_operand.vmem [shape: f32[1,8], index: 14, kind: input, shape index: {}]   ;;  %s4478_s15 = inlined_call_operand.vmem [shape: bf16[32,96], index: 15, kind: input, shape index: {}]   ;;  %s4479_s16 = inlined_call_operand.vmem [shape: f32[1,96], index: 16, kind: input, shape index: {}]   ;;  %s4480_s17 = inlined_call_operand.vmem [shape: bf16[32,32], index: 17, kind: input, shape index: {}]   ;;  %s4481_s18 = inlined_call_operand.vmem [shape: f32[1,32], index: 18, kind: input, shape index: {}]   ;;  %s4482_s19 = inlined_call_operand.vmem [shape: bf16[32,32], index: 19, kind: input, shape index: {}]   ;;  %s4483_s20 = inlined_call_operand.vmem [shape: f32[1,32], index: 20, kind: input, shape index: {}]   ;;  %s4484_s21 = inlined_call_operand.vmem [shape: bf16[32,64], index: 21, kind: input, shape index: {}]   ;;  %s4485_s22 = inlined_call_operand.vmem [shape: f32[1,64], index: 22, kind: input, shape index: {}]   ;;  %s4486_s23 = inlined_call_operand.vmem [shape: bf16[32,32], index: 23, kind: input, shape index: {}]   ;;  %s4487_s24 = inlined_call_operand.vmem [shape: f32[1,32], index: 24, kind: input, shape index: {}]   ;;  %s4488_s25 = inlined_call_operand.vmem [shape: bf16[32,64], index: 25, kind: input, shape index: {}]   ;;  %s4489_s26 = inlined_call_operand.vmem [shape: bf16[64,32], index: 26, kind: input, shape index: {}]   ;;  %s4490_s27 = inlined_call_operand.vmem [shape: bf16[96,8], index: 27, kind: input, shape index: {}]   ;;  %s4491_s28 = inlined_call_operand.hbm [shape: f32[2,8,8], index: 28, kind: output, shape index: {}]  }
   0x1   :  { %4515 = sst [smem:[#allocation11_spill]] %s4463_s0 }
   0x2   :  { %4516 = sst [smem:[#allocation12_spill]] %s4464_s1 }
   0x3   :  { %4517 = sst [smem:[#allocation13_spill]] %s4465_s2 }
   0x4   :  { %4518 = sst [smem:[#allocation14_spill]] %s4466_s3 }
   0x5   :  { %4519 = sst [smem:[#allocation15_spill]] %s4467_s4 }
   0x6   :  { %4520 = sst [smem:[#allocation16_spill]] %s4468_s5 }
   0x7   :  { %4521 = sst [smem:[#allocation17_spill]] %s4469_s6 }
   0x8   :  { %4522 = sst [smem:[#allocation18_spill]] %s4470_s7 }
   0x9   :  { %4523 = sst [smem:[#allocation19_spill]] %s4471_s8 }
   0xa   :  { %4524 = sst [smem:[#allocation20_spill]] %s4472_s9 }
   0xb   :  { %4525 = sst [smem:[#allocation21_spill]] %s4473_s10 }
   0xc   :  { %4526 = sst [smem:[#allocation22_spill]] %s4474_s11 }
   0xd   :  { %4527 = sst [smem:[#allocation23_spill]] %s4475_s12 }
   0xe   :  { %4528 = sst [smem:[#allocation24_spill]] %s4478_s15 }
   0xf   :  { %33 = vsyncpa [#allocation3], 0 }
  0x10   :  { %35 = vsyncpa [#allocation3 + $0x1], 0  ;;  %s3883_s8 = smov 0   ;;  %s3885_s5 = smov 0  }
  0x11   :  { %s3887_s9 = smov 0   ;;  %s3889_s30 = smov 0  }
  0x12 LB: > { %4529 = sst [smem:[#allocation5_spill]] %s3714_s8  ;;  %s3904_s3 = sadd.s32 4294967295, %s3726_s30   ;;  %s3726_s30 = sphi %s3889_s30, %s4560_s30   ;;  %s3722_s9 = sphi %s3887_s9, %s4562_s9   ;;  %s3718_s5 = sphi %s3885_s5, %s4564_s5   ;;  %s3714_s8 = sphi %s3883_s8, %s4563_s8  }
  0x13   : > { %4530 = sst [smem:[#allocation6_spill]] %s3722_s9  ;;  %s3127_s6 = sadd.s32 4294967294, %s3726_s30  }
  0x14   : > { %4531 = sst [smem:[#allocation7_spill]] %s3726_s30  ;;  %s3908_s10 = sadd.s32 1, %s3726_s30  }
  0x15   : > { %4532 = sst [smem:[#allocation8_spill]] %s3908_s10  ;;  %s651_s0 = sadd.s32 1, %s3722_s9 }
  0x16   : > { %s648_s11 = ssub.s32 %s3726_s30, %s3908_s10  ;;  %p661_p0 = scmp.ne.s32.totalorder %s3722_s9, %s3718_s5 }
  0x17   : > { %p649_p1 = scmp.eq.s32.totalorder %s648_s11, 0  ;;  %p662_p2 = scmp.eq.s32.totalorder %s3904_s3, 1 }
  0x18   : > { %p667_p3 = scmp.ne.s32.totalorder %s3718_s5, %s3714_s8  ;;  %p668_p4 = scmp.eq.s32.totalorder %s3127_s6, 1 }
  0x19   : > { %s3919_s29 = scalar_select %p649_p1, %s3722_s9, %s651_s0  }
  0x1a   : > { %p3921_p5 = por %p662_p2, %p661_p0  ;;  %p3925_p6 = por %p668_p4, %p667_p3 }
  0x1b   : > { %4533 = sst [smem:[#allocation9_spill]] %s3919_s29  ;;  %p3130_p7 = scmp.ge.s32.totalorder %s3726_s30, 1 }
  0x1c   : > { %s4535_s7 = scalar_select %p3925_p6, 1, 0 }
  0x1d   : > { %p785_p8 = scmp.lt.s32.totalorder %s3726_s30, 3 }
  0x1e   : > { %4536 = sst [smem:[#allocation10_spill]] %s4535_s7 }
  0x1f   : > { %p786_p9 = pnand %p3130_p7, %p785_p8 }
  0x20   : > { %p869_p10 = scmp.lt.s32.totalorder (!%p786_p9), %s3904_s3, 1  ;;  %v3728_v0 = vmov (!%p786_p9), 0.0   ;;  %vm3729_vm0 = vmmov (!%p786_p9), 0   ;;  %s4537_s6 = sld [smem:[#allocation20_spill]] (!%p786_p9)  ;;  %vm910_vm1 = vcmask (!%p786_p9), 130048   ;;  %v968_v11 = vlaneseq (!%p786_p9) }
  0x21   : > { %789 = sbr.rel (%p786_p9) target bundleno = 7195 (0x1c1b), region = 132  ;;  %3303 = vmatprep.subr.bf16.mxu0 (!%p786_p9), %v3728_v0  ;;  %3305 = vmatprep.mubr.msk.bf16.mxu0 (!%p786_p9), %vm3729_vm0, %v3728_v0  ;;  %s4538_s7 = sld [smem:[#allocation11_spill]] (!%p786_p9)  ;;  %vm1028_vm2 = vcmask (!%p786_p9), 1045504   ;;  %vm955_vm5 = vcmask (!%p786_p9), 64512   ;;  %vm1005_vm6 = vcmask (!%p786_p9), 195584   ;;  %vm1024_vm7 = vcmask (!%p786_p9), 228352  }
  0x22   : > { %3309 = vmatprep.subr.bf16.mxu1 (!%p786_p9), %v3728_v0  ;;  %3313 = vmatprep.mubr.msk.bf16.mxu1 (!%p786_p9), %vm3729_vm0, %v3728_v0  ;;  %s4539_s9 = sld [smem:[#allocation12_spill]] (!%p786_p9)  ;;  %s4540_s11 = sld [smem:[#allocation21_spill]] (!%p786_p9)  ;;  %v3970_v14 = vshrl.u32 (!%p786_p9), %v968_v11, 7  ;;  %vm1097_vm8 = vcmask (!%p786_p9), 261120   ;;  %v3142_v51 = vld [vmem:[%s4479_s16] ss:$0 sm:$0xff] (!%p786_p9) }
  0x23   : > { %s4541_s15 = sld [smem:[#allocation24_spill]] (!%p786_p9)  ;;  %s3731_s30 = smov (!%p786_p9), 8   ;;  %vm1332_vm9 = vcmask (!%p786_p9), 253952   ;;  %vm1342_vm10 = vcmask (!%p786_p9), 72704   ;;  %vm1349_vm11 = vcmask (!%p786_p9), 1040384   ;;  %vm3734_vm12 = vmmov (!%p786_p9), 1  }
  0x24   : > { %vm974_vm3 = vcmp.lt.s32.totalorder (!%p786_p9), %v3970_v14, 7  ;;  %vm970_vm4 = vcmp.lt.s32.totalorder (!%p786_p9), %v3970_v14, 1  ;;  %vm4064_vm13 = vmpackc.low (!%p786_p9), %vm1349_vm11, %vm3734_vm12  ;;  %vm1517_vm14 = vcmask (!%p786_p9), 7168  }
  0x26   : > { %v898_v1 = vld [vmem:[%s4537_s6] sm:$0xff] (!%p786_p9)  ;;  %v899_v2 = vld [vmem:[%s4537_s6 + $0x8] sm:$0xff] (!%p786_p9)  ;;  %s3732_s6 = smov (!%p786_p9), 16  }
  0x27   : > { %v900_v6 = vpack.c.bf16 (!%p786_p9), %v899_v2, %v898_v1 }
  0x28   : > { %s870_s12 = scalar_select %p869_p10, %s3904_s3, 1  ;;  %v3620_v10 = vld [vmem:[%s4540_s11] sm:$0xff]   ;;  %v3621_v12 = vld [vmem:[%s4540_s11 + $0x8] sm:$0x3f]  }
  0x29   : > { %3310 = vmatpush3.bf16.msra.mxu1 %v3620_v10  ;;  %v1030_v15 = vsel %vm1028_vm2, %v3621_v12, 0  ;;  %v3622_v20 = vld [vmem:[%s4541_s15] sm:$0xff]   ;;  %v3623_v45 = vld [vmem:[%s4541_s15 + $0x8] sm:$0xff]   ;;  %s4543_s11 = sld [smem:[#allocation15_spill]]  ;;  %s4508_s15 = smov 96  }
  0x2a   : > { %s3942_s0 = sshll.u32 %s870_s12, 4  ;;  %3311 = vmatprep.subr.bf16.mxu1 %v3728_v0  ;;  %s4542_s12 = sld [smem:[#allocation14_spill]] }
  0x2b   : > { %s3951_s8 = scalar_lea.vmem %s4538_s7, %s3942_s0  ;;  %s878_s10 = scalar_lea.vmem %s4539_s9, %s3942_s0 }
  0x2c   : > { %v903_v3 = vld [vmem:[%s3951_s8] sm:$0xff]  ;;  %v904_v4 = vld [vmem:[%s3951_s8 + $0x8] sm:$0xff]  ;;  %s3730_s7 = smov 24  }
  0x2d   : > { %v909_v5 = vpack.c.bf16 %v904_v4, %v903_v3  ;;  %v905_v7 = vld [vmem:[%s878_s10] sm:$0xff]  ;;  %v906_v8 = vld [vmem:[%s878_s10 + $0x8] sm:$0xff]  ;;  %3312 = vmatpush3.bf16.msra.mxu1 %v1030_v15 }
  0x2e   : > { %v3605_v9 = vpack.i.bf16 %v906_v8, %v905_v7  ;;  %3325 = vmatprep.subr.bf16.mxu1 %v3728_v0 }
  0x2f   : > { %3304 = vmatpush3.bf16.msra.mxu0 %v909_v5  ;;  %v888_v60 = vld [vmem:[%s4543_s11] sm:$0xff]  ;;  %v889_v61 = vld [vmem:[%s4543_s11 + $0x8] sm:$0x1] }
  0x30   : > { %3317 = vmatprep.subr.bf16.mxu0 %v3728_v0  ;;  %3606 = vrot.lane.b32.xlu1 %v3605_v9, %s3730_s7  ;;  %v885_v58 = vld [vmem:[%s4542_s12] sm:$0xff]  ;;  %v886_v59 = vld [vmem:[%s4542_s12 + $0x8] sm:$0x1]  ;;  %v4029_v1 = vpack.c.bf16 %v889_v61, %v888_v60  ;;  %s4546_s7 = sld [smem:[#allocation17_spill]] }
  0x31   : > { %v4024_v63 = vpack.c.bf16 %v886_v59, %v885_v58 }
  0x32   : > { %3306 = vmatmul.mubr.msk.bf16.vlgmr.msra.gmra.mrb[0].mxu0 %vm910_vm1, %v900_v6 }
  0x33   : > { %3321 = vmatprep.mubr.msk.bf16.mxu0 %vm3729_vm0, %v3728_v0  ;;  %3318 = vmatpush3.bf16.msra.mxu0 %v3622_v20 }
  0x34   : > { %3319 = vmatprep.subr.bf16.mxu0 %v3728_v0 }
  0x37   : > { %3320 = vmatpush3.bf16.msra.mxu0 %v3623_v45 }
  0x38   : > { %3331 = vmatprep.subr.bf16.mxu0 %v3728_v0 }
  0xa2   : > { %v3607_v28 = vpop.permute.xlu1 %3606 }
  0xa3   : > { %v3609_v32 = vunpack.i.h.bf16 %v3607_v28  ;;  %v3608_v33 = vunpack.i.l.bf16 %v3607_v28 }
 0x105   : > { %v948_v13 = vpop.f32.mrb[0].mxu0 }
 0x106   : > { %v3307_v16 = vpop.f32.mrb[1].mxu0 }
 0x107   : > { %v950_v17 = vpop.f32.mrb[2].mxu0 }
 0x108   : > { %v954_v18 = vsub.f32 %v904_v4, %v950_v17  ;;  %v3308_v19 = vpop.f32.mrb[3].mxu0 }
 0x10a   : > { %v973_v21 = vrot.slane %v954_v18, 1  ;;  %v3595_v22 = vpack.i.bf16 %v3728_v0, %v954_v18  ;;  %v967_v27 = vrot.slane %v954_v18, 7 }
 0x10c   : > { %3596 = vrot.lane.b32.xlu0 %v3595_v22, %s3731_s30  ;;  %v975_v23 = vsel %vm974_vm3, %v973_v21, 0.0  ;;  %v976_v24 = vsel %vm974_vm3, 0.0, %v973_v21  ;;  %v971_v34 = vsel %vm970_vm4, %v967_v27, 0.0  ;;  %v972_v35 = vsel %vm970_vm4, 0.0, %v967_v27  ;;  %s4544_s30 = sld [smem:[#allocation16_spill]] }
 0x10d   : > { %v3600_v25 = vpack.i.bf16 %v976_v24, %v975_v23 }
 0x110   : > { %3601 = vrot.lane.b32.xlu0 %v3600_v25, %s3732_s6 }
 0x112   : > { %s4545_s6 = smov %s4544_s30 }
 0x17e   : > { %v3597_v26 = vpop.permute.xlu0 %3596 }
 0x17f   : > { %v3599_v29 = vunpack.i.h.bf16 %v3597_v26  ;;  %v3598_v30 = vunpack.i.l.bf16 %v3597_v26 }
 0x181   : > { %v1001_v38 = vsel %vm955_vm5, %v972_v35, %v3598_v30  ;;  %v1002_v39 = vsel %vm955_vm5, %v971_v34, %v3599_v29 }
 0x182   : > { %v3602_v31 = vpop.permute.xlu0 %3601 }
 0x183   : > { %v3604_v36 = vunpack.i.h.bf16 %v3602_v31  ;;  %v3603_v37 = vunpack.i.l.bf16 %v3602_v31 }
 0x185   : > { %v1003_v40 = vsel %vm910_vm1, %v1001_v38, %v3603_v37  ;;  %v1004_v41 = vsel %vm910_vm1, %v1002_v39, %v3604_v36  ;;  %v4053_v36 = vld [vmem:[%s4544_s30] sm:$0xff]  ;;  %s4549_s30 = sld [smem:[#allocation19_spill]] }
 0x186   : > { %v1006_v42 = vsel %vm1005_vm6, %v1003_v40, %v3608_v33  ;;  %v1007_v43 = vsel %vm1005_vm6, %v1004_v41, %v3609_v32  ;;  %v4058_v37 = vld [vmem:[%s4546_s7] sm:$0xff] }
 0x187   : > { %v1012_v44 = vpack.c.bf16 %v1007_v43, %v1006_v42  ;;  %v4075_v43 = vld [vmem:[%s4545_s6 + $0x8] sm:$0xff] }
 0x189   : > { %3314 = vmatmul.mubr.msk.bf16.vlgmr.msra.gmra.mrb[0].mxu1 %vm1024_vm7, %v1012_v44 }
 0x18a   : > { %3327 = vmatprep.mubr.msk.bf16.mxu1 %vm3729_vm0, %v3728_v0 }
 0x25c   : > { %v3998_v46 = vpop.f32.mrb[0].mxu1 }
 0x25d   : > { %v3315_v47 = vpop.f32.mrb[1].mxu1 }
 0x25e   : > { %v4000_v48 = vpop.f32.mrb[2].mxu1  ;;  %v4089_v47 = vld [vmem:[%s4546_s7 + $0x8] sm:$0xff]  ;;  %s3736_s7 = smov 32  }
 0x25f   : > { %v1077_v49 = vpack.c.bf16 %v4000_v48, %v3998_v46  ;;  %v3316_v50 = vpop.f32.mrb[3].mxu1 }
 0x261   : > { %3322 = vmatmul.mubr.msk.bf16.vlgmr.msra.gmra.mrb[4].mxu0 %vm1097_vm8, %v1077_v49 }
 0x262   : > { %3333 = vmatprep.mubr.msk.bf16.mxu0 %vm3729_vm0, %v3728_v0 }
 0x334   : > { %v1135_v52 = vpop.f32.mrb[4].mxu0 }
 0x335   : > { %v3323_v53 = vpop.f32.mrb[5].mxu0  ;;  %v1136_v55 = vadd.f32 %v3142_v51, %v1135_v52 }
 0x336   : > { %v1138_v54 = vpop.f32.mrb[6].mxu0 }
 0x337   : > { %v1139_v56 = vadd.f32 %v3142_v51, %v1138_v54  ;;  %v3324_v57 = vpop.f32.mrb[7].mxu0 }
 0x339   : > { %v4022_v62 = vpack.c.bf16 %v1139_v56, %v1136_v55 }
 0x33b   : > { %1232 = vrot.lane.b32.xlu1 %v4022_v62, %s4508_s15  ;;  %3326 = vmatpush3.bf16.msra.mxu1 %v4022_v62  ;;  %s4509_s15 = smov 64  }
 0x33c   : > { %3332 = vmatpush3.bf16.msra.mxu0 %v4022_v62  ;;  %3337 = vmatprep.subr.bf16.mxu1 %v3728_v0 }
 0x33d   : > { %3343 = vmatprep.subr.bf16.mxu0 %v3728_v0 }
 0x33e   : > { %3328 = vmatmul.mubr.msk.bf16.vlgmr.msra.gmra.mrb[4].mxu1 %vm910_vm1, %v4024_v63 }
 0x33f   : > { %3334 = vmatmul.mubr.msk.bf16.vlgmr.msra.gmra.mrb[8].mxu0 %vm910_vm1, %v4029_v1  ;;  %3339 = vmatprep.mubr.msk.bf16.mxu1 %vm3729_vm0, %v3728_v0 }
 0x340   : > { %3345 = vmatprep.mubr.msk.bf16.mxu0 %vm3729_vm0, %v3728_v0 }
 0x3ad   : > { %v1233_v2 = vpop.permute.xlu1 %1232 }
 0x3ae   : > { %3338 = vmatpush3.bf16.msra.mxu1 %v1233_v2  ;;  %3344 = vmatpush3.bf16.msra.mxu0 %v1233_v2 }
 0x3b1   : > { %3340 = vmatmul.mubr.msk.bf16.vlgmr.msra.gmra.mrb[8].mxu1 %vm910_vm1, %v4024_v63  ;;  %3346 = vmatmul.mubr.msk.bf16.vlgmr.msra.gmra.mrb[12].mxu0 %vm910_vm1, %v4029_v1 }
 0x3b2   : > { %3353 = vmatprep.mubr.msk.f32.mxu1 %vm1342_vm10, %v4053_v36  ;;  %3360 = vmatprep.mubr.msk.f32.mxu0 %vm1342_vm10, %v4058_v37 }
 0x411   : > { %v1180_v3 = vpop.f32.mrb[4].mxu1 }
 0x412   : > { %v1224_v4 = vpop.f32.mrb[8].mxu0  ;;  %v3329_v5 = vpop.f32.mrb[5].mxu1 }
 0x413   : > { %v3335_v6 = vpop.f32.mrb[9].mxu0  ;;  %v1183_v7 = vpop.f32.mrb[6].mxu1 }
 0x414   : > { %v1227_v8 = vpop.f32.mrb[10].mxu0  ;;  %v3330_v9 = vpop.f32.mrb[7].mxu1 }
 0x415   : > { %v3336_v10 = vpop.f32.mrb[11].mxu0 }
 0x484   : > { %v1269_v11 = vpop.f32.mrb[8].mxu1  ;;  %v1310_v12 = vpop.f32.mrb[12].mxu0 }
 0x485   : > { %v1317_v13 = vmul.f32 %v1269_v11, %v1180_v3  ;;  %v1325_v15 = vmul.f32 %v1269_v11, %v1224_v4  ;;  %v1319_v16 = vmul.f32 %v1310_v12, %v1224_v4  ;;  %v1323_v17 = vmul.f32 %v1310_v12, %v1180_v3  ;;  %v3341_v18 = vpop.f32.mrb[9].mxu1  ;;  %v3347_v19 = vpop.f32.mrb[13].mxu0 }
 0x486   : > { %v1272_v20 = vpop.f32.mrb[10].mxu1  ;;  %v1313_v21 = vpop.f32.mrb[14].mxu0 }
 0x487   : > { %v1318_v22 = vmul.f32 %v1272_v20, %v1183_v7  ;;  %v1326_v23 = vmul.f32 %v1272_v20, %v1227_v8  ;;  %v1320_v24 = vmul.f32 %v1313_v21, %v1227_v8  ;;  %v1324_v25 = vmul.f32 %v1313_v21, %v1183_v7  ;;  %v3342_v26 = vpop.f32.mrb[11].mxu1  ;;  %v3348_v27 = vpop.f32.mrb[15].mxu0 }
 0x488   : > { %v1321_v28 = vadd.f32 %v1319_v16, %v1317_v13  ;;  %v1327_v29 = vsub.f32 %v1323_v17, %v1325_v15  ;;  %v4099_v7 = vadd.s32 8, %v3970_v14 }
 0x489   : > { %v1322_v30 = vadd.f32 %v1320_v24, %v1318_v22  ;;  %v1328_v31 = vsub.f32 %v1324_v25, %v1326_v23 }
 0x48a   : > { %v1329_v32 = vsel %vm1097_vm8, %v1321_v28, 0.0  ;;  %v1336_v34 = vsel %vm1097_vm8, %v1327_v29, 0.0 }
 0x48b   : > { %1330 = vadd.xlane.f32.xlu0 %v1329_v32  ;;  %v1333_v33 = vsel %vm1332_vm9, %v1322_v30, 0.0  ;;  %v1339_v35 = vsel %vm1332_vm9, %v1328_v31, 0.0 }
 0x48c   : > { %1334 = vadd.xlane.f32.xlu1 %v1333_v33 }
 0x48f   : > { %1337 = vadd.xlane.f32.xlu0 %v1336_v34 }
 0x493   : > { %1340 = vadd.xlane.f32.xlu0 %v1339_v35 }
 0x518   : > { %v1331_v38 = vpop.xlane.xlu0 %1330 }
 0x519   : > { %v1335_v39 = vpop.xlane.xlu1 %1334 }
 0x51a   : > { %v3507_v41 = vpack.c.bf16 %v1335_v39, %v1331_v38 }
 0x51c   : > { %v1338_v42 = vpop.xlane.xlu0 %1337  ;;  %3509 = vmatprep.subr.msk.bf16.mxu1 %vm4064_vm13, %v3507_v41 }
 0x51d   : > { %3512 = vmatpush3.bf16.msk.msra.mxu1 %vm4064_vm13, %v3507_v41 }
 0x51e   : > { %3377 = vmatprep.subr.bf16.mxu1 %v3728_v0 }
 0x520   : > { %v1341_v44 = vpop.xlane.xlu0 %1340  ;;  %3354 = vmatmul.mubr.msk.f32.vlgmr.msra.gmra.mrb[12].mxu1 %vm1342_vm10, %v4075_v43 }
 0x521   : > { %v3513_v45 = vpack.c.bf16 %v1341_v44, %v1338_v42  ;;  %3379 = vmatprep.mubr.msk.bf16.mxu1 %vm3729_vm0, %v3728_v0 }
 0x523   : > { %3515 = vmatprep.subr.msk.bf16.mxu0 %vm4064_vm13, %v3513_v45 }
 0x524   : > { %3518 = vmatpush3.bf16.msk.msra.mxu0 %vm4064_vm13, %v3513_v45 }
 0x525   : > { %3363 = vmatprep.subr.bf16.mxu0 %v3728_v0 }
 0x527   : > { %3361 = vmatmul.mubr.msk.f32.vlgmr.msra.gmra.mrb[16].mxu0 %vm1342_vm10, %v4089_v47 }
 0x528   : > { %3365 = vmatprep.mubr.msk.bf16.mxu0 %vm3729_vm0, %v3728_v0 }
 0x5f3   : > { %v3355_v49 = vpop.f32.mrb[12].mxu1 }
 0x5f4   : > { %v1419_v50 = vpop.f32.mrb[13].mxu1 }
 0x5fa   : > { %v3362_v51 = vpop.f32.mrb[16].mxu0 }
 0x5fb   : > { %v1513_v52 = vsub.f32 %v3355_v49, %v3362_v51  ;;  %v1503_v53 = vpop.f32.mrb[17].mxu0 }
 0x5fc   : > { %v1512_v54 = vsub.f32 %v1419_v50, %v1503_v53 }
 0x5fd   : > { %v1515_v55 = vmul.f32 0.03125, %v1513_v52 }
 0x5fe   : > { %v1514_v56 = vmul.f32 0.03125, %v1512_v54 }
 0x5ff   : > { %v1519_v57 = vsel %vm1517_vm14, %v1515_v55, -inf }
 0x600   : > { %v1518_v58 = vsel %vm1517_vm14, %v1514_v56, -inf }
 0x601   : > { %v1520_v59 = vmax.f32 %v1518_v58, %v1519_v57 }
 0x603   : > { %1521 = vmax.xlane.f32.xlu1 %v1520_v59 }
 0x690   : > { %v1522_v60 = vpop.xlane.xlu1 %1521 }
 0x691   : > { %v1523_v61 = vrot.slane %v1522_v60, 4 }
 0x693   : > { %v1524_v2 = vmax.f32 %v1522_v60, %v1523_v61 }
 0x695   : > { %v1525_v3 = vrot.slane %v1524_v2, 2 }
 0x697   : > { %v1526_v4 = vmax.f32 %v1524_v2, %v1525_v3 }
 0x699   : > { %v1527_v5 = vrot.slane %v1526_v4, 1 }
 0x69b   : > { %v1528_v6 = vmax.f32 %v1526_v4, %v1527_v5 }
 0x69d   : > { %3531 = vpush %v1528_v6 }
 0x6ce   : > { %s3532_s9 = spop %3531 }
 0x6cf   : > { %v4101_v8 = vstv %s3532_s9 }
 0x6d0   : > { %vm1531_vm15 = vcmp.ge.f32.partialorder %v1514_v56, %v4101_v8  ;;  %vm1532_vm2 = vcmp.ge.f32.partialorder %v1515_v55, %v4101_v8 }
 0x6d1   : > { %v1533_v9 = vsel %vm1531_vm15, %v3970_v14, 16  ;;  %v1534_v10 = vsel %vm1532_vm2, %v4099_v7, 16 }
 0x6d2   : > { %v1535_v11 = vsel %vm1517_vm14, %v1533_v9, 2147483647  ;;  %v1536_v12 = vsel %vm1517_vm14, %v1534_v10, 2147483647 }
 0x6d3   : > { %vm1537_vm6 = vcmp.lt.s32.totalorder %v1535_v11, %v1536_v12 }
 0x6d4   : > { %v1538_v13 = vsel %vm1537_vm6, %v1535_v11, %v1536_v12 }
 0x6d5   : > { %v1540_v15 = vshra.s32 %v1538_v13, 16  ;;  %v1539_v17 = vand.u32 65535, %v1538_v13 }
 0x6d7   : > { %v1542_v16 = vcvt.s32.f32 %v1540_v15  ;;  %v1541_v19 = vcvt.s32.f32 %v1539_v17 }
 0x6d9   : > { %1543 = vmin.xlane.f32.xlu0 %v1542_v16 }
 0x766   : > { %v1544_v18 = vpop.xlane.xlu0 %1543 }
 0x767   : > { %vm1545_vm7 = vcmp.eq.f32.partialorder %v1542_v16, %v1544_v18  ;;  %v1550_v21 = vcvt.f32.s32 %v1544_v18 }
 0x768   : > { %v1546_v20 = vsel %vm1545_vm7, %v1541_v19, inf }
 0x769   : > { %1547 = vmin.xlane.f32.xlu1 %v1546_v20  ;;  %v1551_v23 = vshll.u32 %v1550_v21, 16 }
 0x7f6   : > { %v1548_v22 = vpop.xlane.xlu1 %1547 }
 0x7f7   : > { %v1549_v24 = vcvt.f32.s32 %v1548_v22 }
 0x7f9   : > { %v1552_v25 = vadd.s32 %v1551_v23, %v1549_v24 }
 0x7fb   : > { %v1553_v26 = vrot.slane %v1552_v25, 4 }
 0x7fd   : > { %vm1554_vm11 = vcmp.lt.s32.totalorder %v1552_v25, %v1553_v26 }
 0x7fe   : > { %v1555_v27 = vsel %vm1554_vm11, %v1552_v25, %v1553_v26 }
 0x7ff   : > { %v1556_v28 = vrot.slane %v1555_v27, 2 }
 0x801   : > { %vm1557_vm12 = vcmp.lt.s32.totalorder %v1555_v27, %v1556_v28 }
 0x802   : > { %v1558_v29 = vsel %vm1557_vm12, %v1555_v27, %v1556_v28 }
 0x803   : > { %v1559_v30 = vrot.slane %v1558_v29, 1 }
 0x805   : > { %vm1560_vm15 = vcmp.lt.s32.totalorder %v1558_v29, %v1559_v30 }
 0x806   : > { %v1561_v31 = vsel %vm1560_vm15, %v1558_v29, %v1559_v30 }
 0x807   : > { %3533 = vpush %v1561_v31 }
 0x838   : > { %s3534_s10 = spop %3533 }
 0x839   : > { %v1563_v32 = vstv %s3534_s10  ;;  %s4550_s10 = smov %s4549_s30 }
 0x83a   : > { %vm1564_vm2 = vcmp.eq.s32.totalorder %v3970_v14, %v1563_v32  ;;  %vm1565_vm6 = vcmp.eq.s32.totalorder %v4099_v7, %v1563_v32  ;;  %v4127_v10 = vld [vmem:[%s4550_s10 + $0x8] sm:$0xff]  ;;  %s4555_s10 = sld [smem:[#allocation22_spill]] }
 0x83b   : > { %v1566_v33 = vsel %vm1564_vm2, -1e+30, %v1514_v56  ;;  %v1567_v34 = vsel %vm1565_vm6, -1e+30, %v1515_v55  ;;  %vm1625_vm2 = vcmp.eq.s32.totalorder %v4127_v10, %v1563_v32 }
 0x83c   : > { %v1568_v35 = vsel %vm1517_vm14, %v1566_v33, -inf  ;;  %v1569_v38 = vsel %vm1517_vm14, %v1567_v34, -inf  ;;  %v3157_v15 = vsel %vm1625_vm2, 1.0, %v3728_v0 }
 0x83d   : > { %v1570_v39 = vmax.f32 %v1568_v35, %v1569_v38 }
 0x83f   : > { %1571 = vmax.xlane.f32.xlu0 %v1570_v39 }
 0x8cc   : > { %v1572_v41 = vpop.xlane.xlu0 %1571 }
 0x8cd   : > { %v1573_v42 = vrot.slane %v1572_v41, 4 }
 0x8cf   : > { %v1574_v44 = vmax.f32 %v1572_v41, %v1573_v42 }
 0x8d1   : > { %v1575_v45 = vrot.slane %v1574_v44, 2 }
 0x8d3   : > { %v1576_v49 = vmax.f32 %v1574_v44, %v1575_v45  ;;  %v3624_v45 = vld [vmem:[%s4480_s17] sm:$0xff]  }
 0x8d5   : > { %v1577_v50 = vrot.slane %v1576_v49, 1 }
 0x8d7   : > { %v1578_v51 = vmax.f32 %v1576_v49, %v1577_v50  ;;  %v3625_v50 = vld [vmem:[%s4480_s17 + $0x8] sm:$0xff]  }
 0x8d9   : > { %3535 = vpush %v1578_v51 }
 0x90a   : > { %s3536_s1 = spop %3535 }
 0x90b   : > { %v1580_v52 = vstv %s3536_s1  ;;  %s4551_s1 = sld [smem:[#allocation18_spill]] }
 0x90c   : > { %vm1581_vm7 = vcmp.ge.f32.partialorder %v1566_v33, %v1580_v52  ;;  %vm1582_vm11 = vcmp.ge.f32.partialorder %v1567_v34, %v1580_v52  ;;  %v1613_v53 = vmax.f32 %v4101_v8, %v1580_v52 }
 0x90d   : > { %v1583_v54 = vsel %vm1581_vm7, %v3970_v14, 16  ;;  %v1584_v55 = vsel %vm1582_vm11, %v4099_v7, 16 }
 0x90e   : > { %v1614_v56 = vsub.f32 %v4101_v8, %v1613_v53  ;;  %v1617_v57 = vsub.f32 %v1580_v52, %v1613_v53  ;;  %v1585_v58 = vsel %vm1517_vm14, %v1583_v54, 2147483647  ;;  %v1586_v59 = vsel %vm1517_vm14, %v1584_v55, 2147483647  ;;  %v4122_v8 = vld [vmem:[%s4549_s30] sm:$0xff]  ;;  %s4552_s30 = sld [smem:[#allocation13_spill]] }
 0x90f   : > { %vm1587_vm12 = vcmp.lt.s32.totalorder %v1585_v58, %v1586_v59  ;;  %vm1624_vm15 = vcmp.eq.s32.totalorder %v4122_v8, %v1563_v32 }
 0x910   : > { %v1615_v60 = vmul.f32 1.442695, %v1614_v56  ;;  %v1618_v61 = vmul.f32 1.442695, %v1617_v57  ;;  %v1588_v2 = vsel %vm1587_vm12, %v1585_v58, %v1586_v59  ;;  %v3156_v13 = vsel %vm1624_vm15, 1.0, %v3728_v0 }
 0x911   : > { %v1590_v3 = vshra.s32 %v1588_v2, 16  ;;  %v1589_v18 = vand.u32 65535, %v1588_v2  ;;  %v3164_v59 = vld [vmem:[%s4481_s18] ss:$0 sm:$0xff] }
 0x912   : > { %3646 = vpow2.f32 %v1615_v60 }
 0x913   : > { %3648 = vpow2.f32 %v1618_v61  ;;  %v1592_v4 = vcvt.s32.f32 %v1590_v3  ;;  %v1591_v20 = vcvt.s32.f32 %v1589_v18 }
 0x914   : > { %s883_s9 = scalar_lea.vmem %s4552_s30, %s3942_s0  ;;  %s4553_s30 = smov 96  }
 0x915   : > { %1593 = vmin.xlane.f32.xlu1 %v1592_v4 }
 0x91c   : > { %v3647_v5 = vpop.eup %3646 }
 0x91d   : > { %v3649_v6 = vpop.eup %3648 }
 0x91e   : > { %v1620_v9 = vadd.f32 %v3649_v6, %v3647_v5 }
 0x920   : > { %3650 = vrcp.f32 %v1620_v9 }
 0x926   : > { %1647 = vrot.lane.b32.xlu1 %v4022_v62, %s4509_s15 }
 0x92a   : > { %v3651_v11 = vpop.eup %3650 }
 0x92b   : > { %v1623_v12 = vmul.f32 %v3651_v11, %v3647_v5  ;;  %v1634_v34 = vmul.f32 %v3651_v11, %v3649_v6  ;;  %v895_v5 = vld [vmem:[%s4551_s1] sm:$0xff]  ;;  %v3627_v11 = vld [vmem:[%s4482_s19 + $0x8] sm:$0xff]  }
 0x92d   : > { %v1630_v16 = vmul.f32 %v3156_v13, %v1623_v12  ;;  %v1631_v17 = vmul.f32 %v3157_v15, %v1623_v12  ;;  %v3628_v12 = vld [vmem:[%s4484_s21] sm:$0xff]   ;;  %v908_v15 = vld [vmem:[%s883_s9 + $0x8] sm:$0xff] }
 0x92e   : > { %v907_v13 = vld [vmem:[%s883_s9] sm:$0xff] }
 0x9a2   : > { %v1594_v19 = vpop.xlane.xlu1 %1593 }
 0x9a3   : > { %vm1595_vm6 = vcmp.eq.f32.partialorder %v1592_v4, %v1594_v19  ;;  %v1600_v62 = vcvt.f32.s32 %v1594_v19 }
 0x9a4   : > { %v1596_v21 = vsel %vm1595_vm6, %v1591_v20, inf }
 0x9a5   : > { %1597 = vmin.xlane.f32.xlu0 %v1596_v21  ;;  %v1601_v24 = vshll.u32 %v1600_v62, 16 }
 0x9a6   : > { %v1648_v22 = vpop.permute.xlu1 %1647 }
 0x9a7   : > { %3364 = vmatpush3.bf16.msra.mxu0 %v1648_v22 }
 0x9a8   : > { %3369 = vmatprep.subr.bf16.mxu0 %v3728_v0 }
 0xa32   : > { %v1598_v23 = vpop.xlane.xlu0 %1597 }
 0xa33   : > { %v1599_v25 = vcvt.f32.s32 %v1598_v23 }
 0xa35   : > { %v1602_v26 = vadd.s32 %v1601_v24, %v1599_v25  ;;  %v3170_v24 = vld [vmem:[%s4485_s22] ss:$0 sm:$0xff] }
 0xa37   : > { %v1603_v27 = vrot.slane %v1602_v26, 4 }
 0xa39   : > { %vm1604_vm7 = vcmp.lt.s32.totalorder %v1602_v26, %v1603_v27 }
 0xa3a   : > { %v1605_v28 = vsel %vm1604_vm7, %v1602_v26, %v1603_v27 }
 0xa3b   : > { %v1606_v29 = vrot.slane %v1605_v28, 2 }
 0xa3d   : > { %vm1607_vm11 = vcmp.lt.s32.totalorder %v1605_v28, %v1606_v29 }
 0xa3e   : > { %v1608_v30 = vsel %vm1607_vm11, %v1605_v28, %v1606_v29 }
 0xa3f   : > { %v1609_v31 = vrot.slane %v1608_v30, 1 }
 0xa41   : > { %vm1610_vm12 = vcmp.lt.s32.totalorder %v1608_v30, %v1609_v31 }
 0xa42   : > { %v1611_v32 = vsel %vm1610_vm12, %v1608_v30, %v1609_v31 }
 0xa43   : > { %3537 = vpush %v1611_v32  ;;  %v3166_v32 = vld [vmem:[%s4483_s20] ss:$0 sm:$0xff] }
 0xa74   : > { %s3538_s4 = spop %3537 }
 0xa75   : > { %v1635_v33 = vstv %s3538_s4 }
 0xa76   : > { %vm1636_vm15 = vcmp.eq.s32.totalorder %v4122_v8, %v1635_v33  ;;  %vm1637_vm2 = vcmp.eq.s32.totalorder %v4127_v10, %v1635_v33 }
 0xa77   : > { %v3158_v35 = vsel %vm1636_vm15, 1.0, %v3728_v0  ;;  %v3159_v38 = vsel %vm1637_vm2, 1.0, %v3728_v0 }
 0xa78   : > { %v1642_v39 = vmul.f32 %v3158_v35, %v1634_v34  ;;  %v1643_v41 = vmul.f32 %v3159_v38, %v1634_v34 }
 0xa7a   : > { %v1644_v42 = vadd.f32 %v1642_v39, %v1630_v16  ;;  %v1645_v44 = vadd.f32 %v1643_v41, %v1631_v17  ;;  %v3629_v16 = vld [vmem:[%s4484_s21 + $0x8] sm:$0xff]   ;;  %v1885_v17 = vpack.c.bf16 %v908_v15, %v907_v13 }
 0xa7c   : > { %v1646_v49 = vpack.c.bf16 %v1645_v44, %v1644_v42 }
 0xa7e   : > { %3366 = vmatmul.mubr.msk.bf16.vlgmr.msra.gmra.mrb[20].mxu0 %vm910_vm1, %v1646_v49 }
 0xa7f   : > { %3370 = vmatpush3.bf16.msra.mxu0 %v3624_v45  ;;  %3373 = vmatprep.mubr.msk.bf16.mxu0 %vm3729_vm0, %v3728_v0 }
 0xa80   : > { %3371 = vmatprep.subr.bf16.mxu0 %v3728_v0 }
 0xa83   : > { %3372 = vmatpush3.bf16.msra.mxu0 %v3625_v50 }
 0xa84   : > { %3383 = vmatprep.subr.bf16.mxu0 %v3728_v0 }
 0xb51   : > { %v1687_v51 = vpop.f32.mrb[20].mxu0 }
 0xb52   : > { %v3367_v52 = vpop.f32.mrb[21].mxu0 }
 0xb53   : > { %v1690_v53 = vpop.f32.mrb[22].mxu0 }
 0xb54   : > { %v1698_v54 = vpack.c.bf16 %v1690_v53, %v1687_v51  ;;  %v3368_v55 = vpop.f32.mrb[23].mxu0 }
 0xb56   : > { %3374 = vmatmul.mubr.msk.bf16.vlgmr.msra.gmra.mrb[24].mxu0 %vm1097_vm8, %v1698_v54 }
 0xb57   : > { %3387 = vmatprep.mubr.msk.bf16.mxu0 %vm3729_vm0, %v3728_v0 }
 0xc29   : > { %v1748_v56 = vpop.f32.mrb[24].mxu0 }
 0xc2a   : > { %v1755_v57 = vadd.f32 %v1748_v56, %v3998_v46  ;;  %v3375_v58 = vpop.f32.mrb[25].mxu0  ;;  %v896_v46 = vld [vmem:[%s4551_s1 + $0x8] sm:$0xff] }
 0xc2b   : > { %v1751_v60 = vpop.f32.mrb[26].mxu0  ;;  %v4165_v9 = vpack.c.bf16 %v896_v46, %v895_v5 }
 0xc2c   : > { %v1756_v61 = vadd.f32 %v1751_v60, %v4000_v48  ;;  %v3376_v2 = vpop.f32.mrb[27].mxu0  ;;  %v1764_v3 = vadd.f32 %v3164_v59, %v1755_v57  ;;  %v3626_v48 = vld [vmem:[%s4482_s19] sm:$0xff]  }
 0xc2d   : > { %3384 = vmatpush3.bf16.msra.mxu0 %v3626_v48 }
 0xc2e   : > { %v1765_v4 = vadd.f32 %v3164_v59, %v1756_v61  ;;  %3385 = vmatprep.subr.bf16.mxu0 %v3728_v0 }
 0xc30   : > { %v1766_v6 = vpack.c.bf16 %v1765_v4, %v1764_v3 }
 0xc31   : > { %3386 = vmatpush3.bf16.msra.mxu0 %v3627_v11 }
 0xc32   : > { %3378 = vmatpush3.bf16.msra.mxu1 %v1766_v6  ;;  %3399 = vmatprep.subr.bf16.mxu0 %v3728_v0 }
 0xc33   : > { %3391 = vmatprep.subr.bf16.mxu1 %v3728_v0 }
 0xc35   : > { %3380 = vmatmul.mubr.msk.bf16.vlgmr.msra.gmra.mrb[16].mxu1 %vm910_vm1, %v4165_v9 }
 0xc36   : > { %3395 = vmatprep.mubr.msk.bf16.mxu1 %vm3729_vm0, %v3728_v0  ;;  %3392 = vmatpush3.bf16.msra.mxu1 %v3628_v12 }
 0xc37   : > { %3393 = vmatprep.subr.bf16.mxu1 %v3728_v0 }
 0xc3a   : > { %3394 = vmatpush3.bf16.msra.mxu1 %v3629_v16 }
 0xc3b   : > { %3405 = vmatprep.subr.bf16.mxu1 %v3728_v0 }
 0xc3d   : > { %3396 = vmatmul.mubr.msk.bf16.vlgmr.msra.gmra.mrb[20].mxu1 %vm1097_vm8, %v1885_v17 }
 0xc3e   : > { %3407 = vmatprep.mubr.msk.bf16.mxu1 %vm3729_vm0, %v3728_v0 }
 0xd08   : > { %v4195_v18 = vpop.f32.mrb[16].mxu1 }
 0xd09   : > { %v3381_v19 = vpop.f32.mrb[17].mxu1  ;;  %v4200_v21 = vsub.f32 %v1764_v3, %v4195_v18 }
 0xd0a   : > { %v4197_v20 = vpop.f32.mrb[18].mxu1 }
 0xd0b   : > { %v4203_v22 = vsub.f32 %v1765_v4, %v4197_v20  ;;  %v3382_v62 = vpop.f32.mrb[19].mxu1 }
 0xd0d   : > { %v1817_v23 = vpack.c.bf16 %v4203_v22, %v4200_v21 }
 0xd0f   : > { %3388 = vmatmul.mubr.msk.bf16.vlgmr.msra.gmra.mrb[28].mxu0 %vm1097_vm8, %v1817_v23 }
 0xd10   : > { %3401 = vmatprep.mubr.msk.bf16.mxu0 %vm3729_vm0, %v3728_v0  ;;  %v1942_v25 = vpop.f32.mrb[20].mxu1 }
 0xd11   : > { %v1943_v26 = vadd.f32 %v3170_v24, %v1942_v25  ;;  %v3397_v27 = vpop.f32.mrb[21].mxu1 }
 0xd12   : > { %v1945_v28 = vpop.f32.mrb[22].mxu1 }
 0xd13   : > { %v1946_v29 = vadd.f32 %v3170_v24, %v1945_v28  ;;  %v3398_v30 = vpop.f32.mrb[23].mxu1 }
 0xd15   : > { %v4213_v31 = vpack.c.bf16 %v1946_v29, %v1943_v26 }
 0xde2   : > { %v1874_v33 = vpop.f32.mrb[28].mxu0 }
 0xde3   : > { %v3389_v34 = vpop.f32.mrb[29].mxu0  ;;  %v1875_v38 = vadd.f32 %v3166_v32, %v1874_v33 }
 0xde4   : > { %v1877_v35 = vpop.f32.mrb[30].mxu0 }
 0xde5   : > { %v1878_v39 = vadd.f32 %v3166_v32, %v1877_v35  ;;  %v3390_v41 = vpop.f32.mrb[31].mxu0 }
 0xde7   : > { %v1949_v42 = vpack.c.bf16 %v1878_v39, %v1875_v38 }
 0xde9   : > { %3400 = vmatpush3.bf16.msra.mxu0 %v1949_v42  ;;  %3406 = vmatpush3.bf16.msra.mxu1 %v1949_v42 }
 0xdea   : > { %3411 = vmatprep.subr.bf16.mxu0 %v3728_v0  ;;  %3417 = vmatprep.subr.bf16.mxu1 %v3728_v0 }
 0xdec   : > { %3402 = vmatmul.mubr.msk.bf16.vlgmr.msra.gmra.mrb[32].mxu0 %vm910_vm1, %v4024_v63  ;;  %3408 = vmatmul.mubr.msk.bf16.vlgmr.msra.gmra.mrb[24].mxu1 %vm910_vm1, %v4029_v1 }
 0xded   : > { %3412 = vmatpush3.bf16.msra.mxu0 %v4213_v31  ;;  %3418 = vmatpush3.bf16.msra.mxu1 %v4213_v31 }
 0xdee   : > { %3413 = vmatprep.mubr.msk.bf16.mxu0 %vm3729_vm0, %v3728_v0  ;;  %3419 = vmatprep.mubr.msk.bf16.mxu1 %vm3729_vm0, %v3728_v0 }
 0xdf4   : > { %3414 = vmatmul.mubr.msk.bf16.vlgmr.msra.gmra.mrb[36].mxu0 %vm910_vm1, %v4024_v63  ;;  %3420 = vmatmul.mubr.msk.bf16.vlgmr.msra.gmra.mrb[28].mxu1 %vm910_vm1, %v4029_v1 }
 0xdf5   : > { %3427 = vmatprep.mubr.msk.f32.mxu0 %vm1342_vm10, %v4053_v36  ;;  %3434 = vmatprep.mubr.msk.f32.mxu1 %vm1342_vm10, %v4058_v37 }
 0xebf   : > { %v1985_v44 = vpop.f32.mrb[32].mxu0  ;;  %v2026_v45 = vpop.f32.mrb[24].mxu1 }
 0xec0   : > { %v3403_v49 = vpop.f32.mrb[33].mxu0  ;;  %v3409_v50 = vpop.f32.mrb[25].mxu1 }
 0xec1   : > { %v1988_v51 = vpop.f32.mrb[34].mxu0  ;;  %v2029_v52 = vpop.f32.mrb[26].mxu1 }
 0xec2   : > { %v3404_v53 = vpop.f32.mrb[35].mxu0  ;;  %v3410_v54 = vpop.f32.mrb[27].mxu1 }
 0xec7   : > { %v2067_v55 = vpop.f32.mrb[36].mxu0  ;;  %v2108_v56 = vpop.f32.mrb[28].mxu1 }
 0xec8   : > { %v2115_v63 = vmul.f32 %v2067_v55, %v1985_v44  ;;  %v2123_v57 = vmul.f32 %v2067_v55, %v2026_v45  ;;  %v2117_v58 = vmul.f32 %v2108_v56, %v2026_v45  ;;  %v2121_v1 = vmul.f32 %v2108_v56, %v1985_v44  ;;  %v3415_v59 = vpop.f32.mrb[37].mxu0  ;;  %v3421_v60 = vpop.f32.mrb[29].mxu1 }
 0xec9   : > { %v2070_v36 = vpop.f32.mrb[38].mxu0  ;;  %v2111_v61 = vpop.f32.mrb[30].mxu1 }
 0xeca   : > { %v2116_v2 = vmul.f32 %v2070_v36, %v1988_v51  ;;  %v2124_v37 = vmul.f32 %v2070_v36, %v2029_v52  ;;  %v2118_v3 = vmul.f32 %v2111_v61, %v2029_v52  ;;  %v2122_v4 = vmul.f32 %v2111_v61, %v1988_v51  ;;  %v3416_v5 = vpop.f32.mrb[39].mxu0  ;;  %v3422_v46 = vpop.f32.mrb[31].mxu1 }
 0xecb   : > { %v2119_v6 = vadd.f32 %v2117_v58, %v2115_v63  ;;  %v2125_v48 = vsub.f32 %v2121_v1, %v2123_v57 }
 0xecc   : > { %v2120_v11 = vadd.f32 %v2118_v3, %v2116_v2  ;;  %v2126_v12 = vsub.f32 %v2122_v4, %v2124_v37 }
 0xecd   : > { %v2127_v13 = vsel %vm1097_vm8, %v2119_v6, 0.0  ;;  %v2133_v15 = vsel %vm1097_vm8, %v2125_v48, 0.0 }
 0xece   : > { %2128 = vadd.xlane.f32.xlu0 %v2127_v13  ;;  %v2130_v16 = vsel %vm1332_vm9, %v2120_v11, 0.0  ;;  %v2136_v17 = vsel %vm1332_vm9, %v2126_v12, 0.0 }
 0xed2   : > { %2134 = vadd.xlane.f32.xlu0 %v2133_v15 }
 0xed6   : > { %2131 = vadd.xlane.f32.xlu0 %v2130_v16 }
 0xeda   : > { %2137 = vadd.xlane.f32.xlu0 %v2136_v17 }
 0xf5b   : > { %v2129_v19 = vpop.xlane.xlu0 %2128 }
 0xf5f   : > { %v2135_v62 = vpop.xlane.xlu0 %2134 }
 0xf63   : > { %v2132_v23 = vpop.xlane.xlu0 %2131 }
 0xf64   : > { %v3519_v24 = vpack.c.bf16 %v2132_v23, %v2129_v19 }
 0xf66   : > { %3521 = vmatprep.subr.msk.bf16.mxu0 %vm4064_vm13, %v3519_v24 }
 0xf67   : > { %3524 = vmatpush3.bf16.msk.msra.mxu0 %vm4064_vm13, %v3519_v24  ;;  %v2138_v25 = vpop.xlane.xlu0 %2137 }
 0xf68   : > { %v3525_v26 = vpack.c.bf16 %v2138_v25, %v2135_v62  ;;  %3437 = vmatprep.subr.bf16.mxu0 %v3728_v0 }
 0xf6a   : > { %3527 = vmatprep.subr.msk.bf16.mxu1 %vm4064_vm13, %v3525_v26  ;;  %3428 = vmatmul.mubr.msk.f32.vlgmr.msra.gmra.mrb[18].mxu0 %vm1342_vm10, %v4075_v43 }
 0xf6b   : > { %3530 = vmatpush3.bf16.msk.msra.mxu1 %vm4064_vm13, %v3525_v26  ;;  %3439 = vmatprep.mubr.msk.bf16.mxu0 %vm3729_vm0, %v3728_v0 }
 0xf6c   : > { %3443 = vmatprep.subr.bf16.mxu1 %v3728_v0 }
 0xf6e   : > { %3435 = vmatmul.mubr.msk.f32.vlgmr.msra.gmra.mrb[14].mxu1 %vm1342_vm10, %v4089_v47 }
 0xf6f   : > { %3447 = vmatprep.mubr.msk.bf16.mxu1 %vm3729_vm0, %v3728_v0 }
0x103d   : > { %v3429_v27 = vpop.f32.mrb[18].mxu0 }
0x103e   : > { %v2208_v28 = vpop.f32.mrb[19].mxu0 }
0x1041   : > { %v3436_v29 = vpop.f32.mrb[14].mxu1 }
0x1042   : > { %v2296_v30 = vsub.f32 %v3429_v27, %v3436_v29  ;;  %v2286_v32 = vpop.f32.mrb[15].mxu1 }
0x1043   : > { %v2295_v43 = vsub.f32 %v2208_v28, %v2286_v32 }
0x1044   : > { %v2298_v33 = vmul.f32 0.03125, %v2296_v30 }
0x1045   : > { %v2297_v40 = vmul.f32 0.03125, %v2295_v43 }
0x1046   : > { %v2300_v34 = vsel %vm1517_vm14, %v2298_v33, -inf }
0x1047   : > { %v2299_v35 = vsel %vm1517_vm14, %v2297_v40, -inf }
0x1048   : > { %v2301_v38 = vmax.f32 %v2299_v35, %v2300_v34 }
0x104a   : > { %2302 = vmax.xlane.f32.xlu1 %v2301_v38 }
0x10d7   : > { %v2303_v39 = vpop.xlane.xlu1 %2302 }
0x10d8   : > { %v2304_v41 = vrot.slane %v2303_v39, 4 }
0x10da   : > { %v2305_v47 = vmax.f32 %v2303_v39, %v2304_v41 }
0x10dc   : > { %v2306_v42 = vrot.slane %v2305_v47, 2 }
0x10de   : > { %v2307_v44 = vmax.f32 %v2305_v47, %v2306_v42 }
0x10e0   : > { %v2308_v45 = vrot.slane %v2307_v44, 1 }
0x10e2   : > { %v2309_v49 = vmax.f32 %v2307_v44, %v2308_v45 }
0x10e4   : > { %3539 = vpush %v2309_v49 }
0x1115   : > { %s3540_s1 = spop %3539 }
0x1116   : > { %v4262_v50 = vstv %s3540_s1 }
0x1117   : > { %vm2312_vm9 = vcmp.ge.f32.partialorder %v2297_v40, %v4262_v50  ;;  %vm2313_vm10 = vcmp.ge.f32.partialorder %v2298_v33, %v4262_v50 }
0x1118   : > { %v2314_v51 = vsel %vm2312_vm9, %v3970_v14, 16  ;;  %v2315_v52 = vsel %vm2313_vm10, %v4099_v7, 16 }
0x1119   : > { %v2316_v53 = vsel %vm1517_vm14, %v2314_v51, 2147483647  ;;  %v2317_v54 = vsel %vm1517_vm14, %v2315_v52, 2147483647 }
0x111a   : > { %vm2318_vm13 = vcmp.lt.s32.totalorder %v2316_v53, %v2317_v54 }
0x111b   : > { %v2319_v55 = vsel %vm2318_vm13, %v2316_v53, %v2317_v54 }
0x111c   : > { %v2321_v56 = vshra.s32 %v2319_v55, 16  ;;  %v2320_v57 = vand.u32 65535, %v2319_v55 }
0x111e   : > { %v2323_v63 = vcvt.s32.f32 %v2321_v56  ;;  %v2322_v1 = vcvt.s32.f32 %v2320_v57  ;;  %v3630_v57 = vld [vmem:[%s4486_s23] sm:$0xff]  }
0x111f   : > { %3444 = vmatpush3.bf16.msra.mxu1 %v3630_v57 }
0x1120   : > { %2324 = vmin.xlane.f32.xlu0 %v2323_v63  ;;  %3445 = vmatprep.subr.bf16.mxu1 %v3728_v0 }
0x11ad   : > { %v2325_v58 = vpop.xlane.xlu0 %2324 }
0x11ae   : > { %vm2326_vm6 = vcmp.eq.f32.partialorder %v2323_v63, %v2325_v58  ;;  %v2331_v60 = vcvt.f32.s32 %v2325_v58 }
0x11af   : > { %v2327_v59 = vsel %vm2326_vm6, %v2322_v1, inf }
0x11b0   : > { %2328 = vmin.xlane.f32.xlu0 %v2327_v59  ;;  %v2332_v61 = vshll.u32 %v2331_v60, 16 }
0x123d   : > { %v2329_v36 = vpop.xlane.xlu0 %2328 }
0x123e   : > { %v2330_v2 = vcvt.f32.s32 %v2329_v36 }
0x1240   : > { %v2333_v37 = vadd.s32 %v2332_v61, %v2330_v2 }
0x1242   : > { %v2334_v3 = vrot.slane %v2333_v37, 4 }
0x1244   : > { %vm2335_vm7 = vcmp.lt.s32.totalorder %v2333_v37, %v2334_v3 }
0x1245   : > { %v2336_v4 = vsel %vm2335_vm7, %v2333_v37, %v2334_v3 }
0x1246   : > { %v2337_v5 = vrot.slane %v2336_v4, 2 }
0x1248   : > { %vm2338_vm11 = vcmp.lt.s32.totalorder %v2336_v4, %v2337_v5 }
0x1249   : > { %v2339_v46 = vsel %vm2338_vm11, %v2336_v4, %v2337_v5 }
0x124a   : > { %v2340_v6 = vrot.slane %v2339_v46, 1 }
0x124c   : > { %vm2341_vm12 = vcmp.lt.s32.totalorder %v2339_v46, %v2340_v6 }
0x124d   : > { %v2342_v48 = vsel %vm2341_vm12, %v2339_v46, %v2340_v6 }
0x124e   : > { %3541 = vpush %v2342_v48 }
0x127f   : > { %s3542_s15 = spop %3541 }
0x1280   : > { %v2344_v11 = vstv %s3542_s15  ;;  %s4554_s15 = smov 64  }
0x1281   : > { %vm2345_vm15 = vcmp.eq.s32.totalorder %v3970_v14, %v2344_v11  ;;  %vm2346_vm2 = vcmp.eq.s32.totalorder %v4099_v7, %v2344_v11  ;;  %vm2405_vm6 = vcmp.eq.s32.totalorder %v4122_v8, %v2344_v11  ;;  %vm2406_vm7 = vcmp.eq.s32.totalorder %v4127_v10, %v2344_v11 }
0x1282   : > { %v2347_v12 = vsel %vm2345_vm15, -1e+30, %v2297_v40  ;;  %v2348_v13 = vsel %vm2346_vm2, -1e+30, %v2298_v33  ;;  %v3185_v51 = vsel %vm2406_vm7, 1.0, %v3728_v0 }
0x1283   : > { %v2349_v15 = vsel %vm1517_vm14, %v2347_v12, -inf  ;;  %v2350_v16 = vsel %vm1517_vm14, %v2348_v13, -inf }
0x1284   : > { %v2351_v17 = vmax.f32 %v2349_v15, %v2350_v16 }
0x1286   : > { %2352 = vmax.xlane.f32.xlu0 %v2351_v17 }
0x1313   : > { %v2353_v19 = vpop.xlane.xlu0 %2352 }
0x1314   : > { %v2354_v62 = vrot.slane %v2353_v19, 4 }
0x1316   : > { %v2355_v23 = vmax.f32 %v2353_v19, %v2354_v62 }
0x1318   : > { %v2356_v24 = vrot.slane %v2355_v23, 2 }
0x131a   : > { %v2357_v25 = vmax.f32 %v2355_v23, %v2356_v24 }
0x131c   : > { %v2358_v26 = vrot.slane %v2357_v25, 1 }
0x131e   : > { %v2359_v27 = vmax.f32 %v2357_v25, %v2358_v26 }
0x1320   : > { %3543 = vpush %v2359_v27 }
0x1351   : > { %s3544_s6 = spop %3543 }
0x1352   : > { %v2361_v28 = vstv %s3544_s6  ;;  %s4556_s6 = sld [smem:[#allocation23_spill]] }
0x1353   : > { %vm2362_vm9 = vcmp.ge.f32.partialorder %v2347_v12, %v2361_v28  ;;  %vm2363_vm10 = vcmp.ge.f32.partialorder %v2348_v13, %v2361_v28  ;;  %v2394_v29 = vmax.f32 %v4262_v50, %v2361_v28 }
0x1354   : > { %v2364_v30 = vsel %vm2362_vm9, %v3970_v14, 16  ;;  %v2365_v32 = vsel %vm2363_vm10, %v4099_v7, 16  ;;  %vm2688_vm10 = vcmask 523264  }
0x1355   : > { %v2395_v43 = vsub.f32 %v4262_v50, %v2394_v29  ;;  %v2398_v33 = vsub.f32 %v2361_v28, %v2394_v29  ;;  %v2366_v40 = vsel %vm1517_vm14, %v2364_v30, 2147483647  ;;  %v2367_v34 = vsel %vm1517_vm14, %v2365_v32, 2147483647  ;;  %v3192_v28 = vld [vmem:[%s4487_s24] ss:$0 sm:$0xff] }
0x1356   : > { %vm2368_vm13 = vcmp.lt.s32.totalorder %v2366_v40, %v2367_v34  ;;  %v3184_v50 = vsel %vm2405_vm6, 1.0, %v3728_v0 }
0x1357   : > { %v2396_v35 = vmul.f32 1.442695, %v2395_v43  ;;  %v2399_v38 = vmul.f32 1.442695, %v2398_v33  ;;  %v2369_v39 = vsel %vm2368_vm13, %v2366_v40, %v2367_v34  ;;  %v3634_v34 = vld [vmem:[%s4489_s26] sm:$0xff]  }
0x1358   : > { %v2371_v41 = vshra.s32 %v2369_v39, 16  ;;  %v2370_v54 = vand.u32 65535, %v2369_v39 }
0x1359   : > { %3652 = vpow2.f32 %v2396_v35  ;;  %v3635_v35 = vld [vmem:[%s4489_s26 + $0x8] sm:$0xff]  }
0x135a   : > { %3654 = vpow2.f32 %v2399_v38  ;;  %v2373_v47 = vcvt.s32.f32 %v2371_v41  ;;  %v2372_v56 = vcvt.s32.f32 %v2370_v54 }
0x135c   : > { %2374 = vmin.xlane.f32.xlu0 %v2373_v47 }
0x1363   : > { %v3653_v42 = vpop.eup %3652 }
0x1364   : > { %v3655_v44 = vpop.eup %3654 }
0x1365   : > { %v2401_v45 = vadd.f32 %v3655_v44, %v3653_v42 }
0x1367   : > { %3656 = vrcp.f32 %v2401_v45 }
0x1371   : > { %v3657_v7 = vpop.eup %3656 }
0x1372   : > { %v2404_v49 = vmul.f32 %v3657_v7, %v3653_v42  ;;  %v2415_v6 = vmul.f32 %v3657_v7, %v3655_v44 }
0x1374   : > { %v2411_v52 = vmul.f32 %v3184_v50, %v2404_v49  ;;  %v2412_v53 = vmul.f32 %v3185_v51, %v2404_v49  ;;  %v3636_v50 = vld [vmem:[%s4489_s26 + $0x10] sm:$0xff]  }
0x13e9   : > { %v2375_v55 = vpop.xlane.xlu0 %2374 }
0x13ea   : > { %vm2376_vm14 = vcmp.eq.f32.partialorder %v2373_v47, %v2375_v55  ;;  %v2381_v58 = vcvt.f32.s32 %v2375_v55 }
0x13eb   : > { %v2377_v63 = vsel %vm2376_vm14, %v2372_v56, inf }
0x13ec   : > { %2378 = vmin.xlane.f32.xlu0 %v2377_v63  ;;  %v2382_v59 = vshll.u32 %v2381_v58, 16 }
0x1402   : > { %2429 = vrot.lane.b32.xlu0 %v4213_v31, %s4553_s30  ;;  %s866_s30 = sand.u32 1, %s3718_s5  }
0x1403   : > { %s3131_s9 = sshll.u32 %s866_s30, 3 }
0x1404   : > { %s868_s0 = scalar_lea.vmem [#allocation2], %s3131_s9 }
0x1405   : > { %s3044_s11 = sshll.u32 %s868_s0, 4  ;;  %s4422_s11 = int_to_ptr.vmem [resolvable:$true] %s3044_s11 }
0x1479   : > { %v2379_v1 = vpop.xlane.xlu0 %2378 }
0x147a   : > { %v2380_v60 = vcvt.f32.s32 %v2379_v1 }
0x147c   : > { %v2383_v36 = vadd.s32 %v2382_v59, %v2380_v60 }
0x147d   : > { %v2430_v61 = vpop.permute.xlu0 %2429 }
0x147e   : > { %v2384_v2 = vrot.slane %v2383_v36, 4  ;;  %3438 = vmatpush3.bf16.msra.mxu0 %v2430_v61 }
0x147f   : > { %3451 = vmatprep.subr.bf16.mxu0 %v3728_v0 }
0x1480   : > { %vm2385_vm11 = vcmp.lt.s32.totalorder %v2383_v36, %v2384_v2 }
0x1481   : > { %v2386_v37 = vsel %vm2385_vm11, %v2383_v36, %v2384_v2 }
0x1482   : > { %v2387_v31 = vrot.slane %v2386_v37, 2 }
0x1484   : > { %vm2388_vm12 = vcmp.lt.s32.totalorder %v2386_v37, %v2387_v31 }
0x1485   : > { %v2389_v3 = vsel %vm2388_vm12, %v2386_v37, %v2387_v31 }
0x1486   : > { %v2390_v4 = vrot.slane %v2389_v3, 1 }
0x1488   : > { %vm2391_vm15 = vcmp.lt.s32.totalorder %v2389_v3, %v2390_v4 }
0x1489   : > { %v2392_v5 = vsel %vm2391_vm15, %v2389_v3, %v2390_v4 }
0x148a   : > { %3545 = vpush %v2392_v5 }
0x14bb   : > { %s3546_s29 = spop %3545 }
0x14bc   : > { %v2416_v46 = vstv %s3546_s29  ;;  %s3217_s29 = sshll.u32 %s3904_s3, 7  ;;  %s3031_s3 = scalar_lea.sflag [#allocation3], %s866_s30 }
0x14bd   : > { %vm2417_vm2 = vcmp.eq.s32.totalorder %v4122_v8, %v2416_v46  ;;  %vm2418_vm9 = vcmp.eq.s32.totalorder %v4127_v10, %v2416_v46  ;;  %v3631_v8 = vld [vmem:[%s4486_s23 + $0x8] sm:$0xff]   ;;  %s4420_s1 = scalar_lea.hbm %s4491_s28, %s3217_s29 }
0x14be   : > { %v3186_v48 = vsel %vm2417_vm2, 1.0, %v3728_v0  ;;  %v3187_v11 = vsel %vm2418_vm9, 1.0, %v3728_v0  ;;  %3446 = vmatpush3.bf16.msra.mxu1 %v3631_v8 }
0x14bf   : > { %v2423_v12 = vmul.f32 %v3186_v48, %v2415_v6  ;;  %v2424_v13 = vmul.f32 %v3187_v11, %v2415_v6  ;;  %3457 = vmatprep.subr.bf16.mxu1 %v3728_v0 }
0x14c1   : > { %v2425_v15 = vadd.f32 %v2423_v12, %v2411_v52  ;;  %v2426_v16 = vadd.f32 %v2424_v13, %v2412_v53 }
0x14c3   : > { %v2427_v17 = vpack.c.bf16 %v2426_v16, %v2425_v15 }
0x14c5   : > { %3440 = vmatmul.mubr.msk.bf16.vlgmr.msra.gmra.mrb[40].mxu0 %vm910_vm1, %v2427_v17 }
0x14c6   : > { %3453 = vmatprep.mubr.msk.bf16.mxu0 %vm3729_vm0, %v3728_v0 }
0x1598   : > { %v2469_v10 = vpop.f32.mrb[40].mxu0 }
0x1599   : > { %v3441_v19 = vpop.f32.mrb[41].mxu0 }
0x159a   : > { %v2472_v62 = vpop.f32.mrb[42].mxu0 }
0x159b   : > { %v2480_v23 = vpack.c.bf16 %v2472_v62, %v2469_v10  ;;  %v3442_v24 = vpop.f32.mrb[43].mxu0  ;;  %v3638_v62 = vld [vmem:[%s4490_s27] sm:$0xff]  }
0x159d   : > { %3448 = vmatmul.mubr.msk.bf16.vlgmr.msra.gmra.mrb[32].mxu1 %vm1097_vm8, %v2480_v23  ;;  %v3639_v23 = vld [vmem:[%s4490_s27 + $0x8] sm:$0xff]  }
0x159e   : > { %3461 = vmatprep.mubr.msk.bf16.mxu1 %vm3729_vm0, %v3728_v0 }
0x1670   : > { %v2530_v25 = vpop.f32.mrb[32].mxu1 }
0x1671   : > { %v2537_v26 = vadd.f32 %v2530_v25, %v4200_v21  ;;  %v3449_v27 = vpop.f32.mrb[33].mxu1  ;;  %v3632_v21 = vld [vmem:[%s4488_s25] sm:$0xff]  }
0x1672   : > { %v2533_v29 = vpop.f32.mrb[34].mxu1  ;;  %3458 = vmatpush3.bf16.msra.mxu1 %v3632_v21  ;;  %v3642_v21 = vld [vmem:[%s4490_s27 + $0x20] sm:$0xff]  }
0x1673   : > { %v2538_v30 = vadd.f32 %v2533_v29, %v4203_v22  ;;  %v3450_v32 = vpop.f32.mrb[35].mxu1  ;;  %v2546_v43 = vadd.f32 %v3192_v28, %v2537_v26  ;;  %3459 = vmatprep.subr.bf16.mxu1 %v3728_v0  ;;  %v3633_v22 = vld [vmem:[%s4488_s25 + $0x8] sm:$0xff]  }
0x1675   : > { %v2547_v33 = vadd.f32 %v3192_v28, %v2538_v30 }
0x1676   : > { %3460 = vmatpush3.bf16.msra.mxu1 %v3633_v22  ;;  %v3643_v22 = vld [vmem:[%s4490_s27 + $0x28] sm:$0xff]  }
0x1677   : > { %v2548_v40 = vpack.c.bf16 %v2547_v33, %v2546_v43  ;;  %3477 = vmatprep.subr.bf16.mxu1 %v3728_v0 }
0x1679   : > { %3452 = vmatpush3.bf16.msra.mxu0 %v2548_v40  ;;  %v3641_v40 = vld [vmem:[%s4490_s27 + $0x18] sm:$0xff]  }
0x167a   : > { %3465 = vmatprep.subr.bf16.mxu0 %v3728_v0 }
0x167c   : > { %3454 = vmatmul.mubr.msk.bf16.vlgmr.msra.gmra.mrb[44].mxu0 %vm910_vm1, %v4165_v9 }
0x167d   : > { %3473 = vmatprep.mubr.msk.bf16.mxu0 %vm3729_vm0, %v3728_v0  ;;  %3466 = vmatpush3.bf16.msra.mxu0 %v3634_v34  ;;  %v3644_v34 = vld [vmem:[%s4476_s13] sm:$0xff]  }
0x167e   : > { %3467 = vmatprep.subr.bf16.mxu0 %v3728_v0 }
0x1681   : > { %3468 = vmatpush3.bf16.msra.mxu0 %v3635_v35  ;;  %v3645_v35 = vld [vmem:[%s4476_s13 + $0x8] sm:$0xff]  }
0x1682   : > { %3469 = vmatprep.subr.bf16.mxu0 %v3728_v0 }
0x1685   : > { %3470 = vmatpush3.bf16.msra.mxu0 %v3636_v50 }
0x1686   : > { %3471 = vmatprep.subr.bf16.mxu0 %v3728_v0 }
0x174f   : > { %v2583_v38 = vpop.f32.mrb[44].mxu0 }
0x1750   : > { %v2779_v39 = vadd.f32 %v2583_v38, %v4195_v18  ;;  %v3455_v41 = vpop.f32.mrb[45].mxu0  ;;  %v2590_v42 = vsub.f32 %v2546_v43, %v2583_v38  ;;  %v3637_v18 = vld [vmem:[%s4489_s26 + $0x18] sm:$0xff]  }
0x1751   : > { %v2586_v47 = vpop.f32.mrb[46].mxu0  ;;  %3472 = vmatpush3.bf16.msra.mxu0 %v3637_v18 }
0x1752   : > { %v2591_v44 = vsub.f32 %v2547_v33, %v2586_v47  ;;  %v2780_v45 = vadd.f32 %v2586_v47, %v4197_v20  ;;  %v3456_v7 = vpop.f32.mrb[47].mxu0  ;;  %3499 = vmatprep.subr.bf16.mxu0 %v3728_v0  ;;  %v3640_v33 = vld [vmem:[%s4490_s27 + $0x10] sm:$0xff]  }
0x1754   : > { %v2596_v49 = vpack.c.bf16 %v2591_v44, %v2590_v42 }
0x1756   : > { %3462 = vmatmul.mubr.msk.bf16.vlgmr.msra.gmra.mrb[36].mxu1 %vm1097_vm8, %v2596_v49 }
0x1757   : > { %3479 = vmatprep.mubr.msk.bf16.mxu1 %vm3729_vm0, %v3728_v0 }
0x1829   : > { %v2646_v20 = vpop.f32.mrb[36].mxu1 }
0x182a   : > { %v3463_v51 = vpop.f32.mrb[37].mxu1  ;;  %v2653_v53 = vmax.f32 %v2646_v20, 0.0 }
0x182b   : > { %v2649_v52 = vpop.f32.mrb[38].mxu1 }
0x182c   : > { %v2654_v54 = vmax.f32 %v2649_v52, 0.0  ;;  %v3464_v55 = vpop.f32.mrb[39].mxu1 }
0x182e   : > { %v2663_v56 = vpack.c.bf16 %v2654_v54, %v2653_v53  ;;  %v3210_v53 = vld [vmem:[%s4555_s10] ss:$0 sm:$0xff] }
0x1830   : > { %3474 = vmatmul.mubr.msk.bf16.vlgmr.msra.gmra.mrb[48].mxu0 %vm2688_vm10, %v2663_v56 }
0x1831   : > { %3503 = vmatprep.mubr.msk.bf16.mxu0 %vm3729_vm0, %v3728_v0  ;;  %3500 = vmatpush3.bf16.msra.mxu0 %v3644_v34 }
0x1832   : > { %3501 = vmatprep.subr.bf16.mxu0 %v3728_v0 }
0x1835   : > { %3502 = vmatpush3.bf16.msra.mxu0 %v3645_v35 }
0x1903   : > { %v2726_v63 = vpop.f32.mrb[48].mxu0 }
0x1904   : > { %v3475_v57 = vpop.f32.mrb[49].mxu0  ;;  %v2733_v1 = vadd.f32 %v2726_v63, %v2590_v42 }
0x1905   : > { %v2729_v58 = vpop.f32.mrb[50].mxu0 }
0x1906   : > { %v2734_v59 = vadd.f32 %v2729_v58, %v2591_v44  ;;  %v3476_v60 = vpop.f32.mrb[51].mxu0 }
0x1908   : > { %v2735_v36 = vpack.c.bf16 %v2734_v59, %v2733_v1 }
0x190a   : > { %3478 = vmatpush3.bf16.msra.mxu1 %v2735_v36 }
0x190b   : > { %3483 = vmatprep.subr.bf16.mxu1 %v3728_v0 }
0x190d   : > { %3480 = vmatmul.mubr.msk.bf16.vlgmr.msra.gmra.mrb[40].mxu1 %vm910_vm1, %v4165_v9 }
0x190e   : > { %3495 = vmatprep.mubr.msk.bf16.mxu1 %vm3729_vm0, %v3728_v0  ;;  %3484 = vmatpush3.bf16.msra.mxu1 %v3638_v62  ;;  %vm2860_vm0 = vcmask 785408  }
0x190f   : > { %3485 = vmatprep.subr.bf16.mxu1 %v3728_v0 }
0x1912   : > { %3486 = vmatpush3.bf16.msra.mxu1 %v3639_v23 }
0x1913   : > { %3487 = vmatprep.subr.bf16.mxu1 %v3728_v0 }
0x1916   : > { %3488 = vmatpush3.bf16.msra.mxu1 %v3640_v33 }
0x1917   : > { %3489 = vmatprep.subr.bf16.mxu1 %v3728_v0 }
0x191a   : > { %3490 = vmatpush3.bf16.msra.mxu1 %v3641_v40 }
0x191b   : > { %3491 = vmatprep.subr.bf16.mxu1 %v3728_v0 }
0x191e   : > { %3492 = vmatpush3.bf16.msra.mxu1 %v3642_v21 }
0x191f   : > { %3493 = vmatprep.subr.bf16.mxu1 %v3728_v0 }
0x1922   : > { %3494 = vmatpush3.bf16.msra.mxu1 %v3643_v22 }
0x19e0   : > { %v2770_v61 = vpop.f32.mrb[40].mxu1 }
0x19e1   : > { %v2777_v2 = vsub.f32 %v2733_v1, %v2770_v61  ;;  %v2781_v37 = vadd.f32 %v2779_v39, %v2770_v61  ;;  %v3481_v31 = vpop.f32.mrb[41].mxu1  ;;  %v3211_v1 = vld [vmem:[%s4556_s6] ss:$0 sm:$0xff]  ;;  %s3737_s6 = smov [#allocation2]  }
0x19e2   : > { %v2773_v3 = vpop.f32.mrb[42].mxu1  ;;  %s3668_s9 = sshll.u32 %s3737_s6, 4  ;;  %s3669_s9 = int_to_ptr.vmem [resolvable:$false] %s3668_s9 }
0x19e3   : > { %v2782_v4 = vadd.f32 %v2780_v45, %v2773_v3  ;;  %v3482_v5 = vpop.f32.mrb[43].mxu1  ;;  %v2783_v46 = vrot.slane %v2781_v37, 7  ;;  %v2778_v6 = vsub.f32 %v2734_v59, %v2773_v3  ;;  %v2907_v48 = vsel %vm1097_vm8, %v2777_v2, 0.0  ;;  %s3670_s4 = scalar_lea.vmem %s3669_s9, 256  ;;  %p3671_p0 = scmp.lt.s32.totalorder %s4422_s11, %s3669_s9 }
0x19e4   : > { %v2787_v11 = vrot.slane %v2781_v37, 1  ;;  %2908 = vadd.xlane.f32.xlu1 %v2907_v48 }
0x19e5   : > { %v2784_v12 = vrot.slane %v2782_v4, 7  ;;  %v2788_v13 = vrot.slane %v2782_v4, 1  ;;  %v3610_v15 = vpack.i.bf16 %v2782_v4, %v2781_v37  ;;  %v2910_v10 = vsel %vm1097_vm8, %v2778_v6, 0.0 }
0x19e7   : > { %v2789_v9 = vsel %vm974_vm3, %v2787_v11, %v2788_v13  ;;  %v2790_v16 = vsel %vm974_vm3, %v2788_v13, %v2787_v11  ;;  %v2785_v17 = vsel %vm970_vm4, %v2783_v46, %v2784_v12  ;;  %v2786_v8 = vsel %vm970_vm4, %v2784_v12, %v2783_v46 }
0x19e8   : > { %v3615_v19 = vpack.i.bf16 %v2790_v16, %v2789_v9  ;;  %2911 = vadd.xlane.f32.xlu1 %v2910_v10  ;;  %v3663_v16 = vld [vmem:[%s3951_s8 + $0x8] sm:$0xff] }
0x1a71   : > { %v2909_v14 = vpop.xlane.xlu1 %2908 }
0x1a72   : > { %v2914_v24 = vmul.f32 0.03125, %v2909_v14 }
0x1a74   : > { %v2916_v25 = vsub.f32 %v2777_v2, %v2914_v24 }
0x1a75   : > { %v2912_v26 = vpop.xlane.xlu1 %2911 }
0x1a76   : > { %v2915_v27 = vmul.f32 0.03125, %v2912_v26  ;;  %v2918_v28 = vmul.f32 %v2916_v25, %v2916_v25 }
0x1a78   : > { %v2917_v29 = vsub.f32 %v2778_v6, %v2915_v27  ;;  %v2920_v30 = vsel %vm1097_vm8, %v2918_v28, 0.0 }
0x1a79   : > { %2921 = vadd.xlane.f32.xlu0 %v2920_v30 }
0x1a7a   : > { %v2919_v32 = vmul.f32 %v2917_v29, %v2917_v29 }
0x1a7c   : > { %v2923_v43 = vsel %vm1097_vm8, %v2919_v32, 0.0  ;;  %v3212_v32 = vld [vmem:[%s4477_s14] ss:$0 sm:$0xff] }
0x1a7d   : > { %2924 = vadd.xlane.f32.xlu1 %v2923_v43 }
0x1a8e   : > { %3611 = vrot.lane.b32.xlu1 %v3610_v15, %s3736_s7  ;;  %v3662_v15 = vld [vmem:[%s3951_s8] sm:$0xff] }
0x1a8f   : > { %v956_v9 = vsel %vm955_vm5, %v3662_v15, 0.0 }
0x1a92   : > { %3616 = vrot.lane.b32.xlu1 %v3615_v19, %s4554_s15  ;;  %s3664_s15 = scalar_lea.vmem %s4422_s11, 128 }
0x1a93   : > { %p3665_p11 = scmp.ne.s32.totalorder %s4422_s11, %s3664_s15  ;;  %p3672_p1 = scmp.lt.s32.totalorder %s3670_s4, %s3664_s15 }
0x1a95   : > { %p3666_p12 = pnand %p3665_p11, %p3921_p5  ;;  %p3673_p2 = por %p3672_p1, %p3671_p0 }
0x1a97   : > { %p3667_p13 = pneg %p3666_p12 }
0x1a99   : > { %p3674_p3 = pnand %p3673_p2, %p3667_p13 }
0x1b06   : > { %v2922_v38 = vpop.xlane.xlu0 %2921 }
0x1b07   : > { %v2926_v39 = vmul.f32 0.03125, %v2922_v38 }
0x1b09   : > { %v2928_v41 = vadd.f32 1e-05, %v2926_v39 }
0x1b0a   : > { %v2925_v47 = vpop.xlane.xlu1 %2924 }
0x1b0b   : > { %3658 = vrsqrt.f32 %v2928_v41  ;;  %v2927_v42 = vmul.f32 0.03125, %v2925_v47 }
0x1b0d   : > { %v2929_v44 = vadd.f32 1e-05, %v2927_v42 }
0x1b0e   : > { %v3612_v45 = vpop.permute.xlu1 %3611 }
0x1b0f   : > { %3660 = vrsqrt.f32 %v2929_v44  ;;  %v3614_v7 = vunpack.i.h.bf16 %v3612_v45  ;;  %v3613_v49 = vunpack.i.l.bf16 %v3612_v45 }
0x1b11   : > { %v2808_v51 = vsel %vm1097_vm8, %v2785_v17, %v3614_v7  ;;  %v2807_v52 = vsel %vm1097_vm8, %v2786_v8, %v3613_v49  ;;  %v957_v17 = vsel %vm955_vm5, %v3663_v16, 0.0 }
0x1b12   : > { %v3617_v50 = vpop.permute.xlu1 %3616  ;;  %v958_v8 = vadd.f32 %v957_v17, %v956_v9 }
0x1b13   : > { %v3619_v18 = vunpack.i.h.bf16 %v3617_v50  ;;  %v3618_v20 = vunpack.i.l.bf16 %v3617_v50 }
0x1b14   : > { %v959_v10 = vrot.slane %v958_v8, 4 }
0x1b15   : > { %v3659_v0 = vpop.eup %3658  ;;  %v2809_v54 = vsel %vm2688_vm10, %v2807_v52, %v3618_v20  ;;  %v2810_v55 = vsel %vm2688_vm10, %v2808_v51, %v3619_v18 }
0x1b16   : > { %v2932_v56 = vmul.f32 %v3659_v0, %v2916_v25  ;;  %v2823_v63 = vpack.c.bf16 %v2810_v55, %v2809_v54  ;;  %v960_v19 = vadd.f32 %v959_v10, %v958_v8 }
0x1b18   : > { %v2940_v57 = vmul.f32 %v3210_v53, %v2932_v56  ;;  %3496 = vmatmul.mubr.msk.bf16.vlgmr.msra.gmra.mrb[44].mxu1 %vm2860_vm0, %v2823_v63  ;;  %v961_v62 = vrot.slane %v960_v19, 2 }
0x1b19   : > { %v3661_v58 = vpop.eup %3660 }
0x1b1a   : > { %v2933_v59 = vmul.f32 %v3661_v58, %v2917_v29  ;;  %v2948_v36 = vadd.f32 %v3211_v1, %v2940_v57  ;;  %v962_v23 = vadd.f32 %v961_v62, %v960_v19 }
0x1b1c   : > { %v2941_v60 = vmul.f32 %v3210_v53, %v2933_v59  ;;  %v2950_v2 = vsel %vm1097_vm8, %v2948_v36, 0.0  ;;  %v963_v14 = vrot.slane %v962_v23, 1 }
0x1b1e   : > { %v2949_v61 = vadd.f32 %v3211_v1, %v2941_v60  ;;  %v964_v24 = vadd.f32 %v963_v14, %v962_v23 }
0x1b20   : > { %v2951_v37 = vsel %vm1097_vm8, %v2949_v61, 0.0  ;;  %v966_v25 = vmul.f32 0.0625, %v964_v24 }
0x1b21   : > { %v2952_v31 = vadd.f32 %v2951_v37, %v2950_v2 }
0x1b23   : > { %v2953_v3 = vrot.slane %v2952_v31, 4 }
0x1b25   : > { %v2954_v4 = vadd.f32 %v2953_v3, %v2952_v31 }
0x1b27   : > { %v2955_v5 = vrot.slane %v2954_v4, 2 }
0x1b29   : > { %v2956_v46 = vadd.f32 %v2955_v5, %v2954_v4 }
0x1b2b   : > { %v2957_v6 = vrot.slane %v2956_v46, 1 }
0x1b2d   : > { %v2958_v48 = vadd.f32 %v2957_v6, %v2956_v46 }
0x1b2f   : > { %v2959_v11 = vmul.f32 0.0625, %v2958_v48 }
0x1b31   : > { %v2960_v12 = vsub.f32 %v2949_v61, %v2959_v11 }
0x1b33   : > { %v2965_v13 = vpack.c.bf16 %v2960_v12, %v2960_v12 }
0x1b35   : > { %3504 = vmatmul.mubr.msk.bf16.vlgmr.msra.gmra.mrb[52].mxu0 %vm1097_vm8, %v2965_v13 }
0x1beb   : > { %v2898_v26 = vpop.f32.mrb[44].mxu1 }
0x1bec   : > { %v3497_v27 = vpop.f32.mrb[45].mxu1 }
0x1bed   : > { %v2900_v28 = vpop.f32.mrb[46].mxu1 }
0x1bee   : > { %v2904_v29 = vadd.f32 %v2900_v28, %v966_v25  ;;  %v3498_v30 = vpop.f32.mrb[47].mxu1 }
0x1c08   : > { %v3022_v43 = vpop.f32.mrb[52].mxu0 }
0x1c09   : > { %v3023_v33 = vadd.f32 %v3212_v32, %v3022_v43  ;;  %v3505_v40 = vpop.f32.mrb[53].mxu0 }
0x1c0a   : > { %v3025_v21 = vpop.f32.mrb[54].mxu0 }
0x1c0b   : > { %v3028_v22 = vadd.f32 %v3023_v33, %v2904_v29  ;;  %v3506_v34 = vpop.f32.mrb[55].mxu0 }
0x1c0d   : > { %3029 = vst.msk [vmem:[%s868_s0] sm:$0xff] %vm955_vm5, %v3028_v22 }
0x1c0e   : > { %3677 = shalt.err (!%p3674_p3)
}
0x1c0f   : > { %s3678_s30 = scalar_lea.hbm %s4420_s1, 128  ;;  %s3682_s0 = scalar_lea.hbm %s4491_s28, 256 }
0x1c10   : > { %p3679_p4 = scmp.ne.s32.totalorder %s4420_s1, %s3678_s30  ;;  %p3683_p9 = scmp.lt.u32.totalorder %s4420_s1, %s4491_s28 }
0x1c11   : > { %p3684_p10 = scmp.lt.u32.totalorder %s3682_s0, %s3678_s30  ;;  %p3686_p12 = scmp.lt.u32.totalorder %s3678_s30, %s4420_s1 }
0x1c12   : > { %p3680_p7 = pnand %p3679_p4, %p3921_p5 }
0x1c13   : > { %p3685_p11 = por %p3684_p10, %p3683_p9 }
0x1c14   : > { %p3681_p8 = pneg %p3680_p7 }
0x1c15   : > { %p3687_p13 = por %p3686_p12, %p3685_p11 }
0x1c17   : > { %p3688_p0 = pnand %p3687_p13, %p3681_p8 }
0x1c19   : > { %3691 = shalt.err (!%p3688_p0)
}
0x1c1a   : > { %3547 = dma.vmem_to_hbm [thread:$0]  (%p3921_p5), %s4422_s11, 128, %s4420_s1, %s3031_s3  }
0x1c1b PF: > { %s4557_s15 = sld [smem:[#allocation7_spill]]  ;;  %s4558_s6 = sld [smem:[#allocation5_spill]] }
0x1c21   : > { %p3553_p1 = scmp.ge.s32.totalorder %s4557_s15, 2  ;;  %s3056_s4 = sand.u32 1, %s4558_s6  }
0x1c22   : > { %s3057_s8 = scalar_lea.sflag [#allocation3], %s3056_s4 }
0x1c23   : > { %p3550_p2 = pnand %p3553_p1, %p3925_p6 }
0x1c25   : > { %3709 = dma.done.wait (!%p3550_p2), %s3057_s8, 128  }
0x1c26   : > { %3711 = vsyncadd (!%p3550_p2), %s3057_s8, 4294967168  ;;  %s4560_s30 = sld [smem:[#allocation8_spill]]  ;;  %s4561_s29 = sld [smem:[#allocation6_spill]] }
0x1c27   : > { %s4562_s9 = sld [smem:[#allocation9_spill]]  ;;  %s4563_s8 = smov %s3718_s5 }
0x1c2c   : > { %p38_p3 = scmp.ge.s32.totalorder %s4560_s30, 4   ;;  %s4564_s5 = smov %s4561_s29 }
0x1c2e   :  { %40 = sbr.rel (!%p38_p3) target bundleno = 18 (0x12), region = 173 }
0x1c35   :  { %3062 = vsyncpa [#allocation3], 1 }
0x1c36   :  { %3064 = vsyncpa [#allocation3 + $0x1], 1 }

</bundles_post_ra>
